<compile_context>
chip_gen: v5e
topology: v5e:2x2
jax: 0.10.0
libtpu: 0.0.40
codegen_flags: <defaults>
</compile_context>

<pallas_src>
import functools

import jax
import jax.numpy as jnp
from jax import lax
from jax.experimental import pallas as pl
from jax.experimental.pallas import tpu as pltpu


_VMEM_SPEC = pl.BlockSpec(memory_space=pltpu.MemorySpace.VMEM)

_ONEHOT_WIDTH = 128          # combined one-hot lane width (lane-dense)
_WORD_ROWS = _ONEHOT_WIDTH - 2  # rows [0:126] word ids, rows [126:128] mask ids
_LABEL_PAD = 128             # padded label lanes for lane-dense logits store


# ----------------------------------------------------------------------------
# Fused Pallas kernel: embeddings + n_layers of BiLSTM + linear head + argmax
# ----------------------------------------------------------------------------
def _make_bio_kernel(n_layers, seq_len, batch_padded, hidden_dim, n_labels):
    T, Bp, H = seq_len, batch_padded, hidden_dim
    G = 4 * H                                   # gate width per direction
    R = T * Bp                                  # rows, time-major: row = t*Bp + b
    LP = _LABEL_PAD
    # inputs: ids, layer0 (4 refs), layers 1.. (5 refs each), head (3 refs)
    n_in = 1 + 4 + 5 * (n_layers - 1) + 3

    def lstm_cell(gates, c_prev):
        # Gate column order is [i | f | o | g] (reordered at pack time), so one
        # sigmoid pass covers a contiguous 3H slice and tanh the trailing H.
        # sigmoid(z) == 0.5 * (tanh(z/2) + 1)
        s = 0.5 * (jnp.tanh(0.5 * gates[:, : 3 * H]) + 1.0)
        i_g = s[:, 0:H]
        f_g = s[:, H:2 * H]
        o_g = s[:, 2 * H:3 * H]
        g_g = jnp.tanh(gates[:, 3 * H:])
        c_new = f_g * c_prev + i_g * g_g
        h_new = o_g * jnp.tanh(c_new)
        return h_new, c_new

    def run_layer(xw, whh_f, whh_b):
        # xw: (R, 8H) f32 precomputed input projection (+ bias) for BOTH
        # directions (cols [0:4H] fwd, [4H:8H] bwd).  Only the recurrent matmul
        # + gate math stay on the serial critical path.  Per-step slices are
        # exact (8, 128) vregs thanks to Bp=8 / 4H=128.
        zero = jnp.zeros((Bp, H), jnp.float32)
        h_f, c_f, h_b, c_b = zero, zero, zero, zero
        ys_f = [None] * T
        ys_b = [None] * T
        for t in range(T):                      # T is small & static: full unroll
            tb = T - 1 - t
            g_f = xw[t * Bp:(t + 1) * Bp, 0:G] + jnp.dot(
                h_f.astype(jnp.bfloat16), whh_f,
                preferred_element_type=jnp.float32)
            g_b = xw[tb * Bp:(tb + 1) * Bp, G:2 * G] + jnp.dot(
                h_b.astype(jnp.bfloat16), whh_b,
                preferred_element_type=jnp.float32)
            h_f, c_f = lstm_cell(g_f, c_f)
            h_b, c_b = lstm_cell(g_b, c_b)
            ys_f[t] = h_f
            ys_b[tb] = h_b
        # Keep layer outputs in vregs (no VMEM scratch round-trip).
        return jnp.concatenate(ys_f, axis=0), jnp.concatenate(ys_b, axis=0)

    def kernel(*refs):
        ids_ref = refs[0]                       # (R, 2) int32
        logits_ref = refs[n_in]                 # (R, LP) f32  (lane-dense)
        pred_ref = refs[n_in + 1]               # (R, 1) int32

        # ---- in-kernel embedding via lane-dense combined one-hot -----------
        ids = ids_ref[...]
        w_id = ids[:, 0:1]                      # word id in [0, 126)
        m_id = ids[:, 1:2]                      # mask id in {0, 1}
        lane = lax.broadcasted_iota(jnp.int32, (R, _ONEHOT_WIDTH), 1)
        hit = jnp.logical_or(lane == w_id, lane == (_WORD_ROWS + m_id))
        onehot = jnp.where(hit, 1.0, 0.0).astype(jnp.bfloat16)   # (R, 128)

        # ---- layer 0: (embed tables @ W_ih0) pre-folded into proj0 ---------
        proj0_ref, b0_ref, whh0f_ref, whh0b_ref = refs[1:5]
        xw = jnp.dot(onehot, proj0_ref[...],
                     preferred_element_type=jnp.float32) + b0_ref[...]
        yf, yb = run_layer(xw, whh0f_ref[...], whh0b_ref[...])

        # ---- layers 1..n-1: row-split input weights, no concat -------------
        ptr = 5
        for _ in range(1, n_layers):
            wf_ref, wb_ref, bl_ref, whf_ref, whb_ref = refs[ptr:ptr + 5]
            ptr += 5
            xw = (jnp.dot(yf.astype(jnp.bfloat16), wf_ref[...],
                          preferred_element_type=jnp.float32)
                  + jnp.dot(yb.astype(jnp.bfloat16), wb_ref[...],
                            preferred_element_type=jnp.float32)
                  + bl_ref[...])
            yf, yb = run_layer(xw, whf_ref[...], whb_ref[...])

        # ---- fused head: linear (padded to 128 lanes) + argmax -------------
        lwf_ref, lwb_ref, lb_ref = refs[ptr:ptr + 3]
        logits = (jnp.dot(yf.astype(jnp.bfloat16), lwf_ref[...],
                          preferred_element_type=jnp.float32)
                  + jnp.dot(yb.astype(jnp.bfloat16), lwb_ref[...],
                            preferred_element_type=jnp.float32)
                  + lb_ref[...])
        logits_ref[...] = logits                # unmasked lane-dense store

        lane_l = lax.broadcasted_iota(jnp.int32, (R, LP), 1)
        masked = jnp.where(lane_l < n_labels, logits, jnp.float32(-1e30))
        m = jnp.max(masked, axis=-1, keepdims=True)
        idx = jnp.where(masked == m, lane_l, jnp.int32(LP))
        pred_ref[...] = jnp.min(idx, axis=-1, keepdims=True)   # first-occurrence

    return kernel


# ----------------------------------------------------------------------------
# One-time parameter packing (outside jit): gate reorder, bf16, padding, folds
# ----------------------------------------------------------------------------
def pack_params(params, *, n_layers, hidden_dim, n_labels, embedding_dim,
                vocab_size):
    H = hidden_dim
    E = embedding_dim
    G = 4 * H
    assert vocab_size <= _WORD_ROWS, "vocab must fit the combined one-hot width"

    def reorder_gates(w):
        # columns per direction: [i | f | g | o]  ->  [i | f | o | g]
        return jnp.concatenate(
            [w[..., :2 * H], w[..., 3 * H:4 * H], w[..., 2 * H:3 * H]], axis=-1)

    def reorder_dirs(w):
        # last dim 8H = [fwd 4H | bwd 4H]; reorder within each direction.
        return jnp.concatenate(
            [reorder_gates(w[..., :G]), reorder_gates(w[..., G:])], axis=-1)

    args = []

    # ---- layer 0: fold [word_embed | mask_embed] @ W_ih0 into one table ----
    l0 = params["layers"][0]
    wih0 = reorder_dirs(l0["wih"])                                # (2E, 8H)
    emb_tbl = jnp.zeros((_ONEHOT_WIDTH, 2 * E), jnp.float32)
    emb_tbl = emb_tbl.at[:vocab_size, :E].set(params["word_embed"])
    emb_tbl = emb_tbl.at[_WORD_ROWS:, E:].set(params["mask_embed"])
    proj0 = (emb_tbl @ wih0).astype(jnp.bfloat16)                 # (128, 8H)
    args += [proj0,
             reorder_dirs(l0["bias"]).astype(jnp.float32),        # (1, 8H)
             reorder_gates(l0["whh_f"]).astype(jnp.bfloat16),     # (H, 4H)
             reorder_gates(l0["whh_b"]).astype(jnp.bfloat16)]

    # ---- layers 1..n-1: row-split input weights (no in-kernel concat) ------
    for l in range(1, n_layers):
        lp = params["layers"][l]
        wih = reorder_dirs(lp["wih"])                             # (2H, 8H)
        args += [wih[:H, :].astype(jnp.bfloat16),
                 wih[H:, :].astype(jnp.bfloat16),
                 reorder_dirs(lp["bias"]).astype(jnp.float32),
                 reorder_gates(lp["whh_f"]).astype(jnp.bfloat16),
                 reorder_gates(lp["whh_b"]).astype(jnp.bfloat16)]

    # ---- head: zero-pad labels to 128 lanes, row-split -----------------------
    lw = jnp.zeros((2 * H, _LABEL_PAD), jnp.float32)
    lw = lw.at[:, :n_labels].set(params["linear_w"])
    lb = jnp.zeros((1, _LABEL_PAD), jnp.float32)
    lb = lb.at[:, :n_labels].set(params["linear_b"])
    args += [lw[:H, :].astype(jnp.bfloat16),
             lw[H:, :].astype(jnp.bfloat16),
             lb]
    return args


# ----------------------------------------------------------------------------
# Wrapper
# ----------------------------------------------------------------------------
def bio_model_forward(packed_args, x, *, n_layers, hidden_dim, n_labels):
    """x: int32 (B, T, 2); x[..., 0] = word ids, x[..., 1] = mask ids (0/1).

    Returns (output, pred):
      output: f32 (B, T, n_labels)  -- linear output (pre-softmax, as in PyTorch)
      pred:   i32 (B, T)            -- argmax over labels
    """
    B, T, _ = x.shape
    Bp = max(8, ((B + 7) // 8) * 8)             # pad batch to full sublane group

    # Only int32 id plumbing stays in the wrapper (embeddings are in-kernel).
    ids = jnp.transpose(x.astype(jnp.int32), (1, 0, 2))          # (T, B, 2)
    ids = jnp.pad(ids, ((0, 0), (0, Bp - B), (0, 0)))            # (T, Bp, 2)
    ids_flat = ids.reshape(T * Bp, 2)

    kernel = _make_bio_kernel(n_layers, T, Bp, hidden_dim, n_labels)
    args = [ids_flat] + list(packed_args)
    logits_pad, pred_pad = pl.pallas_call(
        kernel,
        out_shape=(jax.ShapeDtypeStruct((T * Bp, _LABEL_PAD), jnp.float32),
                   jax.ShapeDtypeStruct((T * Bp, 1), jnp.int32)),
        in_specs=[_VMEM_SPEC] * len(args),
        out_specs=(_VMEM_SPEC, _VMEM_SPEC),
    )(*args)

    output = jnp.transpose(
        logits_pad.reshape(T, Bp, _LABEL_PAD)[:, :B, :n_labels], (1, 0, 2))
    pred = jnp.transpose(pred_pad.reshape(T, Bp)[:, :B], (1, 0))
    return output, pred


# ----------------------------------------------------------------------------
# Parameter init (synthetic, deterministic)
# ----------------------------------------------------------------------------
def init_params(key, vocab_size, embedding_dim, n_layers, hidden_dim, n_labels):
    H = hidden_dim
    keys = iter(jax.random.split(key, 8 + 8 * n_layers))
    k = 1.0 / (H ** 0.5)

    params = {
        # "pretrained" word embedding (synthetic stand-in)
        "word_embed": jax.random.normal(next(keys), (vocab_size, embedding_dim),
                                        jnp.float32),
        "mask_embed": jax.random.normal(next(keys), (2, embedding_dim),
                                        jnp.float32),
        "layers": [],
    }

    def u(shape):
        return jax.random.uniform(next(keys), shape, jnp.float32, -k, k)

    for layer in range(n_layers):
        d_in = 2 * embedding_dim if layer == 0 else 2 * H
        w_ih_f, w_ih_b = u((d_in, 4 * H)), u((d_in, 4 * H))
        whh_f, whh_b = u((H, 4 * H)), u((H, 4 * H))
        b_f = u((1, 4 * H)) + u((1, 4 * H))      # b_ih + b_hh (fwd)
        b_b = u((1, 4 * H)) + u((1, 4 * H))      # b_ih + b_hh (bwd)
        params["layers"].append({
            "wih": jnp.concatenate([w_ih_f, w_ih_b], axis=1),   # (d_in, 8H)
            "whh_f": whh_f,                                     # (H, 4H)
            "whh_b": whh_b,                                     # (H, 4H)
            "bias": jnp.concatenate([b_f, b_b], axis=1),        # (1, 8H)
        })

    k2 = 1.0 / ((2 * H) ** 0.5)
    params["linear_w"] = jax.random.uniform(next(keys), (2 * H, n_labels),
                                            jnp.float32, -k2, k2)
    params["linear_b"] = jax.random.uniform(next(keys), (1, n_labels),
                                            jnp.float32, -k2, k2)
    return params


# ----------------------------------------------------------------------------
# Pure-JAX reference (for correctness check; f32, original gate order)
# ----------------------------------------------------------------------------
def reference_forward(params, x, *, hidden_dim):
    H = hidden_dim
    B, T, _ = x.shape
    xw = params["word_embed"][x[..., 0]]
    xm = params["mask_embed"][x[..., 1]]
    h = jnp.concatenate([xw, xm], axis=-1)                    # (B, T, 2E)

    for lp in params["layers"]:
        proj = jnp.einsum("btd,dg->btg", h, lp["wih"]) + lp["bias"]   # (B,T,8H)

        def run_dir(whh, col_off, reverse):
            hh = jnp.zeros((B, H), jnp.float32)
            cc = jnp.zeros((B, H), jnp.float32)
            order = range(T - 1, -1, -1) if reverse else range(T)
            ys = [None] * T
            for t in order:
                g = proj[:, t, col_off:col_off + 4 * H] + hh @ whh
                i = jax.nn.sigmoid(g[:, :H])
                f = jax.nn.sigmoid(g[:, H:2 * H])
                gg = jnp.tanh(g[:, 2 * H:3 * H])
                o = jax.nn.sigmoid(g[:, 3 * H:])
                cc = f * cc + i * gg
                hh = o * jnp.tanh(cc)
                ys[t] = hh
            return jnp.stack(ys, axis=1)                      # (B, T, H)

        yf = run_dir(lp["whh_f"], 0, False)
        yb = run_dir(lp["whh_b"], 4 * H, True)
        h = jnp.concatenate([yf, yb], axis=-1)                # (B, T, 2H)

    logits = (h.reshape(B * T, 2 * H) @ params["linear_w"]
              + params["linear_b"]).reshape(B, T, -1)
    return logits, jnp.argmax(logits, axis=-1)


# ----------------------------------------------------------------------------
# Main
# ----------------------------------------------------------------------------
if __name__ == "__main__":
    vocab_size = 50
    embedding_dim = 16
    n_layers = 2
    hidden_dim = 32
    n_labels = 5        # data.label_dict.size()
    batch = 2
    seq = 8

    root = jax.random.PRNGKey(0)
    k_param, k_word, k_mask = jax.random.split(root, 3)

    params = init_params(k_param, vocab_size, embedding_dim, n_layers,
                         hidden_dim, n_labels)
    packed = pack_params(params, n_layers=n_layers, hidden_dim=hidden_dim,
                         n_labels=n_labels, embedding_dim=embedding_dim,
                         vocab_size=vocab_size)

    word_ids = jax.random.randint(k_word, (batch, seq), 0, vocab_size,
                                  dtype=jnp.int32)
    mask_ids = jax.random.randint(k_mask, (batch, seq), 0, 2, dtype=jnp.int32)
    x = jnp.stack([word_ids, mask_ids], axis=-1)              # (B, T, 2) int32

    fwd = jax.jit(functools.partial(bio_model_forward, packed,
                                    n_layers=n_layers, hidden_dim=hidden_dim,
                                    n_labels=n_labels))
    output, pred = fwd(x)
    jax.block_until_ready((output, pred))

    assert output.shape == (batch, seq, n_labels)
    assert pred.shape == (batch, seq)

    # Correctness check against a pure-f32 JAX reference (tolerance covers bf16
    # matmul operands + MXU accumulation differences).
    ref_out, ref_pred = reference_forward(params, x, hidden_dim=hidden_dim)
    max_err = float(jnp.max(jnp.abs(output - ref_out)))
    assert jnp.allclose(output, ref_out, atol=5e-2, rtol=5e-2), max_err
    # Kernel argmax must match first-occurrence argmax of the kernel's logits.
    assert jnp.array_equal(pred, jnp.argmax(output, axis=-1))

    print("KERNEL_OK")
</pallas_src>

<mosaic_0001>
module attributes {stable_mosaic.version = 11 : i64} {
  func.func @kernel(%arg0: memref<64x2xi32, #tpu.memory_space<vmem>>, %arg1: memref<128x256xbf16, #tpu.memory_space<vmem>>, %arg2: memref<1x256xf32, #tpu.memory_space<vmem>>, %arg3: memref<32x128xbf16, #tpu.memory_space<vmem>>, %arg4: memref<32x128xbf16, #tpu.memory_space<vmem>>, %arg5: memref<32x256xbf16, #tpu.memory_space<vmem>>, %arg6: memref<32x256xbf16, #tpu.memory_space<vmem>>, %arg7: memref<1x256xf32, #tpu.memory_space<vmem>>, %arg8: memref<32x128xbf16, #tpu.memory_space<vmem>>, %arg9: memref<32x128xbf16, #tpu.memory_space<vmem>>, %arg10: memref<32x128xbf16, #tpu.memory_space<vmem>>, %arg11: memref<32x128xbf16, #tpu.memory_space<vmem>>, %arg12: memref<1x128xf32, #tpu.memory_space<vmem>>, %arg13: memref<64x128xf32, #tpu.memory_space<vmem>>, %arg14: memref<64x1xi32, #tpu.memory_space<vmem>>) attributes {dimension_semantics = [], scalar_prefetch = 0 : i64, scratch_operands = 0 : i64, tpu.core_type = #tpu.core_type<tc>} {
    %c0 = arith.constant 0 : index
    %c0_0 = arith.constant 0 : index
    %0 = vector.load %arg0[%c0, %c0_0] : memref<64x2xi32, #tpu.memory_space<vmem>>, vector<64x2xi32>
    %1 = vector.extract_strided_slice %0 {offsets = [0, 0], sizes = [64, 1], strides = [1, 1]} : vector<64x2xi32> to vector<64x1xi32>
    %2 = vector.extract_strided_slice %0 {offsets = [0, 1], sizes = [64, 1], strides = [1, 1]} : vector<64x2xi32> to vector<64x1xi32>
    %3 = tpu.iota {dimensions = array<i32: 1>} : vector<64x128xi32>
    %4 = vector.broadcast %1 : vector<64x1xi32> to vector<64x128xi32>
    %5 = arith.cmpi eq, %3, %4 : vector<64x128xi32>
    %c126_i32 = arith.constant 126 : i32
    %6 = vector.broadcast %c126_i32 : i32 to vector<64x1xi32>
    %7 = arith.addi %6, %2 : vector<64x1xi32>
    %8 = vector.broadcast %7 : vector<64x1xi32> to vector<64x128xi32>
    %9 = arith.cmpi eq, %3, %8 : vector<64x128xi32>
    %10 = arith.ori %5, %9 : vector<64x128xi1>
    %cst = arith.constant 1.000000e+00 : f32
    %cst_1 = arith.constant 0.000000e+00 : f32
    %11 = vector.broadcast %cst : f32 to vector<64x128xf32>
    %12 = vector.broadcast %cst_1 : f32 to vector<64x128xf32>
    %13 = arith.select %10, %11, %12 : vector<64x128xi1>, vector<64x128xf32>
    %14 = arith.truncf %13 : vector<64x128xf32> to vector<64x128xbf16>
    %c0_2 = arith.constant 0 : index
    %c0_3 = arith.constant 0 : index
    %15 = vector.load %arg1[%c0_2, %c0_3] : memref<128x256xbf16, #tpu.memory_space<vmem>>, vector<128x256xbf16>
    %cst_4 = arith.constant dense<0.000000e+00> : vector<64x256xf32>
    %16 = tpu.matmul %14, %15, %cst_4 {dimension_numbers = #tpu.dot_dimension_numbers<[1], [0], [0], [1], [0, 0, 1, 1], [], []>} : vector<64x128xbf16>, vector<128x256xbf16>, vector<64x256xf32> -> vector<64x256xf32>
    %c0_5 = arith.constant 0 : index
    %c0_6 = arith.constant 0 : index
    %17 = vector.load %arg2[%c0_5, %c0_6] : memref<1x256xf32, #tpu.memory_space<vmem>>, vector<1x256xf32>
    %18 = vector.broadcast %17 : vector<1x256xf32> to vector<64x256xf32>
    %19 = arith.addf %16, %18 : vector<64x256xf32>
    %c0_7 = arith.constant 0 : index
    %c0_8 = arith.constant 0 : index
    %20 = vector.load %arg3[%c0_7, %c0_8] : memref<32x128xbf16, #tpu.memory_space<vmem>>, vector<32x128xbf16>
    %c0_9 = arith.constant 0 : index
    %c0_10 = arith.constant 0 : index
    %21 = vector.load %arg4[%c0_9, %c0_10] : memref<32x128xbf16, #tpu.memory_space<vmem>>, vector<32x128xbf16>
    %cst_11 = arith.constant 0.000000e+00 : f32
    %22 = vector.broadcast %cst_11 : f32 to vector<8x32xf32>
    %23 = vector.extract_strided_slice %19 {offsets = [0, 0], sizes = [8, 128], strides = [1, 1]} : vector<64x256xf32> to vector<8x128xf32>
    %24 = arith.truncf %22 : vector<8x32xf32> to vector<8x32xbf16>
    %cst_12 = arith.constant dense<0.000000e+00> : vector<8x128xf32>
    %25 = tpu.matmul %24, %20, %cst_12 {dimension_numbers = #tpu.dot_dimension_numbers<[1], [0], [0], [1], [0, 0, 1, 1], [], []>} : vector<8x32xbf16>, vector<32x128xbf16>, vector<8x128xf32> -> vector<8x128xf32>
    %26 = arith.addf %23, %25 : vector<8x128xf32>
    %27 = vector.extract_strided_slice %19 {offsets = [56, 128], sizes = [8, 128], strides = [1, 1]} : vector<64x256xf32> to vector<8x128xf32>
    %28 = arith.truncf %22 : vector<8x32xf32> to vector<8x32xbf16>
    %cst_13 = arith.constant dense<0.000000e+00> : vector<8x128xf32>
    %29 = tpu.matmul %28, %21, %cst_13 {dimension_numbers = #tpu.dot_dimension_numbers<[1], [0], [0], [1], [0, 0, 1, 1], [], []>} : vector<8x32xbf16>, vector<32x128xbf16>, vector<8x128xf32> -> vector<8x128xf32>
    %30 = arith.addf %27, %29 : vector<8x128xf32>
    %31 = vector.extract_strided_slice %26 {offsets = [0, 0], sizes = [8, 96], strides = [1, 1]} : vector<8x128xf32> to vector<8x96xf32>
    %cst_14 = arith.constant 5.000000e-01 : f32
    %32 = vector.broadcast %cst_14 : f32 to vector<8x96xf32>
    %33 = arith.mulf %32, %31 : vector<8x96xf32>
    %34 = math.tanh %33 : vector<8x96xf32>
    %cst_15 = arith.constant 1.000000e+00 : f32
    %35 = vector.broadcast %cst_15 : f32 to vector<8x96xf32>
    %36 = arith.addf %34, %35 : vector<8x96xf32>
    %cst_16 = arith.constant 5.000000e-01 : f32
    %37 = vector.broadcast %cst_16 : f32 to vector<8x96xf32>
    %38 = arith.mulf %37, %36 : vector<8x96xf32>
    %39 = vector.extract_strided_slice %38 {offsets = [0, 0], sizes = [8, 32], strides = [1, 1]} : vector<8x96xf32> to vector<8x32xf32>
    %40 = vector.extract_strided_slice %38 {offsets = [0, 32], sizes = [8, 32], strides = [1, 1]} : vector<8x96xf32> to vector<8x32xf32>
    %41 = vector.extract_strided_slice %38 {offsets = [0, 64], sizes = [8, 32], strides = [1, 1]} : vector<8x96xf32> to vector<8x32xf32>
    %42 = vector.extract_strided_slice %26 {offsets = [0, 96], sizes = [8, 32], strides = [1, 1]} : vector<8x128xf32> to vector<8x32xf32>
    %43 = math.tanh %42 : vector<8x32xf32>
    %44 = arith.mulf %40, %22 : vector<8x32xf32>
    %45 = arith.mulf %39, %43 : vector<8x32xf32>
    %46 = arith.addf %44, %45 : vector<8x32xf32>
    %47 = math.tanh %46 : vector<8x32xf32>
    %48 = arith.mulf %41, %47 : vector<8x32xf32>
    %49 = vector.extract_strided_slice %30 {offsets = [0, 0], sizes = [8, 96], strides = [1, 1]} : vector<8x128xf32> to vector<8x96xf32>
    %cst_17 = arith.constant 5.000000e-01 : f32
    %50 = vector.broadcast %cst_17 : f32 to vector<8x96xf32>
    %51 = arith.mulf %50, %49 : vector<8x96xf32>
    %52 = math.tanh %51 : vector<8x96xf32>
    %cst_18 = arith.constant 1.000000e+00 : f32
    %53 = vector.broadcast %cst_18 : f32 to vector<8x96xf32>
    %54 = arith.addf %52, %53 : vector<8x96xf32>
    %cst_19 = arith.constant 5.000000e-01 : f32
    %55 = vector.broadcast %cst_19 : f32 to vector<8x96xf32>
    %56 = arith.mulf %55, %54 : vector<8x96xf32>
    %57 = vector.extract_strided_slice %56 {offsets = [0, 0], sizes = [8, 32], strides = [1, 1]} : vector<8x96xf32> to vector<8x32xf32>
    %58 = vector.extract_strided_slice %56 {offsets = [0, 32], sizes = [8, 32], strides = [1, 1]} : vector<8x96xf32> to vector<8x32xf32>
    %59 = vector.extract_strided_slice %56 {offsets = [0, 64], sizes = [8, 32], strides = [1, 1]} : vector<8x96xf32> to vector<8x32xf32>
    %60 = vector.extract_strided_slice %30 {offsets = [0, 96], sizes = [8, 32], strides = [1, 1]} : vector<8x128xf32> to vector<8x32xf32>
    %61 = math.tanh %60 : vector<8x32xf32>
    %62 = arith.mulf %58, %22 : vector<8x32xf32>
    %63 = arith.mulf %57, %61 : vector<8x32xf32>
    %64 = arith.addf %62, %63 : vector<8x32xf32>
    %65 = math.tanh %64 : vector<8x32xf32>
    %66 = arith.mulf %59, %65 : vector<8x32xf32>
    %67 = vector.extract_strided_slice %19 {offsets = [8, 0], sizes = [8, 128], strides = [1, 1]} : vector<64x256xf32> to vector<8x128xf32>
    %68 = arith.truncf %48 : vector<8x32xf32> to vector<8x32xbf16>
    %cst_20 = arith.constant dense<0.000000e+00> : vector<8x128xf32>
    %69 = tpu.matmul %68, %20, %cst_20 {dimension_numbers = #tpu.dot_dimension_numbers<[1], [0], [0], [1], [0, 0, 1, 1], [], []>} : vector<8x32xbf16>, vector<32x128xbf16>, vector<8x128xf32> -> vector<8x128xf32>
    %70 = arith.addf %67, %69 : vector<8x128xf32>
    %71 = vector.extract_strided_slice %19 {offsets = [48, 128], sizes = [8, 128], strides = [1, 1]} : vector<64x256xf32> to vector<8x128xf32>
    %72 = arith.truncf %66 : vector<8x32xf32> to vector<8x32xbf16>
    %cst_21 = arith.constant dense<0.000000e+00> : vector<8x128xf32>
    %73 = tpu.matmul %72, %21, %cst_21 {dimension_numbers = #tpu.dot_dimension_numbers<[1], [0], [0], [1], [0, 0, 1, 1], [], []>} : vector<8x32xbf16>, vector<32x128xbf16>, vector<8x128xf32> -> vector<8x128xf32>
    %74 = arith.addf %71, %73 : vector<8x128xf32>
    %75 = vector.extract_strided_slice %70 {offsets = [0, 0], sizes = [8, 96], strides = [1, 1]} : vector<8x128xf32> to vector<8x96xf32>
    %cst_22 = arith.constant 5.000000e-01 : f32
    %76 = vector.broadcast %cst_22 : f32 to vector<8x96xf32>
    %77 = arith.mulf %76, %75 : vector<8x96xf32>
    %78 = math.tanh %77 : vector<8x96xf32>
    %cst_23 = arith.constant 1.000000e+00 : f32
    %79 = vector.broadcast %cst_23 : f32 to vector<8x96xf32>
    %80 = arith.addf %78, %79 : vector<8x96xf32>
    %cst_24 = arith.constant 5.000000e-01 : f32
    %81 = vector.broadcast %cst_24 : f32 to vector<8x96xf32>
    %82 = arith.mulf %81, %80 : vector<8x96xf32>
    %83 = vector.extract_strided_slice %82 {offsets = [0, 0], sizes = [8, 32], strides = [1, 1]} : vector<8x96xf32> to vector<8x32xf32>
    %84 = vector.extract_strided_slice %82 {offsets = [0, 32], sizes = [8, 32], strides = [1, 1]} : vector<8x96xf32> to vector<8x32xf32>
    %85 = vector.extract_strided_slice %82 {offsets = [0, 64], sizes = [8, 32], strides = [1, 1]} : vector<8x96xf32> to vector<8x32xf32>
    %86 = vector.extract_strided_slice %70 {offsets = [0, 96], sizes = [8, 32], strides = [1, 1]} : vector<8x128xf32> to vector<8x32xf32>
    %87 = math.tanh %86 : vector<8x32xf32>
    %88 = arith.mulf %84, %46 : vector<8x32xf32>
    %89 = arith.mulf %83, %87 : vector<8x32xf32>
    %90 = arith.addf %88, %89 : vector<8x32xf32>
    %91 = math.tanh %90 : vector<8x32xf32>
    %92 = arith.mulf %85, %91 : vector<8x32xf32>
    %93 = vector.extract_strided_slice %74 {offsets = [0, 0], sizes = [8, 96], strides = [1, 1]} : vector<8x128xf32> to vector<8x96xf32>
    %cst_25 = arith.constant 5.000000e-01 : f32
    %94 = vector.broadcast %cst_25 : f32 to vector<8x96xf32>
    %95 = arith.mulf %94, %93 : vector<8x96xf32>
    %96 = math.tanh %95 : vector<8x96xf32>
    %cst_26 = arith.constant 1.000000e+00 : f32
    %97 = vector.broadcast %cst_26 : f32 to vector<8x96xf32>
    %98 = arith.addf %96, %97 : vector<8x96xf32>
    %cst_27 = arith.constant 5.000000e-01 : f32
    %99 = vector.broadcast %cst_27 : f32 to vector<8x96xf32>
    %100 = arith.mulf %99, %98 : vector<8x96xf32>
    %101 = vector.extract_strided_slice %100 {offsets = [0, 0], sizes = [8, 32], strides = [1, 1]} : vector<8x96xf32> to vector<8x32xf32>
    %102 = vector.extract_strided_slice %100 {offsets = [0, 32], sizes = [8, 32], strides = [1, 1]} : vector<8x96xf32> to vector<8x32xf32>
    %103 = vector.extract_strided_slice %100 {offsets = [0, 64], sizes = [8, 32], strides = [1, 1]} : vector<8x96xf32> to vector<8x32xf32>
    %104 = vector.extract_strided_slice %74 {offsets = [0, 96], sizes = [8, 32], strides = [1, 1]} : vector<8x128xf32> to vector<8x32xf32>
    %105 = math.tanh %104 : vector<8x32xf32>
    %106 = arith.mulf %102, %64 : vector<8x32xf32>
    %107 = arith.mulf %101, %105 : vector<8x32xf32>
    %108 = arith.addf %106, %107 : vector<8x32xf32>
    %109 = math.tanh %108 : vector<8x32xf32>
    %110 = arith.mulf %103, %109 : vector<8x32xf32>
    %111 = vector.extract_strided_slice %19 {offsets = [16, 0], sizes = [8, 128], strides = [1, 1]} : vector<64x256xf32> to vector<8x128xf32>
    %112 = arith.truncf %92 : vector<8x32xf32> to vector<8x32xbf16>
    %cst_28 = arith.constant dense<0.000000e+00> : vector<8x128xf32>
    %113 = tpu.matmul %112, %20, %cst_28 {dimension_numbers = #tpu.dot_dimension_numbers<[1], [0], [0], [1], [0, 0, 1, 1], [], []>} : vector<8x32xbf16>, vector<32x128xbf16>, vector<8x128xf32> -> vector<8x128xf32>
    %114 = arith.addf %111, %113 : vector<8x128xf32>
    %115 = vector.extract_strided_slice %19 {offsets = [40, 128], sizes = [8, 128], strides = [1, 1]} : vector<64x256xf32> to vector<8x128xf32>
    %116 = arith.truncf %110 : vector<8x32xf32> to vector<8x32xbf16>
    %cst_29 = arith.constant dense<0.000000e+00> : vector<8x128xf32>
    %117 = tpu.matmul %116, %21, %cst_29 {dimension_numbers = #tpu.dot_dimension_numbers<[1], [0], [0], [1], [0, 0, 1, 1], [], []>} : vector<8x32xbf16>, vector<32x128xbf16>, vector<8x128xf32> -> vector<8x128xf32>
    %118 = arith.addf %115, %117 : vector<8x128xf32>
    %119 = vector.extract_strided_slice %114 {offsets = [0, 0], sizes = [8, 96], strides = [1, 1]} : vector<8x128xf32> to vector<8x96xf32>
    %cst_30 = arith.constant 5.000000e-01 : f32
    %120 = vector.broadcast %cst_30 : f32 to vector<8x96xf32>
    %121 = arith.mulf %120, %119 : vector<8x96xf32>
    %122 = math.tanh %121 : vector<8x96xf32>
    %cst_31 = arith.constant 1.000000e+00 : f32
    %123 = vector.broadcast %cst_31 : f32 to vector<8x96xf32>
    %124 = arith.addf %122, %123 : vector<8x96xf32>
    %cst_32 = arith.constant 5.000000e-01 : f32
    %125 = vector.broadcast %cst_32 : f32 to vector<8x96xf32>
    %126 = arith.mulf %125, %124 : vector<8x96xf32>
    %127 = vector.extract_strided_slice %126 {offsets = [0, 0], sizes = [8, 32], strides = [1, 1]} : vector<8x96xf32> to vector<8x32xf32>
    %128 = vector.extract_strided_slice %126 {offsets = [0, 32], sizes = [8, 32], strides = [1, 1]} : vector<8x96xf32> to vector<8x32xf32>
    %129 = vector.extract_strided_slice %126 {offsets = [0, 64], sizes = [8, 32], strides = [1, 1]} : vector<8x96xf32> to vector<8x32xf32>
    %130 = vector.extract_strided_slice %114 {offsets = [0, 96], sizes = [8, 32], strides = [1, 1]} : vector<8x128xf32> to vector<8x32xf32>
    %131 = math.tanh %130 : vector<8x32xf32>
    %132 = arith.mulf %128, %90 : vector<8x32xf32>
    %133 = arith.mulf %127, %131 : vector<8x32xf32>
    %134 = arith.addf %132, %133 : vector<8x32xf32>
    %135 = math.tanh %134 : vector<8x32xf32>
    %136 = arith.mulf %129, %135 : vector<8x32xf32>
    %137 = vector.extract_strided_slice %118 {offsets = [0, 0], sizes = [8, 96], strides = [1, 1]} : vector<8x128xf32> to vector<8x96xf32>
    %cst_33 = arith.constant 5.000000e-01 : f32
    %138 = vector.broadcast %cst_33 : f32 to vector<8x96xf32>
    %139 = arith.mulf %138, %137 : vector<8x96xf32>
    %140 = math.tanh %139 : vector<8x96xf32>
    %cst_34 = arith.constant 1.000000e+00 : f32
    %141 = vector.broadcast %cst_34 : f32 to vector<8x96xf32>
    %142 = arith.addf %140, %141 : vector<8x96xf32>
    %cst_35 = arith.constant 5.000000e-01 : f32
    %143 = vector.broadcast %cst_35 : f32 to vector<8x96xf32>
    %144 = arith.mulf %143, %142 : vector<8x96xf32>
    %145 = vector.extract_strided_slice %144 {offsets = [0, 0], sizes = [8, 32], strides = [1, 1]} : vector<8x96xf32> to vector<8x32xf32>
    %146 = vector.extract_strided_slice %144 {offsets = [0, 32], sizes = [8, 32], strides = [1, 1]} : vector<8x96xf32> to vector<8x32xf32>
    %147 = vector.extract_strided_slice %144 {offsets = [0, 64], sizes = [8, 32], strides = [1, 1]} : vector<8x96xf32> to vector<8x32xf32>
    %148 = vector.extract_strided_slice %118 {offsets = [0, 96], sizes = [8, 32], strides = [1, 1]} : vector<8x128xf32> to vector<8x32xf32>
    %149 = math.tanh %148 : vector<8x32xf32>
    %150 = arith.mulf %146, %108 : vector<8x32xf32>
    %151 = arith.mulf %145, %149 : vector<8x32xf32>
    %152 = arith.addf %150, %151 : vector<8x32xf32>
    %153 = math.tanh %152 : vector<8x32xf32>
    %154 = arith.mulf %147, %153 : vector<8x32xf32>
    %155 = vector.extract_strided_slice %19 {offsets = [24, 0], sizes = [8, 128], strides = [1, 1]} : vector<64x256xf32> to vector<8x128xf32>
    %156 = arith.truncf %136 : vector<8x32xf32> to vector<8x32xbf16>
    %cst_36 = arith.constant dense<0.000000e+00> : vector<8x128xf32>
    %157 = tpu.matmul %156, %20, %cst_36 {dimension_numbers = #tpu.dot_dimension_numbers<[1], [0], [0], [1], [0, 0, 1, 1], [], []>} : vector<8x32xbf16>, vector<32x128xbf16>, vector<8x128xf32> -> vector<8x128xf32>
    %158 = arith.addf %155, %157 : vector<8x128xf32>
    %159 = vector.extract_strided_slice %19 {offsets = [32, 128], sizes = [8, 128], strides = [1, 1]} : vector<64x256xf32> to vector<8x128xf32>
    %160 = arith.truncf %154 : vector<8x32xf32> to vector<8x32xbf16>
    %cst_37 = arith.constant dense<0.000000e+00> : vector<8x128xf32>
    %161 = tpu.matmul %160, %21, %cst_37 {dimension_numbers = #tpu.dot_dimension_numbers<[1], [0], [0], [1], [0, 0, 1, 1], [], []>} : vector<8x32xbf16>, vector<32x128xbf16>, vector<8x128xf32> -> vector<8x128xf32>
    %162 = arith.addf %159, %161 : vector<8x128xf32>
    %163 = vector.extract_strided_slice %158 {offsets = [0, 0], sizes = [8, 96], strides = [1, 1]} : vector<8x128xf32> to vector<8x96xf32>
    %cst_38 = arith.constant 5.000000e-01 : f32
    %164 = vector.broadcast %cst_38 : f32 to vector<8x96xf32>
    %165 = arith.mulf %164, %163 : vector<8x96xf32>
    %166 = math.tanh %165 : vector<8x96xf32>
    %cst_39 = arith.constant 1.000000e+00 : f32
    %167 = vector.broadcast %cst_39 : f32 to vector<8x96xf32>
    %168 = arith.addf %166, %167 : vector<8x96xf32>
    %cst_40 = arith.constant 5.000000e-01 : f32
    %169 = vector.broadcast %cst_40 : f32 to vector<8x96xf32>
    %170 = arith.mulf %169, %168 : vector<8x96xf32>
    %171 = vector.extract_strided_slice %170 {offsets = [0, 0], sizes = [8, 32], strides = [1, 1]} : vector<8x96xf32> to vector<8x32xf32>
    %172 = vector.extract_strided_slice %170 {offsets = [0, 32], sizes = [8, 32], strides = [1, 1]} : vector<8x96xf32> to vector<8x32xf32>
    %173 = vector.extract_strided_slice %170 {offsets = [0, 64], sizes = [8, 32], strides = [1, 1]} : vector<8x96xf32> to vector<8x32xf32>
    %174 = vector.extract_strided_slice %158 {offsets = [0, 96], sizes = [8, 32], strides = [1, 1]} : vector<8x128xf32> to vector<8x32xf32>
    %175 = math.tanh %174 : vector<8x32xf32>
    %176 = arith.mulf %172, %134 : vector<8x32xf32>
    %177 = arith.mulf %171, %175 : vector<8x32xf32>
    %178 = arith.addf %176, %177 : vector<8x32xf32>
    %179 = math.tanh %178 : vector<8x32xf32>
    %180 = arith.mulf %173, %179 : vector<8x32xf32>
    %181 = vector.extract_strided_slice %162 {offsets = [0, 0], sizes = [8, 96], strides = [1, 1]} : vector<8x128xf32> to vector<8x96xf32>
    %cst_41 = arith.constant 5.000000e-01 : f32
    %182 = vector.broadcast %cst_41 : f32 to vector<8x96xf32>
    %183 = arith.mulf %182, %181 : vector<8x96xf32>
    %184 = math.tanh %183 : vector<8x96xf32>
    %cst_42 = arith.constant 1.000000e+00 : f32
    %185 = vector.broadcast %cst_42 : f32 to vector<8x96xf32>
    %186 = arith.addf %184, %185 : vector<8x96xf32>
    %cst_43 = arith.constant 5.000000e-01 : f32
    %187 = vector.broadcast %cst_43 : f32 to vector<8x96xf32>
    %188 = arith.mulf %187, %186 : vector<8x96xf32>
    %189 = vector.extract_strided_slice %188 {offsets = [0, 0], sizes = [8, 32], strides = [1, 1]} : vector<8x96xf32> to vector<8x32xf32>
    %190 = vector.extract_strided_slice %188 {offsets = [0, 32], sizes = [8, 32], strides = [1, 1]} : vector<8x96xf32> to vector<8x32xf32>
    %191 = vector.extract_strided_slice %188 {offsets = [0, 64], sizes = [8, 32], strides = [1, 1]} : vector<8x96xf32> to vector<8x32xf32>
    %192 = vector.extract_strided_slice %162 {offsets = [0, 96], sizes = [8, 32], strides = [1, 1]} : vector<8x128xf32> to vector<8x32xf32>
    %193 = math.tanh %192 : vector<8x32xf32>
    %194 = arith.mulf %190, %152 : vector<8x32xf32>
    %195 = arith.mulf %189, %193 : vector<8x32xf32>
    %196 = arith.addf %194, %195 : vector<8x32xf32>
    %197 = math.tanh %196 : vector<8x32xf32>
    %198 = arith.mulf %191, %197 : vector<8x32xf32>
    %199 = vector.extract_strided_slice %19 {offsets = [32, 0], sizes = [8, 128], strides = [1, 1]} : vector<64x256xf32> to vector<8x128xf32>
    %200 = arith.truncf %180 : vector<8x32xf32> to vector<8x32xbf16>
    %cst_44 = arith.constant dense<0.000000e+00> : vector<8x128xf32>
    %201 = tpu.matmul %200, %20, %cst_44 {dimension_numbers = #tpu.dot_dimension_numbers<[1], [0], [0], [1], [0, 0, 1, 1], [], []>} : vector<8x32xbf16>, vector<32x128xbf16>, vector<8x128xf32> -> vector<8x128xf32>
    %202 = arith.addf %199, %201 : vector<8x128xf32>
    %203 = vector.extract_strided_slice %19 {offsets = [24, 128], sizes = [8, 128], strides = [1, 1]} : vector<64x256xf32> to vector<8x128xf32>
    %204 = arith.truncf %198 : vector<8x32xf32> to vector<8x32xbf16>
    %cst_45 = arith.constant dense<0.000000e+00> : vector<8x128xf32>
    %205 = tpu.matmul %204, %21, %cst_45 {dimension_numbers = #tpu.dot_dimension_numbers<[1], [0], [0], [1], [0, 0, 1, 1], [], []>} : vector<8x32xbf16>, vector<32x128xbf16>, vector<8x128xf32> -> vector<8x128xf32>
    %206 = arith.addf %203, %205 : vector<8x128xf32>
    %207 = vector.extract_strided_slice %202 {offsets = [0, 0], sizes = [8, 96], strides = [1, 1]} : vector<8x128xf32> to vector<8x96xf32>
    %cst_46 = arith.constant 5.000000e-01 : f32
    %208 = vector.broadcast %cst_46 : f32 to vector<8x96xf32>
    %209 = arith.mulf %208, %207 : vector<8x96xf32>
    %210 = math.tanh %209 : vector<8x96xf32>
    %cst_47 = arith.constant 1.000000e+00 : f32
    %211 = vector.broadcast %cst_47 : f32 to vector<8x96xf32>
    %212 = arith.addf %210, %211 : vector<8x96xf32>
    %cst_48 = arith.constant 5.000000e-01 : f32
    %213 = vector.broadcast %cst_48 : f32 to vector<8x96xf32>
    %214 = arith.mulf %213, %212 : vector<8x96xf32>
    %215 = vector.extract_strided_slice %214 {offsets = [0, 0], sizes = [8, 32], strides = [1, 1]} : vector<8x96xf32> to vector<8x32xf32>
    %216 = vector.extract_strided_slice %214 {offsets = [0, 32], sizes = [8, 32], strides = [1, 1]} : vector<8x96xf32> to vector<8x32xf32>
    %217 = vector.extract_strided_slice %214 {offsets = [0, 64], sizes = [8, 32], strides = [1, 1]} : vector<8x96xf32> to vector<8x32xf32>
    %218 = vector.extract_strided_slice %202 {offsets = [0, 96], sizes = [8, 32], strides = [1, 1]} : vector<8x128xf32> to vector<8x32xf32>
    %219 = math.tanh %218 : vector<8x32xf32>
    %220 = arith.mulf %216, %178 : vector<8x32xf32>
    %221 = arith.mulf %215, %219 : vector<8x32xf32>
    %222 = arith.addf %220, %221 : vector<8x32xf32>
    %223 = math.tanh %222 : vector<8x32xf32>
    %224 = arith.mulf %217, %223 : vector<8x32xf32>
    %225 = vector.extract_strided_slice %206 {offsets = [0, 0], sizes = [8, 96], strides = [1, 1]} : vector<8x128xf32> to vector<8x96xf32>
    %cst_49 = arith.constant 5.000000e-01 : f32
    %226 = vector.broadcast %cst_49 : f32 to vector<8x96xf32>
    %227 = arith.mulf %226, %225 : vector<8x96xf32>
    %228 = math.tanh %227 : vector<8x96xf32>
    %cst_50 = arith.constant 1.000000e+00 : f32
    %229 = vector.broadcast %cst_50 : f32 to vector<8x96xf32>
    %230 = arith.addf %228, %229 : vector<8x96xf32>
    %cst_51 = arith.constant 5.000000e-01 : f32
    %231 = vector.broadcast %cst_51 : f32 to vector<8x96xf32>
    %232 = arith.mulf %231, %230 : vector<8x96xf32>
    %233 = vector.extract_strided_slice %232 {offsets = [0, 0], sizes = [8, 32], strides = [1, 1]} : vector<8x96xf32> to vector<8x32xf32>
    %234 = vector.extract_strided_slice %232 {offsets = [0, 32], sizes = [8, 32], strides = [1, 1]} : vector<8x96xf32> to vector<8x32xf32>
    %235 = vector.extract_strided_slice %232 {offsets = [0, 64], sizes = [8, 32], strides = [1, 1]} : vector<8x96xf32> to vector<8x32xf32>
    %236 = vector.extract_strided_slice %206 {offsets = [0, 96], sizes = [8, 32], strides = [1, 1]} : vector<8x128xf32> to vector<8x32xf32>
    %237 = math.tanh %236 : vector<8x32xf32>
    %238 = arith.mulf %234, %196 : vector<8x32xf32>
    %239 = arith.mulf %233, %237 : vector<8x32xf32>
    %240 = arith.addf %238, %239 : vector<8x32xf32>
    %241 = math.tanh %240 : vector<8x32xf32>
    %242 = arith.mulf %235, %241 : vector<8x32xf32>
    %243 = vector.extract_strided_slice %19 {offsets = [40, 0], sizes = [8, 128], strides = [1, 1]} : vector<64x256xf32> to vector<8x128xf32>
    %244 = arith.truncf %224 : vector<8x32xf32> to vector<8x32xbf16>
    %cst_52 = arith.constant dense<0.000000e+00> : vector<8x128xf32>
    %245 = tpu.matmul %244, %20, %cst_52 {dimension_numbers = #tpu.dot_dimension_numbers<[1], [0], [0], [1], [0, 0, 1, 1], [], []>} : vector<8x32xbf16>, vector<32x128xbf16>, vector<8x128xf32> -> vector<8x128xf32>
    %246 = arith.addf %243, %245 : vector<8x128xf32>
    %247 = vector.extract_strided_slice %19 {offsets = [16, 128], sizes = [8, 128], strides = [1, 1]} : vector<64x256xf32> to vector<8x128xf32>
    %248 = arith.truncf %242 : vector<8x32xf32> to vector<8x32xbf16>
    %cst_53 = arith.constant dense<0.000000e+00> : vector<8x128xf32>
    %249 = tpu.matmul %248, %21, %cst_53 {dimension_numbers = #tpu.dot_dimension_numbers<[1], [0], [0], [1], [0, 0, 1, 1], [], []>} : vector<8x32xbf16>, vector<32x128xbf16>, vector<8x128xf32> -> vector<8x128xf32>
    %250 = arith.addf %247, %249 : vector<8x128xf32>
    %251 = vector.extract_strided_slice %246 {offsets = [0, 0], sizes = [8, 96], strides = [1, 1]} : vector<8x128xf32> to vector<8x96xf32>
    %cst_54 = arith.constant 5.000000e-01 : f32
    %252 = vector.broadcast %cst_54 : f32 to vector<8x96xf32>
    %253 = arith.mulf %252, %251 : vector<8x96xf32>
    %254 = math.tanh %253 : vector<8x96xf32>
    %cst_55 = arith.constant 1.000000e+00 : f32
    %255 = vector.broadcast %cst_55 : f32 to vector<8x96xf32>
    %256 = arith.addf %254, %255 : vector<8x96xf32>
    %cst_56 = arith.constant 5.000000e-01 : f32
    %257 = vector.broadcast %cst_56 : f32 to vector<8x96xf32>
    %258 = arith.mulf %257, %256 : vector<8x96xf32>
    %259 = vector.extract_strided_slice %258 {offsets = [0, 0], sizes = [8, 32], strides = [1, 1]} : vector<8x96xf32> to vector<8x32xf32>
    %260 = vector.extract_strided_slice %258 {offsets = [0, 32], sizes = [8, 32], strides = [1, 1]} : vector<8x96xf32> to vector<8x32xf32>
    %261 = vector.extract_strided_slice %258 {offsets = [0, 64], sizes = [8, 32], strides = [1, 1]} : vector<8x96xf32> to vector<8x32xf32>
    %262 = vector.extract_strided_slice %246 {offsets = [0, 96], sizes = [8, 32], strides = [1, 1]} : vector<8x128xf32> to vector<8x32xf32>
    %263 = math.tanh %262 : vector<8x32xf32>
    %264 = arith.mulf %260, %222 : vector<8x32xf32>
    %265 = arith.mulf %259, %263 : vector<8x32xf32>
    %266 = arith.addf %264, %265 : vector<8x32xf32>
    %267 = math.tanh %266 : vector<8x32xf32>
    %268 = arith.mulf %261, %267 : vector<8x32xf32>
    %269 = vector.extract_strided_slice %250 {offsets = [0, 0], sizes = [8, 96], strides = [1, 1]} : vector<8x128xf32> to vector<8x96xf32>
    %cst_57 = arith.constant 5.000000e-01 : f32
    %270 = vector.broadcast %cst_57 : f32 to vector<8x96xf32>
    %271 = arith.mulf %270, %269 : vector<8x96xf32>
    %272 = math.tanh %271 : vector<8x96xf32>
    %cst_58 = arith.constant 1.000000e+00 : f32
    %273 = vector.broadcast %cst_58 : f32 to vector<8x96xf32>
    %274 = arith.addf %272, %273 : vector<8x96xf32>
    %cst_59 = arith.constant 5.000000e-01 : f32
    %275 = vector.broadcast %cst_59 : f32 to vector<8x96xf32>
    %276 = arith.mulf %275, %274 : vector<8x96xf32>
    %277 = vector.extract_strided_slice %276 {offsets = [0, 0], sizes = [8, 32], strides = [1, 1]} : vector<8x96xf32> to vector<8x32xf32>
    %278 = vector.extract_strided_slice %276 {offsets = [0, 32], sizes = [8, 32], strides = [1, 1]} : vector<8x96xf32> to vector<8x32xf32>
    %279 = vector.extract_strided_slice %276 {offsets = [0, 64], sizes = [8, 32], strides = [1, 1]} : vector<8x96xf32> to vector<8x32xf32>
    %280 = vector.extract_strided_slice %250 {offsets = [0, 96], sizes = [8, 32], strides = [1, 1]} : vector<8x128xf32> to vector<8x32xf32>
    %281 = math.tanh %280 : vector<8x32xf32>
    %282 = arith.mulf %278, %240 : vector<8x32xf32>
    %283 = arith.mulf %277, %281 : vector<8x32xf32>
    %284 = arith.addf %282, %283 : vector<8x32xf32>
    %285 = math.tanh %284 : vector<8x32xf32>
    %286 = arith.mulf %279, %285 : vector<8x32xf32>
    %287 = vector.extract_strided_slice %19 {offsets = [48, 0], sizes = [8, 128], strides = [1, 1]} : vector<64x256xf32> to vector<8x128xf32>
    %288 = arith.truncf %268 : vector<8x32xf32> to vector<8x32xbf16>
    %cst_60 = arith.constant dense<0.000000e+00> : vector<8x128xf32>
    %289 = tpu.matmul %288, %20, %cst_60 {dimension_numbers = #tpu.dot_dimension_numbers<[1], [0], [0], [1], [0, 0, 1, 1], [], []>} : vector<8x32xbf16>, vector<32x128xbf16>, vector<8x128xf32> -> vector<8x128xf32>
    %290 = arith.addf %287, %289 : vector<8x128xf32>
    %291 = vector.extract_strided_slice %19 {offsets = [8, 128], sizes = [8, 128], strides = [1, 1]} : vector<64x256xf32> to vector<8x128xf32>
    %292 = arith.truncf %286 : vector<8x32xf32> to vector<8x32xbf16>
    %cst_61 = arith.constant dense<0.000000e+00> : vector<8x128xf32>
    %293 = tpu.matmul %292, %21, %cst_61 {dimension_numbers = #tpu.dot_dimension_numbers<[1], [0], [0], [1], [0, 0, 1, 1], [], []>} : vector<8x32xbf16>, vector<32x128xbf16>, vector<8x128xf32> -> vector<8x128xf32>
    %294 = arith.addf %291, %293 : vector<8x128xf32>
    %295 = vector.extract_strided_slice %290 {offsets = [0, 0], sizes = [8, 96], strides = [1, 1]} : vector<8x128xf32> to vector<8x96xf32>
    %cst_62 = arith.constant 5.000000e-01 : f32
    %296 = vector.broadcast %cst_62 : f32 to vector<8x96xf32>
    %297 = arith.mulf %296, %295 : vector<8x96xf32>
    %298 = math.tanh %297 : vector<8x96xf32>
    %cst_63 = arith.constant 1.000000e+00 : f32
    %299 = vector.broadcast %cst_63 : f32 to vector<8x96xf32>
    %300 = arith.addf %298, %299 : vector<8x96xf32>
    %cst_64 = arith.constant 5.000000e-01 : f32
    %301 = vector.broadcast %cst_64 : f32 to vector<8x96xf32>
    %302 = arith.mulf %301, %300 : vector<8x96xf32>
    %303 = vector.extract_strided_slice %302 {offsets = [0, 0], sizes = [8, 32], strides = [1, 1]} : vector<8x96xf32> to vector<8x32xf32>
    %304 = vector.extract_strided_slice %302 {offsets = [0, 32], sizes = [8, 32], strides = [1, 1]} : vector<8x96xf32> to vector<8x32xf32>
    %305 = vector.extract_strided_slice %302 {offsets = [0, 64], sizes = [8, 32], strides = [1, 1]} : vector<8x96xf32> to vector<8x32xf32>
    %306 = vector.extract_strided_slice %290 {offsets = [0, 96], sizes = [8, 32], strides = [1, 1]} : vector<8x128xf32> to vector<8x32xf32>
    %307 = math.tanh %306 : vector<8x32xf32>
    %308 = arith.mulf %304, %266 : vector<8x32xf32>
    %309 = arith.mulf %303, %307 : vector<8x32xf32>
    %310 = arith.addf %308, %309 : vector<8x32xf32>
    %311 = math.tanh %310 : vector<8x32xf32>
    %312 = arith.mulf %305, %311 : vector<8x32xf32>
    %313 = vector.extract_strided_slice %294 {offsets = [0, 0], sizes = [8, 96], strides = [1, 1]} : vector<8x128xf32> to vector<8x96xf32>
    %cst_65 = arith.constant 5.000000e-01 : f32
    %314 = vector.broadcast %cst_65 : f32 to vector<8x96xf32>
    %315 = arith.mulf %314, %313 : vector<8x96xf32>
    %316 = math.tanh %315 : vector<8x96xf32>
    %cst_66 = arith.constant 1.000000e+00 : f32
    %317 = vector.broadcast %cst_66 : f32 to vector<8x96xf32>
    %318 = arith.addf %316, %317 : vector<8x96xf32>
    %cst_67 = arith.constant 5.000000e-01 : f32
    %319 = vector.broadcast %cst_67 : f32 to vector<8x96xf32>
    %320 = arith.mulf %319, %318 : vector<8x96xf32>
    %321 = vector.extract_strided_slice %320 {offsets = [0, 0], sizes = [8, 32], strides = [1, 1]} : vector<8x96xf32> to vector<8x32xf32>
    %322 = vector.extract_strided_slice %320 {offsets = [0, 32], sizes = [8, 32], strides = [1, 1]} : vector<8x96xf32> to vector<8x32xf32>
    %323 = vector.extract_strided_slice %320 {offsets = [0, 64], sizes = [8, 32], strides = [1, 1]} : vector<8x96xf32> to vector<8x32xf32>
    %324 = vector.extract_strided_slice %294 {offsets = [0, 96], sizes = [8, 32], strides = [1, 1]} : vector<8x128xf32> to vector<8x32xf32>
    %325 = math.tanh %324 : vector<8x32xf32>
    %326 = arith.mulf %322, %284 : vector<8x32xf32>
    %327 = arith.mulf %321, %325 : vector<8x32xf32>
    %328 = arith.addf %326, %327 : vector<8x32xf32>
    %329 = math.tanh %328 : vector<8x32xf32>
    %330 = arith.mulf %323, %329 : vector<8x32xf32>
    %331 = vector.extract_strided_slice %19 {offsets = [56, 0], sizes = [8, 128], strides = [1, 1]} : vector<64x256xf32> to vector<8x128xf32>
    %332 = arith.truncf %312 : vector<8x32xf32> to vector<8x32xbf16>
    %cst_68 = arith.constant dense<0.000000e+00> : vector<8x128xf32>
    %333 = tpu.matmul %332, %20, %cst_68 {dimension_numbers = #tpu.dot_dimension_numbers<[1], [0], [0], [1], [0, 0, 1, 1], [], []>} : vector<8x32xbf16>, vector<32x128xbf16>, vector<8x128xf32> -> vector<8x128xf32>
    %334 = arith.addf %331, %333 : vector<8x128xf32>
    %335 = vector.extract_strided_slice %19 {offsets = [0, 128], sizes = [8, 128], strides = [1, 1]} : vector<64x256xf32> to vector<8x128xf32>
    %336 = arith.truncf %330 : vector<8x32xf32> to vector<8x32xbf16>
    %cst_69 = arith.constant dense<0.000000e+00> : vector<8x128xf32>
    %337 = tpu.matmul %336, %21, %cst_69 {dimension_numbers = #tpu.dot_dimension_numbers<[1], [0], [0], [1], [0, 0, 1, 1], [], []>} : vector<8x32xbf16>, vector<32x128xbf16>, vector<8x128xf32> -> vector<8x128xf32>
    %338 = arith.addf %335, %337 : vector<8x128xf32>
    %339 = vector.extract_strided_slice %334 {offsets = [0, 0], sizes = [8, 96], strides = [1, 1]} : vector<8x128xf32> to vector<8x96xf32>
    %cst_70 = arith.constant 5.000000e-01 : f32
    %340 = vector.broadcast %cst_70 : f32 to vector<8x96xf32>
    %341 = arith.mulf %340, %339 : vector<8x96xf32>
    %342 = math.tanh %341 : vector<8x96xf32>
    %cst_71 = arith.constant 1.000000e+00 : f32
    %343 = vector.broadcast %cst_71 : f32 to vector<8x96xf32>
    %344 = arith.addf %342, %343 : vector<8x96xf32>
    %cst_72 = arith.constant 5.000000e-01 : f32
    %345 = vector.broadcast %cst_72 : f32 to vector<8x96xf32>
    %346 = arith.mulf %345, %344 : vector<8x96xf32>
    %347 = vector.extract_strided_slice %346 {offsets = [0, 0], sizes = [8, 32], strides = [1, 1]} : vector<8x96xf32> to vector<8x32xf32>
    %348 = vector.extract_strided_slice %346 {offsets = [0, 32], sizes = [8, 32], strides = [1, 1]} : vector<8x96xf32> to vector<8x32xf32>
    %349 = vector.extract_strided_slice %346 {offsets = [0, 64], sizes = [8, 32], strides = [1, 1]} : vector<8x96xf32> to vector<8x32xf32>
    %350 = vector.extract_strided_slice %334 {offsets = [0, 96], sizes = [8, 32], strides = [1, 1]} : vector<8x128xf32> to vector<8x32xf32>
    %351 = math.tanh %350 : vector<8x32xf32>
    %352 = arith.mulf %348, %310 : vector<8x32xf32>
    %353 = arith.mulf %347, %351 : vector<8x32xf32>
    %354 = arith.addf %352, %353 : vector<8x32xf32>
    %355 = math.tanh %354 : vector<8x32xf32>
    %356 = arith.mulf %349, %355 : vector<8x32xf32>
    %357 = vector.extract_strided_slice %338 {offsets = [0, 0], sizes = [8, 96], strides = [1, 1]} : vector<8x128xf32> to vector<8x96xf32>
    %cst_73 = arith.constant 5.000000e-01 : f32
    %358 = vector.broadcast %cst_73 : f32 to vector<8x96xf32>
    %359 = arith.mulf %358, %357 : vector<8x96xf32>
    %360 = math.tanh %359 : vector<8x96xf32>
    %cst_74 = arith.constant 1.000000e+00 : f32
    %361 = vector.broadcast %cst_74 : f32 to vector<8x96xf32>
    %362 = arith.addf %360, %361 : vector<8x96xf32>
    %cst_75 = arith.constant 5.000000e-01 : f32
    %363 = vector.broadcast %cst_75 : f32 to vector<8x96xf32>
    %364 = arith.mulf %363, %362 : vector<8x96xf32>
    %365 = vector.extract_strided_slice %364 {offsets = [0, 0], sizes = [8, 32], strides = [1, 1]} : vector<8x96xf32> to vector<8x32xf32>
    %366 = vector.extract_strided_slice %364 {offsets = [0, 32], sizes = [8, 32], strides = [1, 1]} : vector<8x96xf32> to vector<8x32xf32>
    %367 = vector.extract_strided_slice %364 {offsets = [0, 64], sizes = [8, 32], strides = [1, 1]} : vector<8x96xf32> to vector<8x32xf32>
    %368 = vector.extract_strided_slice %338 {offsets = [0, 96], sizes = [8, 32], strides = [1, 1]} : vector<8x128xf32> to vector<8x32xf32>
    %369 = math.tanh %368 : vector<8x32xf32>
    %370 = arith.mulf %366, %328 : vector<8x32xf32>
    %371 = arith.mulf %365, %369 : vector<8x32xf32>
    %372 = arith.addf %370, %371 : vector<8x32xf32>
    %373 = math.tanh %372 : vector<8x32xf32>
    %374 = arith.mulf %367, %373 : vector<8x32xf32>
    %375 = tpu.concatenate %48, %92, %136, %180, %224, %268, %312, %356 in 0 : vector<8x32xf32>, vector<8x32xf32>, vector<8x32xf32>, vector<8x32xf32>, vector<8x32xf32>, vector<8x32xf32>, vector<8x32xf32>, vector<8x32xf32> -> vector<64x32xf32>
    %376 = tpu.concatenate %374, %330, %286, %242, %198, %154, %110, %66 in 0 : vector<8x32xf32>, vector<8x32xf32>, vector<8x32xf32>, vector<8x32xf32>, vector<8x32xf32>, vector<8x32xf32>, vector<8x32xf32>, vector<8x32xf32> -> vector<64x32xf32>
    %377 = arith.truncf %375 : vector<64x32xf32> to vector<64x32xbf16>
    %c0_76 = arith.constant 0 : index
    %c0_77 = arith.constant 0 : index
    %378 = vector.load %arg5[%c0_76, %c0_77] : memref<32x256xbf16, #tpu.memory_space<vmem>>, vector<32x256xbf16>
    %cst_78 = arith.constant dense<0.000000e+00> : vector<64x256xf32>
    %379 = tpu.matmul %377, %378, %cst_78 {dimension_numbers = #tpu.dot_dimension_numbers<[1], [0], [0], [1], [0, 0, 1, 1], [], []>} : vector<64x32xbf16>, vector<32x256xbf16>, vector<64x256xf32> -> vector<64x256xf32>
    %380 = arith.truncf %376 : vector<64x32xf32> to vector<64x32xbf16>
    %c0_79 = arith.constant 0 : index
    %c0_80 = arith.constant 0 : index
    %381 = vector.load %arg6[%c0_79, %c0_80] : memref<32x256xbf16, #tpu.memory_space<vmem>>, vector<32x256xbf16>
    %cst_81 = arith.constant dense<0.000000e+00> : vector<64x256xf32>
    %382 = tpu.matmul %380, %381, %cst_81 {dimension_numbers = #tpu.dot_dimension_numbers<[1], [0], [0], [1], [0, 0, 1, 1], [], []>} : vector<64x32xbf16>, vector<32x256xbf16>, vector<64x256xf32> -> vector<64x256xf32>
    %383 = arith.addf %379, %382 : vector<64x256xf32>
    %c0_82 = arith.constant 0 : index
    %c0_83 = arith.constant 0 : index
    %384 = vector.load %arg7[%c0_82, %c0_83] : memref<1x256xf32, #tpu.memory_space<vmem>>, vector<1x256xf32>
    %385 = vector.broadcast %384 : vector<1x256xf32> to vector<64x256xf32>
    %386 = arith.addf %383, %385 : vector<64x256xf32>
    %c0_84 = arith.constant 0 : index
    %c0_85 = arith.constant 0 : index
    %387 = vector.load %arg8[%c0_84, %c0_85] : memref<32x128xbf16, #tpu.memory_space<vmem>>, vector<32x128xbf16>
    %c0_86 = arith.constant 0 : index
    %c0_87 = arith.constant 0 : index
    %388 = vector.load %arg9[%c0_86, %c0_87] : memref<32x128xbf16, #tpu.memory_space<vmem>>, vector<32x128xbf16>
    %cst_88 = arith.constant 0.000000e+00 : f32
    %389 = vector.broadcast %cst_88 : f32 to vector<8x32xf32>
    %390 = vector.extract_strided_slice %386 {offsets = [0, 0], sizes = [8, 128], strides = [1, 1]} : vector<64x256xf32> to vector<8x128xf32>
    %391 = arith.truncf %389 : vector<8x32xf32> to vector<8x32xbf16>
    %cst_89 = arith.constant dense<0.000000e+00> : vector<8x128xf32>
    %392 = tpu.matmul %391, %387, %cst_89 {dimension_numbers = #tpu.dot_dimension_numbers<[1], [0], [0], [1], [0, 0, 1, 1], [], []>} : vector<8x32xbf16>, vector<32x128xbf16>, vector<8x128xf32> -> vector<8x128xf32>
    %393 = arith.addf %390, %392 : vector<8x128xf32>
    %394 = vector.extract_strided_slice %386 {offsets = [56, 128], sizes = [8, 128], strides = [1, 1]} : vector<64x256xf32> to vector<8x128xf32>
    %395 = arith.truncf %389 : vector<8x32xf32> to vector<8x32xbf16>
    %cst_90 = arith.constant dense<0.000000e+00> : vector<8x128xf32>
    %396 = tpu.matmul %395, %388, %cst_90 {dimension_numbers = #tpu.dot_dimension_numbers<[1], [0], [0], [1], [0, 0, 1, 1], [], []>} : vector<8x32xbf16>, vector<32x128xbf16>, vector<8x128xf32> -> vector<8x128xf32>
    %397 = arith.addf %394, %396 : vector<8x128xf32>
    %398 = vector.extract_strided_slice %393 {offsets = [0, 0], sizes = [8, 96], strides = [1, 1]} : vector<8x128xf32> to vector<8x96xf32>
    %cst_91 = arith.constant 5.000000e-01 : f32
    %399 = vector.broadcast %cst_91 : f32 to vector<8x96xf32>
    %400 = arith.mulf %399, %398 : vector<8x96xf32>
    %401 = math.tanh %400 : vector<8x96xf32>
    %cst_92 = arith.constant 1.000000e+00 : f32
    %402 = vector.broadcast %cst_92 : f32 to vector<8x96xf32>
    %403 = arith.addf %401, %402 : vector<8x96xf32>
    %cst_93 = arith.constant 5.000000e-01 : f32
    %404 = vector.broadcast %cst_93 : f32 to vector<8x96xf32>
    %405 = arith.mulf %404, %403 : vector<8x96xf32>
    %406 = vector.extract_strided_slice %405 {offsets = [0, 0], sizes = [8, 32], strides = [1, 1]} : vector<8x96xf32> to vector<8x32xf32>
    %407 = vector.extract_strided_slice %405 {offsets = [0, 32], sizes = [8, 32], strides = [1, 1]} : vector<8x96xf32> to vector<8x32xf32>
    %408 = vector.extract_strided_slice %405 {offsets = [0, 64], sizes = [8, 32], strides = [1, 1]} : vector<8x96xf32> to vector<8x32xf32>
    %409 = vector.extract_strided_slice %393 {offsets = [0, 96], sizes = [8, 32], strides = [1, 1]} : vector<8x128xf32> to vector<8x32xf32>
    %410 = math.tanh %409 : vector<8x32xf32>
    %411 = arith.mulf %407, %389 : vector<8x32xf32>
    %412 = arith.mulf %406, %410 : vector<8x32xf32>
    %413 = arith.addf %411, %412 : vector<8x32xf32>
    %414 = math.tanh %413 : vector<8x32xf32>
    %415 = arith.mulf %408, %414 : vector<8x32xf32>
    %416 = vector.extract_strided_slice %397 {offsets = [0, 0], sizes = [8, 96], strides = [1, 1]} : vector<8x128xf32> to vector<8x96xf32>
    %cst_94 = arith.constant 5.000000e-01 : f32
    %417 = vector.broadcast %cst_94 : f32 to vector<8x96xf32>
    %418 = arith.mulf %417, %416 : vector<8x96xf32>
    %419 = math.tanh %418 : vector<8x96xf32>
    %cst_95 = arith.constant 1.000000e+00 : f32
    %420 = vector.broadcast %cst_95 : f32 to vector<8x96xf32>
    %421 = arith.addf %419, %420 : vector<8x96xf32>
    %cst_96 = arith.constant 5.000000e-01 : f32
    %422 = vector.broadcast %cst_96 : f32 to vector<8x96xf32>
    %423 = arith.mulf %422, %421 : vector<8x96xf32>
    %424 = vector.extract_strided_slice %423 {offsets = [0, 0], sizes = [8, 32], strides = [1, 1]} : vector<8x96xf32> to vector<8x32xf32>
    %425 = vector.extract_strided_slice %423 {offsets = [0, 32], sizes = [8, 32], strides = [1, 1]} : vector<8x96xf32> to vector<8x32xf32>
    %426 = vector.extract_strided_slice %423 {offsets = [0, 64], sizes = [8, 32], strides = [1, 1]} : vector<8x96xf32> to vector<8x32xf32>
    %427 = vector.extract_strided_slice %397 {offsets = [0, 96], sizes = [8, 32], strides = [1, 1]} : vector<8x128xf32> to vector<8x32xf32>
    %428 = math.tanh %427 : vector<8x32xf32>
    %429 = arith.mulf %425, %389 : vector<8x32xf32>
    %430 = arith.mulf %424, %428 : vector<8x32xf32>
    %431 = arith.addf %429, %430 : vector<8x32xf32>
    %432 = math.tanh %431 : vector<8x32xf32>
    %433 = arith.mulf %426, %432 : vector<8x32xf32>
    %434 = vector.extract_strided_slice %386 {offsets = [8, 0], sizes = [8, 128], strides = [1, 1]} : vector<64x256xf32> to vector<8x128xf32>
    %435 = arith.truncf %415 : vector<8x32xf32> to vector<8x32xbf16>
    %cst_97 = arith.constant dense<0.000000e+00> : vector<8x128xf32>
    %436 = tpu.matmul %435, %387, %cst_97 {dimension_numbers = #tpu.dot_dimension_numbers<[1], [0], [0], [1], [0, 0, 1, 1], [], []>} : vector<8x32xbf16>, vector<32x128xbf16>, vector<8x128xf32> -> vector<8x128xf32>
    %437 = arith.addf %434, %436 : vector<8x128xf32>
    %438 = vector.extract_strided_slice %386 {offsets = [48, 128], sizes = [8, 128], strides = [1, 1]} : vector<64x256xf32> to vector<8x128xf32>
    %439 = arith.truncf %433 : vector<8x32xf32> to vector<8x32xbf16>
    %cst_98 = arith.constant dense<0.000000e+00> : vector<8x128xf32>
    %440 = tpu.matmul %439, %388, %cst_98 {dimension_numbers = #tpu.dot_dimension_numbers<[1], [0], [0], [1], [0, 0, 1, 1], [], []>} : vector<8x32xbf16>, vector<32x128xbf16>, vector<8x128xf32> -> vector<8x128xf32>
    %441 = arith.addf %438, %440 : vector<8x128xf32>
    %442 = vector.extract_strided_slice %437 {offsets = [0, 0], sizes = [8, 96], strides = [1, 1]} : vector<8x128xf32> to vector<8x96xf32>
    %cst_99 = arith.constant 5.000000e-01 : f32
    %443 = vector.broadcast %cst_99 : f32 to vector<8x96xf32>
    %444 = arith.mulf %443, %442 : vector<8x96xf32>
    %445 = math.tanh %444 : vector<8x96xf32>
    %cst_100 = arith.constant 1.000000e+00 : f32
    %446 = vector.broadcast %cst_100 : f32 to vector<8x96xf32>
    %447 = arith.addf %445, %446 : vector<8x96xf32>
    %cst_101 = arith.constant 5.000000e-01 : f32
    %448 = vector.broadcast %cst_101 : f32 to vector<8x96xf32>
    %449 = arith.mulf %448, %447 : vector<8x96xf32>
    %450 = vector.extract_strided_slice %449 {offsets = [0, 0], sizes = [8, 32], strides = [1, 1]} : vector<8x96xf32> to vector<8x32xf32>
    %451 = vector.extract_strided_slice %449 {offsets = [0, 32], sizes = [8, 32], strides = [1, 1]} : vector<8x96xf32> to vector<8x32xf32>
    %452 = vector.extract_strided_slice %449 {offsets = [0, 64], sizes = [8, 32], strides = [1, 1]} : vector<8x96xf32> to vector<8x32xf32>
    %453 = vector.extract_strided_slice %437 {offsets = [0, 96], sizes = [8, 32], strides = [1, 1]} : vector<8x128xf32> to vector<8x32xf32>
    %454 = math.tanh %453 : vector<8x32xf32>
    %455 = arith.mulf %451, %413 : vector<8x32xf32>
    %456 = arith.mulf %450, %454 : vector<8x32xf32>
    %457 = arith.addf %455, %456 : vector<8x32xf32>
    %458 = math.tanh %457 : vector<8x32xf32>
    %459 = arith.mulf %452, %458 : vector<8x32xf32>
    %460 = vector.extract_strided_slice %441 {offsets = [0, 0], sizes = [8, 96], strides = [1, 1]} : vector<8x128xf32> to vector<8x96xf32>
    %cst_102 = arith.constant 5.000000e-01 : f32
    %461 = vector.broadcast %cst_102 : f32 to vector<8x96xf32>
    %462 = arith.mulf %461, %460 : vector<8x96xf32>
    %463 = math.tanh %462 : vector<8x96xf32>
    %cst_103 = arith.constant 1.000000e+00 : f32
    %464 = vector.broadcast %cst_103 : f32 to vector<8x96xf32>
    %465 = arith.addf %463, %464 : vector<8x96xf32>
    %cst_104 = arith.constant 5.000000e-01 : f32
    %466 = vector.broadcast %cst_104 : f32 to vector<8x96xf32>
    %467 = arith.mulf %466, %465 : vector<8x96xf32>
    %468 = vector.extract_strided_slice %467 {offsets = [0, 0], sizes = [8, 32], strides = [1, 1]} : vector<8x96xf32> to vector<8x32xf32>
    %469 = vector.extract_strided_slice %467 {offsets = [0, 32], sizes = [8, 32], strides = [1, 1]} : vector<8x96xf32> to vector<8x32xf32>
    %470 = vector.extract_strided_slice %467 {offsets = [0, 64], sizes = [8, 32], strides = [1, 1]} : vector<8x96xf32> to vector<8x32xf32>
    %471 = vector.extract_strided_slice %441 {offsets = [0, 96], sizes = [8, 32], strides = [1, 1]} : vector<8x128xf32> to vector<8x32xf32>
    %472 = math.tanh %471 : vector<8x32xf32>
    %473 = arith.mulf %469, %431 : vector<8x32xf32>
    %474 = arith.mulf %468, %472 : vector<8x32xf32>
    %475 = arith.addf %473, %474 : vector<8x32xf32>
    %476 = math.tanh %475 : vector<8x32xf32>
    %477 = arith.mulf %470, %476 : vector<8x32xf32>
    %478 = vector.extract_strided_slice %386 {offsets = [16, 0], sizes = [8, 128], strides = [1, 1]} : vector<64x256xf32> to vector<8x128xf32>
    %479 = arith.truncf %459 : vector<8x32xf32> to vector<8x32xbf16>
    %cst_105 = arith.constant dense<0.000000e+00> : vector<8x128xf32>
    %480 = tpu.matmul %479, %387, %cst_105 {dimension_numbers = #tpu.dot_dimension_numbers<[1], [0], [0], [1], [0, 0, 1, 1], [], []>} : vector<8x32xbf16>, vector<32x128xbf16>, vector<8x128xf32> -> vector<8x128xf32>
    %481 = arith.addf %478, %480 : vector<8x128xf32>
    %482 = vector.extract_strided_slice %386 {offsets = [40, 128], sizes = [8, 128], strides = [1, 1]} : vector<64x256xf32> to vector<8x128xf32>
    %483 = arith.truncf %477 : vector<8x32xf32> to vector<8x32xbf16>
    %cst_106 = arith.constant dense<0.000000e+00> : vector<8x128xf32>
    %484 = tpu.matmul %483, %388, %cst_106 {dimension_numbers = #tpu.dot_dimension_numbers<[1], [0], [0], [1], [0, 0, 1, 1], [], []>} : vector<8x32xbf16>, vector<32x128xbf16>, vector<8x128xf32> -> vector<8x128xf32>
    %485 = arith.addf %482, %484 : vector<8x128xf32>
    %486 = vector.extract_strided_slice %481 {offsets = [0, 0], sizes = [8, 96], strides = [1, 1]} : vector<8x128xf32> to vector<8x96xf32>
    %cst_107 = arith.constant 5.000000e-01 : f32
    %487 = vector.broadcast %cst_107 : f32 to vector<8x96xf32>
    %488 = arith.mulf %487, %486 : vector<8x96xf32>
    %489 = math.tanh %488 : vector<8x96xf32>
    %cst_108 = arith.constant 1.000000e+00 : f32
    %490 = vector.broadcast %cst_108 : f32 to vector<8x96xf32>
    %491 = arith.addf %489, %490 : vector<8x96xf32>
    %cst_109 = arith.constant 5.000000e-01 : f32
    %492 = vector.broadcast %cst_109 : f32 to vector<8x96xf32>
    %493 = arith.mulf %492, %491 : vector<8x96xf32>
    %494 = vector.extract_strided_slice %493 {offsets = [0, 0], sizes = [8, 32], strides = [1, 1]} : vector<8x96xf32> to vector<8x32xf32>
    %495 = vector.extract_strided_slice %493 {offsets = [0, 32], sizes = [8, 32], strides = [1, 1]} : vector<8x96xf32> to vector<8x32xf32>
    %496 = vector.extract_strided_slice %493 {offsets = [0, 64], sizes = [8, 32], strides = [1, 1]} : vector<8x96xf32> to vector<8x32xf32>
    %497 = vector.extract_strided_slice %481 {offsets = [0, 96], sizes = [8, 32], strides = [1, 1]} : vector<8x128xf32> to vector<8x32xf32>
    %498 = math.tanh %497 : vector<8x32xf32>
    %499 = arith.mulf %495, %457 : vector<8x32xf32>
    %500 = arith.mulf %494, %498 : vector<8x32xf32>
    %501 = arith.addf %499, %500 : vector<8x32xf32>
    %502 = math.tanh %501 : vector<8x32xf32>
    %503 = arith.mulf %496, %502 : vector<8x32xf32>
    %504 = vector.extract_strided_slice %485 {offsets = [0, 0], sizes = [8, 96], strides = [1, 1]} : vector<8x128xf32> to vector<8x96xf32>
    %cst_110 = arith.constant 5.000000e-01 : f32
    %505 = vector.broadcast %cst_110 : f32 to vector<8x96xf32>
    %506 = arith.mulf %505, %504 : vector<8x96xf32>
    %507 = math.tanh %506 : vector<8x96xf32>
    %cst_111 = arith.constant 1.000000e+00 : f32
    %508 = vector.broadcast %cst_111 : f32 to vector<8x96xf32>
    %509 = arith.addf %507, %508 : vector<8x96xf32>
    %cst_112 = arith.constant 5.000000e-01 : f32
    %510 = vector.broadcast %cst_112 : f32 to vector<8x96xf32>
    %511 = arith.mulf %510, %509 : vector<8x96xf32>
    %512 = vector.extract_strided_slice %511 {offsets = [0, 0], sizes = [8, 32], strides = [1, 1]} : vector<8x96xf32> to vector<8x32xf32>
    %513 = vector.extract_strided_slice %511 {offsets = [0, 32], sizes = [8, 32], strides = [1, 1]} : vector<8x96xf32> to vector<8x32xf32>
    %514 = vector.extract_strided_slice %511 {offsets = [0, 64], sizes = [8, 32], strides = [1, 1]} : vector<8x96xf32> to vector<8x32xf32>
    %515 = vector.extract_strided_slice %485 {offsets = [0, 96], sizes = [8, 32], strides = [1, 1]} : vector<8x128xf32> to vector<8x32xf32>
    %516 = math.tanh %515 : vector<8x32xf32>
    %517 = arith.mulf %513, %475 : vector<8x32xf32>
    %518 = arith.mulf %512, %516 : vector<8x32xf32>
    %519 = arith.addf %517, %518 : vector<8x32xf32>
    %520 = math.tanh %519 : vector<8x32xf32>
    %521 = arith.mulf %514, %520 : vector<8x32xf32>
    %522 = vector.extract_strided_slice %386 {offsets = [24, 0], sizes = [8, 128], strides = [1, 1]} : vector<64x256xf32> to vector<8x128xf32>
    %523 = arith.truncf %503 : vector<8x32xf32> to vector<8x32xbf16>
    %cst_113 = arith.constant dense<0.000000e+00> : vector<8x128xf32>
    %524 = tpu.matmul %523, %387, %cst_113 {dimension_numbers = #tpu.dot_dimension_numbers<[1], [0], [0], [1], [0, 0, 1, 1], [], []>} : vector<8x32xbf16>, vector<32x128xbf16>, vector<8x128xf32> -> vector<8x128xf32>
    %525 = arith.addf %522, %524 : vector<8x128xf32>
    %526 = vector.extract_strided_slice %386 {offsets = [32, 128], sizes = [8, 128], strides = [1, 1]} : vector<64x256xf32> to vector<8x128xf32>
    %527 = arith.truncf %521 : vector<8x32xf32> to vector<8x32xbf16>
    %cst_114 = arith.constant dense<0.000000e+00> : vector<8x128xf32>
    %528 = tpu.matmul %527, %388, %cst_114 {dimension_numbers = #tpu.dot_dimension_numbers<[1], [0], [0], [1], [0, 0, 1, 1], [], []>} : vector<8x32xbf16>, vector<32x128xbf16>, vector<8x128xf32> -> vector<8x128xf32>
    %529 = arith.addf %526, %528 : vector<8x128xf32>
    %530 = vector.extract_strided_slice %525 {offsets = [0, 0], sizes = [8, 96], strides = [1, 1]} : vector<8x128xf32> to vector<8x96xf32>
    %cst_115 = arith.constant 5.000000e-01 : f32
    %531 = vector.broadcast %cst_115 : f32 to vector<8x96xf32>
    %532 = arith.mulf %531, %530 : vector<8x96xf32>
    %533 = math.tanh %532 : vector<8x96xf32>
    %cst_116 = arith.constant 1.000000e+00 : f32
    %534 = vector.broadcast %cst_116 : f32 to vector<8x96xf32>
    %535 = arith.addf %533, %534 : vector<8x96xf32>
    %cst_117 = arith.constant 5.000000e-01 : f32
    %536 = vector.broadcast %cst_117 : f32 to vector<8x96xf32>
    %537 = arith.mulf %536, %535 : vector<8x96xf32>
    %538 = vector.extract_strided_slice %537 {offsets = [0, 0], sizes = [8, 32], strides = [1, 1]} : vector<8x96xf32> to vector<8x32xf32>
    %539 = vector.extract_strided_slice %537 {offsets = [0, 32], sizes = [8, 32], strides = [1, 1]} : vector<8x96xf32> to vector<8x32xf32>
    %540 = vector.extract_strided_slice %537 {offsets = [0, 64], sizes = [8, 32], strides = [1, 1]} : vector<8x96xf32> to vector<8x32xf32>
    %541 = vector.extract_strided_slice %525 {offsets = [0, 96], sizes = [8, 32], strides = [1, 1]} : vector<8x128xf32> to vector<8x32xf32>
    %542 = math.tanh %541 : vector<8x32xf32>
    %543 = arith.mulf %539, %501 : vector<8x32xf32>
    %544 = arith.mulf %538, %542 : vector<8x32xf32>
    %545 = arith.addf %543, %544 : vector<8x32xf32>
    %546 = math.tanh %545 : vector<8x32xf32>
    %547 = arith.mulf %540, %546 : vector<8x32xf32>
    %548 = vector.extract_strided_slice %529 {offsets = [0, 0], sizes = [8, 96], strides = [1, 1]} : vector<8x128xf32> to vector<8x96xf32>
    %cst_118 = arith.constant 5.000000e-01 : f32
    %549 = vector.broadcast %cst_118 : f32 to vector<8x96xf32>
    %550 = arith.mulf %549, %548 : vector<8x96xf32>
    %551 = math.tanh %550 : vector<8x96xf32>
    %cst_119 = arith.constant 1.000000e+00 : f32
    %552 = vector.broadcast %cst_119 : f32 to vector<8x96xf32>
    %553 = arith.addf %551, %552 : vector<8x96xf32>
    %cst_120 = arith.constant 5.000000e-01 : f32
    %554 = vector.broadcast %cst_120 : f32 to vector<8x96xf32>
    %555 = arith.mulf %554, %553 : vector<8x96xf32>
    %556 = vector.extract_strided_slice %555 {offsets = [0, 0], sizes = [8, 32], strides = [1, 1]} : vector<8x96xf32> to vector<8x32xf32>
    %557 = vector.extract_strided_slice %555 {offsets = [0, 32], sizes = [8, 32], strides = [1, 1]} : vector<8x96xf32> to vector<8x32xf32>
    %558 = vector.extract_strided_slice %555 {offsets = [0, 64], sizes = [8, 32], strides = [1, 1]} : vector<8x96xf32> to vector<8x32xf32>
    %559 = vector.extract_strided_slice %529 {offsets = [0, 96], sizes = [8, 32], strides = [1, 1]} : vector<8x128xf32> to vector<8x32xf32>
    %560 = math.tanh %559 : vector<8x32xf32>
    %561 = arith.mulf %557, %519 : vector<8x32xf32>
    %562 = arith.mulf %556, %560 : vector<8x32xf32>
    %563 = arith.addf %561, %562 : vector<8x32xf32>
    %564 = math.tanh %563 : vector<8x32xf32>
    %565 = arith.mulf %558, %564 : vector<8x32xf32>
    %566 = vector.extract_strided_slice %386 {offsets = [32, 0], sizes = [8, 128], strides = [1, 1]} : vector<64x256xf32> to vector<8x128xf32>
    %567 = arith.truncf %547 : vector<8x32xf32> to vector<8x32xbf16>
    %cst_121 = arith.constant dense<0.000000e+00> : vector<8x128xf32>
    %568 = tpu.matmul %567, %387, %cst_121 {dimension_numbers = #tpu.dot_dimension_numbers<[1], [0], [0], [1], [0, 0, 1, 1], [], []>} : vector<8x32xbf16>, vector<32x128xbf16>, vector<8x128xf32> -> vector<8x128xf32>
    %569 = arith.addf %566, %568 : vector<8x128xf32>
    %570 = vector.extract_strided_slice %386 {offsets = [24, 128], sizes = [8, 128], strides = [1, 1]} : vector<64x256xf32> to vector<8x128xf32>
    %571 = arith.truncf %565 : vector<8x32xf32> to vector<8x32xbf16>
    %cst_122 = arith.constant dense<0.000000e+00> : vector<8x128xf32>
    %572 = tpu.matmul %571, %388, %cst_122 {dimension_numbers = #tpu.dot_dimension_numbers<[1], [0], [0], [1], [0, 0, 1, 1], [], []>} : vector<8x32xbf16>, vector<32x128xbf16>, vector<8x128xf32> -> vector<8x128xf32>
    %573 = arith.addf %570, %572 : vector<8x128xf32>
    %574 = vector.extract_strided_slice %569 {offsets = [0, 0], sizes = [8, 96], strides = [1, 1]} : vector<8x128xf32> to vector<8x96xf32>
    %cst_123 = arith.constant 5.000000e-01 : f32
    %575 = vector.broadcast %cst_123 : f32 to vector<8x96xf32>
    %576 = arith.mulf %575, %574 : vector<8x96xf32>
    %577 = math.tanh %576 : vector<8x96xf32>
    %cst_124 = arith.constant 1.000000e+00 : f32
    %578 = vector.broadcast %cst_124 : f32 to vector<8x96xf32>
    %579 = arith.addf %577, %578 : vector<8x96xf32>
    %cst_125 = arith.constant 5.000000e-01 : f32
    %580 = vector.broadcast %cst_125 : f32 to vector<8x96xf32>
    %581 = arith.mulf %580, %579 : vector<8x96xf32>
    %582 = vector.extract_strided_slice %581 {offsets = [0, 0], sizes = [8, 32], strides = [1, 1]} : vector<8x96xf32> to vector<8x32xf32>
    %583 = vector.extract_strided_slice %581 {offsets = [0, 32], sizes = [8, 32], strides = [1, 1]} : vector<8x96xf32> to vector<8x32xf32>
    %584 = vector.extract_strided_slice %581 {offsets = [0, 64], sizes = [8, 32], strides = [1, 1]} : vector<8x96xf32> to vector<8x32xf32>
    %585 = vector.extract_strided_slice %569 {offsets = [0, 96], sizes = [8, 32], strides = [1, 1]} : vector<8x128xf32> to vector<8x32xf32>
    %586 = math.tanh %585 : vector<8x32xf32>
    %587 = arith.mulf %583, %545 : vector<8x32xf32>
    %588 = arith.mulf %582, %586 : vector<8x32xf32>
    %589 = arith.addf %587, %588 : vector<8x32xf32>
    %590 = math.tanh %589 : vector<8x32xf32>
    %591 = arith.mulf %584, %590 : vector<8x32xf32>
    %592 = vector.extract_strided_slice %573 {offsets = [0, 0], sizes = [8, 96], strides = [1, 1]} : vector<8x128xf32> to vector<8x96xf32>
    %cst_126 = arith.constant 5.000000e-01 : f32
    %593 = vector.broadcast %cst_126 : f32 to vector<8x96xf32>
    %594 = arith.mulf %593, %592 : vector<8x96xf32>
    %595 = math.tanh %594 : vector<8x96xf32>
    %cst_127 = arith.constant 1.000000e+00 : f32
    %596 = vector.broadcast %cst_127 : f32 to vector<8x96xf32>
    %597 = arith.addf %595, %596 : vector<8x96xf32>
    %cst_128 = arith.constant 5.000000e-01 : f32
    %598 = vector.broadcast %cst_128 : f32 to vector<8x96xf32>
    %599 = arith.mulf %598, %597 : vector<8x96xf32>
    %600 = vector.extract_strided_slice %599 {offsets = [0, 0], sizes = [8, 32], strides = [1, 1]} : vector<8x96xf32> to vector<8x32xf32>
    %601 = vector.extract_strided_slice %599 {offsets = [0, 32], sizes = [8, 32], strides = [1, 1]} : vector<8x96xf32> to vector<8x32xf32>
    %602 = vector.extract_strided_slice %599 {offsets = [0, 64], sizes = [8, 32], strides = [1, 1]} : vector<8x96xf32> to vector<8x32xf32>
    %603 = vector.extract_strided_slice %573 {offsets = [0, 96], sizes = [8, 32], strides = [1, 1]} : vector<8x128xf32> to vector<8x32xf32>
    %604 = math.tanh %603 : vector<8x32xf32>
    %605 = arith.mulf %601, %563 : vector<8x32xf32>
    %606 = arith.mulf %600, %604 : vector<8x32xf32>
    %607 = arith.addf %605, %606 : vector<8x32xf32>
    %608 = math.tanh %607 : vector<8x32xf32>
    %609 = arith.mulf %602, %608 : vector<8x32xf32>
    %610 = vector.extract_strided_slice %386 {offsets = [40, 0], sizes = [8, 128], strides = [1, 1]} : vector<64x256xf32> to vector<8x128xf32>
    %611 = arith.truncf %591 : vector<8x32xf32> to vector<8x32xbf16>
    %cst_129 = arith.constant dense<0.000000e+00> : vector<8x128xf32>
    %612 = tpu.matmul %611, %387, %cst_129 {dimension_numbers = #tpu.dot_dimension_numbers<[1], [0], [0], [1], [0, 0, 1, 1], [], []>} : vector<8x32xbf16>, vector<32x128xbf16>, vector<8x128xf32> -> vector<8x128xf32>
    %613 = arith.addf %610, %612 : vector<8x128xf32>
    %614 = vector.extract_strided_slice %386 {offsets = [16, 128], sizes = [8, 128], strides = [1, 1]} : vector<64x256xf32> to vector<8x128xf32>
    %615 = arith.truncf %609 : vector<8x32xf32> to vector<8x32xbf16>
    %cst_130 = arith.constant dense<0.000000e+00> : vector<8x128xf32>
    %616 = tpu.matmul %615, %388, %cst_130 {dimension_numbers = #tpu.dot_dimension_numbers<[1], [0], [0], [1], [0, 0, 1, 1], [], []>} : vector<8x32xbf16>, vector<32x128xbf16>, vector<8x128xf32> -> vector<8x128xf32>
    %617 = arith.addf %614, %616 : vector<8x128xf32>
    %618 = vector.extract_strided_slice %613 {offsets = [0, 0], sizes = [8, 96], strides = [1, 1]} : vector<8x128xf32> to vector<8x96xf32>
    %cst_131 = arith.constant 5.000000e-01 : f32
    %619 = vector.broadcast %cst_131 : f32 to vector<8x96xf32>
    %620 = arith.mulf %619, %618 : vector<8x96xf32>
    %621 = math.tanh %620 : vector<8x96xf32>
    %cst_132 = arith.constant 1.000000e+00 : f32
    %622 = vector.broadcast %cst_132 : f32 to vector<8x96xf32>
    %623 = arith.addf %621, %622 : vector<8x96xf32>
    %cst_133 = arith.constant 5.000000e-01 : f32
    %624 = vector.broadcast %cst_133 : f32 to vector<8x96xf32>
    %625 = arith.mulf %624, %623 : vector<8x96xf32>
    %626 = vector.extract_strided_slice %625 {offsets = [0, 0], sizes = [8, 32], strides = [1, 1]} : vector<8x96xf32> to vector<8x32xf32>
    %627 = vector.extract_strided_slice %625 {offsets = [0, 32], sizes = [8, 32], strides = [1, 1]} : vector<8x96xf32> to vector<8x32xf32>
    %628 = vector.extract_strided_slice %625 {offsets = [0, 64], sizes = [8, 32], strides = [1, 1]} : vector<8x96xf32> to vector<8x32xf32>
    %629 = vector.extract_strided_slice %613 {offsets = [0, 96], sizes = [8, 32], strides = [1, 1]} : vector<8x128xf32> to vector<8x32xf32>
    %630 = math.tanh %629 : vector<8x32xf32>
    %631 = arith.mulf %627, %589 : vector<8x32xf32>
    %632 = arith.mulf %626, %630 : vector<8x32xf32>
    %633 = arith.addf %631, %632 : vector<8x32xf32>
    %634 = math.tanh %633 : vector<8x32xf32>
    %635 = arith.mulf %628, %634 : vector<8x32xf32>
    %636 = vector.extract_strided_slice %617 {offsets = [0, 0], sizes = [8, 96], strides = [1, 1]} : vector<8x128xf32> to vector<8x96xf32>
    %cst_134 = arith.constant 5.000000e-01 : f32
    %637 = vector.broadcast %cst_134 : f32 to vector<8x96xf32>
    %638 = arith.mulf %637, %636 : vector<8x96xf32>
    %639 = math.tanh %638 : vector<8x96xf32>
    %cst_135 = arith.constant 1.000000e+00 : f32
    %640 = vector.broadcast %cst_135 : f32 to vector<8x96xf32>
    %641 = arith.addf %639, %640 : vector<8x96xf32>
    %cst_136 = arith.constant 5.000000e-01 : f32
    %642 = vector.broadcast %cst_136 : f32 to vector<8x96xf32>
    %643 = arith.mulf %642, %641 : vector<8x96xf32>
    %644 = vector.extract_strided_slice %643 {offsets = [0, 0], sizes = [8, 32], strides = [1, 1]} : vector<8x96xf32> to vector<8x32xf32>
    %645 = vector.extract_strided_slice %643 {offsets = [0, 32], sizes = [8, 32], strides = [1, 1]} : vector<8x96xf32> to vector<8x32xf32>
    %646 = vector.extract_strided_slice %643 {offsets = [0, 64], sizes = [8, 32], strides = [1, 1]} : vector<8x96xf32> to vector<8x32xf32>
    %647 = vector.extract_strided_slice %617 {offsets = [0, 96], sizes = [8, 32], strides = [1, 1]} : vector<8x128xf32> to vector<8x32xf32>
    %648 = math.tanh %647 : vector<8x32xf32>
    %649 = arith.mulf %645, %607 : vector<8x32xf32>
    %650 = arith.mulf %644, %648 : vector<8x32xf32>
    %651 = arith.addf %649, %650 : vector<8x32xf32>
    %652 = math.tanh %651 : vector<8x32xf32>
    %653 = arith.mulf %646, %652 : vector<8x32xf32>
    %654 = vector.extract_strided_slice %386 {offsets = [48, 0], sizes = [8, 128], strides = [1, 1]} : vector<64x256xf32> to vector<8x128xf32>
    %655 = arith.truncf %635 : vector<8x32xf32> to vector<8x32xbf16>
    %cst_137 = arith.constant dense<0.000000e+00> : vector<8x128xf32>
    %656 = tpu.matmul %655, %387, %cst_137 {dimension_numbers = #tpu.dot_dimension_numbers<[1], [0], [0], [1], [0, 0, 1, 1], [], []>} : vector<8x32xbf16>, vector<32x128xbf16>, vector<8x128xf32> -> vector<8x128xf32>
    %657 = arith.addf %654, %656 : vector<8x128xf32>
    %658 = vector.extract_strided_slice %386 {offsets = [8, 128], sizes = [8, 128], strides = [1, 1]} : vector<64x256xf32> to vector<8x128xf32>
    %659 = arith.truncf %653 : vector<8x32xf32> to vector<8x32xbf16>
    %cst_138 = arith.constant dense<0.000000e+00> : vector<8x128xf32>
    %660 = tpu.matmul %659, %388, %cst_138 {dimension_numbers = #tpu.dot_dimension_numbers<[1], [0], [0], [1], [0, 0, 1, 1], [], []>} : vector<8x32xbf16>, vector<32x128xbf16>, vector<8x128xf32> -> vector<8x128xf32>
    %661 = arith.addf %658, %660 : vector<8x128xf32>
    %662 = vector.extract_strided_slice %657 {offsets = [0, 0], sizes = [8, 96], strides = [1, 1]} : vector<8x128xf32> to vector<8x96xf32>
    %cst_139 = arith.constant 5.000000e-01 : f32
    %663 = vector.broadcast %cst_139 : f32 to vector<8x96xf32>
    %664 = arith.mulf %663, %662 : vector<8x96xf32>
    %665 = math.tanh %664 : vector<8x96xf32>
    %cst_140 = arith.constant 1.000000e+00 : f32
    %666 = vector.broadcast %cst_140 : f32 to vector<8x96xf32>
    %667 = arith.addf %665, %666 : vector<8x96xf32>
    %cst_141 = arith.constant 5.000000e-01 : f32
    %668 = vector.broadcast %cst_141 : f32 to vector<8x96xf32>
    %669 = arith.mulf %668, %667 : vector<8x96xf32>
    %670 = vector.extract_strided_slice %669 {offsets = [0, 0], sizes = [8, 32], strides = [1, 1]} : vector<8x96xf32> to vector<8x32xf32>
    %671 = vector.extract_strided_slice %669 {offsets = [0, 32], sizes = [8, 32], strides = [1, 1]} : vector<8x96xf32> to vector<8x32xf32>
    %672 = vector.extract_strided_slice %669 {offsets = [0, 64], sizes = [8, 32], strides = [1, 1]} : vector<8x96xf32> to vector<8x32xf32>
    %673 = vector.extract_strided_slice %657 {offsets = [0, 96], sizes = [8, 32], strides = [1, 1]} : vector<8x128xf32> to vector<8x32xf32>
    %674 = math.tanh %673 : vector<8x32xf32>
    %675 = arith.mulf %671, %633 : vector<8x32xf32>
    %676 = arith.mulf %670, %674 : vector<8x32xf32>
    %677 = arith.addf %675, %676 : vector<8x32xf32>
    %678 = math.tanh %677 : vector<8x32xf32>
    %679 = arith.mulf %672, %678 : vector<8x32xf32>
    %680 = vector.extract_strided_slice %661 {offsets = [0, 0], sizes = [8, 96], strides = [1, 1]} : vector<8x128xf32> to vector<8x96xf32>
    %cst_142 = arith.constant 5.000000e-01 : f32
    %681 = vector.broadcast %cst_142 : f32 to vector<8x96xf32>
    %682 = arith.mulf %681, %680 : vector<8x96xf32>
    %683 = math.tanh %682 : vector<8x96xf32>
    %cst_143 = arith.constant 1.000000e+00 : f32
    %684 = vector.broadcast %cst_143 : f32 to vector<8x96xf32>
    %685 = arith.addf %683, %684 : vector<8x96xf32>
    %cst_144 = arith.constant 5.000000e-01 : f32
    %686 = vector.broadcast %cst_144 : f32 to vector<8x96xf32>
    %687 = arith.mulf %686, %685 : vector<8x96xf32>
    %688 = vector.extract_strided_slice %687 {offsets = [0, 0], sizes = [8, 32], strides = [1, 1]} : vector<8x96xf32> to vector<8x32xf32>
    %689 = vector.extract_strided_slice %687 {offsets = [0, 32], sizes = [8, 32], strides = [1, 1]} : vector<8x96xf32> to vector<8x32xf32>
    %690 = vector.extract_strided_slice %687 {offsets = [0, 64], sizes = [8, 32], strides = [1, 1]} : vector<8x96xf32> to vector<8x32xf32>
    %691 = vector.extract_strided_slice %661 {offsets = [0, 96], sizes = [8, 32], strides = [1, 1]} : vector<8x128xf32> to vector<8x32xf32>
    %692 = math.tanh %691 : vector<8x32xf32>
    %693 = arith.mulf %689, %651 : vector<8x32xf32>
    %694 = arith.mulf %688, %692 : vector<8x32xf32>
    %695 = arith.addf %693, %694 : vector<8x32xf32>
    %696 = math.tanh %695 : vector<8x32xf32>
    %697 = arith.mulf %690, %696 : vector<8x32xf32>
    %698 = vector.extract_strided_slice %386 {offsets = [56, 0], sizes = [8, 128], strides = [1, 1]} : vector<64x256xf32> to vector<8x128xf32>
    %699 = arith.truncf %679 : vector<8x32xf32> to vector<8x32xbf16>
    %cst_145 = arith.constant dense<0.000000e+00> : vector<8x128xf32>
    %700 = tpu.matmul %699, %387, %cst_145 {dimension_numbers = #tpu.dot_dimension_numbers<[1], [0], [0], [1], [0, 0, 1, 1], [], []>} : vector<8x32xbf16>, vector<32x128xbf16>, vector<8x128xf32> -> vector<8x128xf32>
    %701 = arith.addf %698, %700 : vector<8x128xf32>
    %702 = vector.extract_strided_slice %386 {offsets = [0, 128], sizes = [8, 128], strides = [1, 1]} : vector<64x256xf32> to vector<8x128xf32>
    %703 = arith.truncf %697 : vector<8x32xf32> to vector<8x32xbf16>
    %cst_146 = arith.constant dense<0.000000e+00> : vector<8x128xf32>
    %704 = tpu.matmul %703, %388, %cst_146 {dimension_numbers = #tpu.dot_dimension_numbers<[1], [0], [0], [1], [0, 0, 1, 1], [], []>} : vector<8x32xbf16>, vector<32x128xbf16>, vector<8x128xf32> -> vector<8x128xf32>
    %705 = arith.addf %702, %704 : vector<8x128xf32>
    %706 = vector.extract_strided_slice %701 {offsets = [0, 0], sizes = [8, 96], strides = [1, 1]} : vector<8x128xf32> to vector<8x96xf32>
    %cst_147 = arith.constant 5.000000e-01 : f32
    %707 = vector.broadcast %cst_147 : f32 to vector<8x96xf32>
    %708 = arith.mulf %707, %706 : vector<8x96xf32>
    %709 = math.tanh %708 : vector<8x96xf32>
    %cst_148 = arith.constant 1.000000e+00 : f32
    %710 = vector.broadcast %cst_148 : f32 to vector<8x96xf32>
    %711 = arith.addf %709, %710 : vector<8x96xf32>
    %cst_149 = arith.constant 5.000000e-01 : f32
    %712 = vector.broadcast %cst_149 : f32 to vector<8x96xf32>
    %713 = arith.mulf %712, %711 : vector<8x96xf32>
    %714 = vector.extract_strided_slice %713 {offsets = [0, 0], sizes = [8, 32], strides = [1, 1]} : vector<8x96xf32> to vector<8x32xf32>
    %715 = vector.extract_strided_slice %713 {offsets = [0, 32], sizes = [8, 32], strides = [1, 1]} : vector<8x96xf32> to vector<8x32xf32>
    %716 = vector.extract_strided_slice %713 {offsets = [0, 64], sizes = [8, 32], strides = [1, 1]} : vector<8x96xf32> to vector<8x32xf32>
    %717 = vector.extract_strided_slice %701 {offsets = [0, 96], sizes = [8, 32], strides = [1, 1]} : vector<8x128xf32> to vector<8x32xf32>
    %718 = math.tanh %717 : vector<8x32xf32>
    %719 = arith.mulf %715, %677 : vector<8x32xf32>
    %720 = arith.mulf %714, %718 : vector<8x32xf32>
    %721 = arith.addf %719, %720 : vector<8x32xf32>
    %722 = math.tanh %721 : vector<8x32xf32>
    %723 = arith.mulf %716, %722 : vector<8x32xf32>
    %724 = vector.extract_strided_slice %705 {offsets = [0, 0], sizes = [8, 96], strides = [1, 1]} : vector<8x128xf32> to vector<8x96xf32>
    %cst_150 = arith.constant 5.000000e-01 : f32
    %725 = vector.broadcast %cst_150 : f32 to vector<8x96xf32>
    %726 = arith.mulf %725, %724 : vector<8x96xf32>
    %727 = math.tanh %726 : vector<8x96xf32>
    %cst_151 = arith.constant 1.000000e+00 : f32
    %728 = vector.broadcast %cst_151 : f32 to vector<8x96xf32>
    %729 = arith.addf %727, %728 : vector<8x96xf32>
    %cst_152 = arith.constant 5.000000e-01 : f32
    %730 = vector.broadcast %cst_152 : f32 to vector<8x96xf32>
    %731 = arith.mulf %730, %729 : vector<8x96xf32>
    %732 = vector.extract_strided_slice %731 {offsets = [0, 0], sizes = [8, 32], strides = [1, 1]} : vector<8x96xf32> to vector<8x32xf32>
    %733 = vector.extract_strided_slice %731 {offsets = [0, 32], sizes = [8, 32], strides = [1, 1]} : vector<8x96xf32> to vector<8x32xf32>
    %734 = vector.extract_strided_slice %731 {offsets = [0, 64], sizes = [8, 32], strides = [1, 1]} : vector<8x96xf32> to vector<8x32xf32>
    %735 = vector.extract_strided_slice %705 {offsets = [0, 96], sizes = [8, 32], strides = [1, 1]} : vector<8x128xf32> to vector<8x32xf32>
    %736 = math.tanh %735 : vector<8x32xf32>
    %737 = arith.mulf %733, %695 : vector<8x32xf32>
    %738 = arith.mulf %732, %736 : vector<8x32xf32>
    %739 = arith.addf %737, %738 : vector<8x32xf32>
    %740 = math.tanh %739 : vector<8x32xf32>
    %741 = arith.mulf %734, %740 : vector<8x32xf32>
    %742 = tpu.concatenate %415, %459, %503, %547, %591, %635, %679, %723 in 0 : vector<8x32xf32>, vector<8x32xf32>, vector<8x32xf32>, vector<8x32xf32>, vector<8x32xf32>, vector<8x32xf32>, vector<8x32xf32>, vector<8x32xf32> -> vector<64x32xf32>
    %743 = tpu.concatenate %741, %697, %653, %609, %565, %521, %477, %433 in 0 : vector<8x32xf32>, vector<8x32xf32>, vector<8x32xf32>, vector<8x32xf32>, vector<8x32xf32>, vector<8x32xf32>, vector<8x32xf32>, vector<8x32xf32> -> vector<64x32xf32>
    %744 = arith.truncf %742 : vector<64x32xf32> to vector<64x32xbf16>
    %c0_153 = arith.constant 0 : index
    %c0_154 = arith.constant 0 : index
    %745 = vector.load %arg10[%c0_153, %c0_154] : memref<32x128xbf16, #tpu.memory_space<vmem>>, vector<32x128xbf16>
    %cst_155 = arith.constant dense<0.000000e+00> : vector<64x128xf32>
    %746 = tpu.matmul %744, %745, %cst_155 {dimension_numbers = #tpu.dot_dimension_numbers<[1], [0], [0], [1], [0, 0, 1, 1], [], []>} : vector<64x32xbf16>, vector<32x128xbf16>, vector<64x128xf32> -> vector<64x128xf32>
    %747 = arith.truncf %743 : vector<64x32xf32> to vector<64x32xbf16>
    %c0_156 = arith.constant 0 : index
    %c0_157 = arith.constant 0 : index
    %748 = vector.load %arg11[%c0_156, %c0_157] : memref<32x128xbf16, #tpu.memory_space<vmem>>, vector<32x128xbf16>
    %cst_158 = arith.constant dense<0.000000e+00> : vector<64x128xf32>
    %749 = tpu.matmul %747, %748, %cst_158 {dimension_numbers = #tpu.dot_dimension_numbers<[1], [0], [0], [1], [0, 0, 1, 1], [], []>} : vector<64x32xbf16>, vector<32x128xbf16>, vector<64x128xf32> -> vector<64x128xf32>
    %750 = arith.addf %746, %749 : vector<64x128xf32>
    %c0_159 = arith.constant 0 : index
    %c0_160 = arith.constant 0 : index
    %751 = vector.load %arg12[%c0_159, %c0_160] : memref<1x128xf32, #tpu.memory_space<vmem>>, vector<1x128xf32>
    %752 = vector.broadcast %751 : vector<1x128xf32> to vector<64x128xf32>
    %753 = arith.addf %750, %752 : vector<64x128xf32>
    %c0_161 = arith.constant 0 : index
    %c0_162 = arith.constant 0 : index
    %754 = vector.load %arg13[%c0_161, %c0_162] : memref<64x128xf32, #tpu.memory_space<vmem>>, vector<64x128xf32>
    tpu.vector_store %arg13[%c0_161, %c0_162], %753 {strides = array<i32>} : memref<64x128xf32, #tpu.memory_space<vmem>>, vector<64x128xf32>,
    %755 = tpu.iota {dimensions = array<i32: 1>} : vector<64x128xi32>
    %c5_i32 = arith.constant 5 : i32
    %756 = vector.broadcast %c5_i32 : i32 to vector<64x128xi32>
    %757 = arith.cmpi slt, %755, %756 : vector<64x128xi32>
    %cst_163 = arith.constant -1.000000e+30 : f32
    %758 = vector.broadcast %cst_163 : f32 to vector<64x128xf32>
    %759 = arith.select %757, %753, %758 : vector<64x128xi1>, vector<64x128xf32>
    %cst_164 = arith.constant dense<0xFF800000> : vector<64xf32>
    %760 = vector.multi_reduction <maximumf>, %759, %cst_164 [1] : vector<64x128xf32> to vector<64xf32>
    %761 = vector.shape_cast %760 : vector<64xf32> to vector<64x1xf32>
    %762 = vector.broadcast %761 : vector<64x1xf32> to vector<64x128xf32>
    %763 = arith.cmpf oeq, %759, %762 : vector<64x128xf32>
    %c128_i32 = arith.constant 128 : i32
    %764 = vector.broadcast %c128_i32 : i32 to vector<64x128xi32>
    %765 = arith.select %763, %755, %764 : vector<64x128xi1>, vector<64x128xi32>
    %cst_165 = arith.constant dense<2147483647> : vector<64xi32>
    %766 = vector.multi_reduction <minsi>, %765, %cst_165 [1] : vector<64x128xi32> to vector<64xi32>
    %767 = vector.shape_cast %766 : vector<64xi32> to vector<64x1xi32>
    %c0_166 = arith.constant 0 : index
    %c0_167 = arith.constant 0 : index
    %768 = vector.load %arg14[%c0_166, %c0_167] : memref<64x1xi32, #tpu.memory_space<vmem>>, vector<64x1xi32>
    tpu.vector_store %arg14[%c0_166, %c0_167], %767 {strides = array<i32>} : memref<64x1xi32, #tpu.memory_space<vmem>>, vector<64x1xi32>,
    return
  }
}

</mosaic_0001>

<bundles_post_ra>
// kernel: bio_model_forward.1
= control target key start
LH: loop header
LB: loop body
LE: loop exit
PB: predicated region body
PF: predicated region fallthrough
CT: control target
= control target key end

     0   :  { %20 = vsyncpa [#allocation3], 0  ;;  %s3836_s0 = inlined_call_operand.vmem [shape: s32[64,2], index: 0, kind: input, shape index: {}]   ;;  %s3837_s1 = inlined_call_operand.hbm [shape: bf16[128,256], index: 1, kind: input, shape index: {}]   ;;  %s3838_s2 = inlined_call_operand.vmem [shape: f32[1,256], index: 2, kind: input, shape index: {}]   ;;  %s3839_s3 = inlined_call_operand.hbm [shape: bf16[32,128], index: 3, kind: input, shape index: {}]   ;;  %s3840_s4 = inlined_call_operand.hbm [shape: bf16[32,128], index: 4, kind: input, shape index: {}]   ;;  %s3841_s5 = inlined_call_operand.vmem [shape: bf16[32,256], index: 5, kind: input, shape index: {}]   ;;  %s3842_s6 = inlined_call_operand.vmem [shape: bf16[32,256], index: 6, kind: input, shape index: {}]   ;;  %s3843_s7 = inlined_call_operand.vmem [shape: f32[1,256], index: 7, kind: input, shape index: {}]   ;;  %s3844_s8 = inlined_call_operand.hbm [shape: bf16[32,128], index: 8, kind: input, shape index: {}]   ;;  %s3845_s9 = inlined_call_operand.hbm [shape: bf16[32,128], index: 9, kind: input, shape index: {}]   ;;  %s3846_s10 = inlined_call_operand.vmem [shape: bf16[32,128], index: 10, kind: input, shape index: {}]   ;;  %s3847_s11 = inlined_call_operand.vmem [shape: bf16[32,128], index: 11, kind: input, shape index: {}]   ;;  %s3848_s12 = inlined_call_operand.vmem [shape: f32[1,128], index: 12, kind: input, shape index: {}]   ;;  %s3849_s13 = inlined_call_operand.vmem [shape: f32[64,128], index: 13, kind: output, shape index: {0}]   ;;  %s3850_s14 = inlined_call_operand.vmem [shape: s32[64,1], index: 14, kind: output, shape index: {1}]  }
   0x1   :  { %21 = vsyncpa [#allocation5], 0  ;;  %s44_s15 = sshll.u32 %s3839_s3, 4  ;;  %s45_s15 = int_to_ptr.hbm [resolvable:$true] %s44_s15 }
   0x2   :  { %22 = vsyncpa [#allocation8], 0  ;;  %s2989_s16 = smov [#allocation4]   ;;  %s76_s20 = sshll.u32 %s3844_s8, 4  ;;  %s77_s20 = int_to_ptr.hbm [resolvable:$true] %s76_s20 }
   0x3   :  { %s46_s17 = sshll.u32 %s2989_s16, 4  ;;  %s2990_s21 = smov 64   ;;  %s47_s17 = int_to_ptr.vmem [resolvable:$true] %s46_s17 }
   0x4   :  { %s2991_s22 = smov 4   ;;  %s2992_s23 = smov [#allocation7]  }
   0x5   :  { %52 = dma.hbm_to_vmem [thread:$0]  %s45_s15, 256, %s47_s17, [#allocation5], %s2990_s21, %s2990_s21, %s2991_s22  }
   0x6   :  { %s78_s24 = sshll.u32 %s2992_s23, 4  ;;  %s29_s26 = sshll.u32 %s3837_s1, 4  ;;  %s79_s24 = int_to_ptr.vmem [resolvable:$true] %s78_s24  ;;  %s30_s26 = int_to_ptr.hbm [resolvable:$true] %s29_s26 }
   0x7   :  { %84 = dma.hbm_to_vmem [thread:$0]  %s77_s20, 256, %s79_s24, [#allocation8], %s2990_s21, %s2990_s21, %s2991_s22  }
   0x8   :  { %s2993_s8 = smov [#allocation2]   ;;  %s57_s30 = sshll.u32 %s3840_s4, 4  ;;  %s58_s30 = int_to_ptr.hbm [resolvable:$true] %s57_s30 }
   0x9   :  { %s31_s27 = sshll.u32 %s2993_s8, 4  ;;  %s2994_s15 = smov 128   ;;  %s32_s27 = int_to_ptr.vmem [resolvable:$true] %s31_s27 }
   0xa   :  { %s2995_s16 = smov 8   ;;  %s2996_s17 = smov [#allocation6]  }
   0xb   :  { %37 = dma.hbm_to_vmem [thread:$0]  %s30_s26, 2048, %s32_s27, [#allocation3], %s2994_s15, %s2994_s15, %s2995_s16  }
   0xc   :  { %s59_s18 = sshll.u32 %s2996_s17, 4  ;;  %s89_s23 = sshll.u32 %s3845_s9, 4  ;;  %s60_s18 = int_to_ptr.vmem [resolvable:$true] %s59_s18  ;;  %s90_s23 = int_to_ptr.hbm [resolvable:$true] %s89_s23 }
   0xd   :  { %65 = dma.hbm_to_vmem [thread:$0]  %s58_s30, 256, %s60_s18, [#allocation5], %s2990_s21, %s2990_s21, %s2991_s22  }
   0xe   :  { %s2997_s20 = smov [#allocation9]  }
   0xf   :  { %s91_s24 = sshll.u32 %s2997_s20, 4  ;;  %s92_s24 = int_to_ptr.vmem [resolvable:$true] %s91_s24 }
  0x10   :  { %97 = dma.hbm_to_vmem [thread:$0]  %s90_s23, 256, %s92_s24, [#allocation8], %s2990_s21, %s2990_s21, %s2991_s22  }
  0x11   :  { %2983 = dma.done.wait [#allocation3], 2048  }
  0x12   :  { %2984 = vsyncadd [#allocation3], 4294965248 }
  0x13   :  { %2985 = dma.done.wait [#allocation5], 512  }
  0x14   :  { %2986 = vsyncadd [#allocation5], 4294966784 }
  0x15   :  { %2987 = dma.done.wait [#allocation8], 512  }
  0x16   :  { %2988 = vsyncadd [#allocation8], 4294966784  ;;  %v2998_v0 = vmov 0   ;;  %v2999_v1 = vmov 1   ;;  %v131_v2 = vld [vmem:[%s3836_s0 + $0x30] sm:$0xff]  ;;  %v125_v4 = vld [vmem:[%s3836_s0] sm:$0xff]  ;;  %v133_v62 = vlaneseq }
  0x17   :  { %2661 = vset.pattern.permute.xlu0 %v2998_v0  ;;  %2662 = vset.pattern.permute.xlu1 %v2999_v1  ;;  %v173_v3 = vadd.s32 126, %v131_v2  ;;  %v2442_v5 = vld [vmem:[#allocation2 + $0x70] sm:$0xf]  ;;  %v2611_v6 = vld [vmem:[#allocation2 + $0x74] sm:$0xf0]  ;;  %v126_v23 = vld [vmem:[%s3836_s0 + $0x8] sm:$0xff] }
  0x18   :  { %2663 = vset.pattern.permute.xlu2 %v2998_v0  ;;  %154 = vperm.xlu0 %2661, %v131_v2   ;;  %v2610_v7 = vld [vmem:[#allocation2 + $0x74] sm:$0xf]  ;;  %v2443_v8 = vor.u32 %v2611_v6, %v2442_v5  ;;  %v2444_v9 = vld [vmem:[#allocation2 + $0x78] sm:$0xf0]  ;;  %v2434_v10 = vld [vmem:[#allocation2 + $0x60] sm:$0xf] }
  0x19   :  { %136 = vperm.xlu2 %2663, %v125_v4   ;;  %194 = vperm.xlu1 %2662, %v173_v3   ;;  %v2609_v11 = vld [vmem:[#allocation2 + $0x64] sm:$0xf0]  ;;  %v132_v12 = vld [vmem:[%s3836_s0 + $0x38] sm:$0xff]  ;;  %v2447_v13 = vor.u32 %v2610_v7, %v2444_v9  ;;  %v2608_v14 = vld [vmem:[#allocation2 + $0x64] sm:$0xf]  ;;  %v167_v31 = vadd.s32 126, %v125_v4 }
  0x1a   :  { %v2436_v15 = vld [vmem:[#allocation2 + $0x68] sm:$0xf0]  ;;  %2632 = vmatpush.bf16.msra.mxu2 %v2443_v8  ;;  %v2435_v16 = vor.u32 %v2609_v11, %v2434_v10  ;;  %329 = vmatpush.bf16.msra.mxu0 %v2443_v8  ;;  %v2426_v18 = vld [vmem:[#allocation2 + $0x50] sm:$0xf]  ;;  %v2607_v19 = vld [vmem:[#allocation2 + $0x54] sm:$0xf0] }
  0x1b   :  { %2640 = vmatpush.bf16.msra.mxu3 %v2447_v13  ;;  %v2439_v17 = vor.u32 %v2608_v14, %v2436_v15  ;;  %358 = vmatpush.bf16.msra.mxu1 %v2447_v13  ;;  %v174_v20 = vadd.s32 126, %v132_v12  ;;  %v2606_v21 = vld [vmem:[#allocation2 + $0x54] sm:$0xf]  ;;  %v2428_v22 = vld [vmem:[#allocation2 + $0x58] sm:$0xf0]  ;;  %v2427_v24 = vor.u32 %v2607_v19, %v2426_v18  ;;  %v168_v35 = vadd.s32 126, %v126_v23 }
  0x1c   :  { %v2431_v25 = vor.u32 %v2606_v21, %v2428_v22  ;;  %v2418_v26 = vld [vmem:[#allocation2 + $0x40] sm:$0xf]  ;;  %v2605_v27 = vld [vmem:[#allocation2 + $0x44] sm:$0xf0]  ;;  %v2604_v28 = vld [vmem:[#allocation2 + $0x44] sm:$0xf] }
  0x1d   :  { %v2420_v29 = vld [vmem:[#allocation2 + $0x48] sm:$0xf0]  ;;  %v2419_v30 = vor.u32 %v2605_v27, %v2418_v26  ;;  %v2410_v33 = vld [vmem:[#allocation2 + $0x30] sm:$0xf]  ;;  %v2603_v34 = vld [vmem:[#allocation2 + $0x34] sm:$0xf0] }
  0x1e   :  { %2633 = vmatpush.bf16.msra.mxu2 %v2435_v16  ;;  %330 = vmatpush.bf16.msra.mxu0 %v2435_v16  ;;  %v2423_v32 = vor.u32 %v2604_v28, %v2420_v29  ;;  %v2602_v36 = vld [vmem:[#allocation2 + $0x34] sm:$0xf]  ;;  %v2412_v37 = vld [vmem:[#allocation2 + $0x38] sm:$0xf0]  ;;  %v2411_v38 = vor.u32 %v2603_v34, %v2410_v33  ;;  %v2402_v40 = vld [vmem:[#allocation2 + $0x20] sm:$0xf] }
  0x1f   :  { %2641 = vmatpush.bf16.msra.mxu3 %v2439_v17  ;;  %359 = vmatpush.bf16.msra.mxu1 %v2439_v17  ;;  %v2415_v39 = vor.u32 %v2602_v36, %v2412_v37  ;;  %v2601_v41 = vld [vmem:[#allocation2 + $0x24] sm:$0xf0]  ;;  %v2600_v42 = vld [vmem:[#allocation2 + $0x24] sm:$0xf]  ;;  %v2404_v44 = vld [vmem:[#allocation2 + $0x28] sm:$0xf0] }
  0x20   :  { %157 = vperm.xlu0 %2661, %v132_v12   ;;  %v2403_v43 = vor.u32 %v2601_v41, %v2402_v40  ;;  %v2407_v45 = vor.u32 %v2600_v42, %v2404_v44  ;;  %v2394_v46 = vld [vmem:[#allocation2 + $0x10] sm:$0xf]  ;;  %v2599_v47 = vld [vmem:[#allocation2 + $0x14] sm:$0xf0]  ;;  %v2598_v48 = vld [vmem:[#allocation2 + $0x14] sm:$0xf] }
  0x21   :  { %139 = vperm.xlu2 %2663, %v126_v23   ;;  %197 = vperm.xlu1 %2662, %v174_v20   ;;  %v2395_v49 = vor.u32 %v2599_v47, %v2394_v46  ;;  %v2396_v50 = vld [vmem:[#allocation2 + $0x18] sm:$0xf0]  ;;  %v2386_v52 = vld [vmem:[#allocation2] sm:$0xf]  ;;  %v2597_v53 = vld [vmem:[#allocation2 + $0x4] sm:$0xf0] }
  0x22   :  { %2634 = vmatpush.bf16.msra.mxu2 %v2427_v24  ;;  %331 = vmatpush.bf16.msra.mxu0 %v2427_v24  ;;  %v2399_v51 = vor.u32 %v2598_v48, %v2396_v50  ;;  %v2596_v54 = vld [vmem:[#allocation2 + $0x4] sm:$0xf]  ;;  %v2387_v55 = vor.u32 %v2597_v53, %v2386_v52  ;;  %v2388_v56 = vld [vmem:[#allocation2 + $0x8] sm:$0xf0]  ;;  %v3121_v58 = vld [vmem:[#allocation6 + $0x8] sm:$0xff]  ;;  %v3137_v3 = vand.u32 127, %v133_v62 }
  0x23   :  { %2642 = vmatpush.bf16.msra.mxu3 %v2431_v25  ;;  %360 = vmatpush.bf16.msra.mxu1 %v2431_v25  ;;  %v2391_v57 = vor.u32 %v2596_v54, %v2388_v56  ;;  %v3125_v59 = vld [vmem:[#allocation4 + $0x8] sm:$0xff]  ;;  %v3127_v60 = vld [vmem:[#allocation6] sm:$0xff]  ;;  %v3130_v61 = vld [vmem:[#allocation4] sm:$0xff]  ;;  %v3000_v7 = vmov 1.0|1.0   ;;  %s3001_s30 = smov 32  }
  0x24   :  { %v243_v15 = vld [vmem:[%s3838_s2] sm:$0x3]  ;;  %vm407_vm14 = vcmask 261120  }
  0x25   :  { %v3170_v16 = vperm.slane %v243_v15, 1  ;;  %v3173_v22 = vperm.slane %v243_v15, 0  ;;  %v128_v15 = vld [vmem:[%s3836_s0 + $0x18] sm:$0xff] }
  0x26   :  { %2635 = vmatpush.bf16.msra.mxu2 %v2419_v30  ;;  %332 = vmatpush.bf16.msra.mxu0 %v2419_v30 }
  0x27   :  { %2643 = vmatpush.bf16.msra.mxu3 %v2423_v32  ;;  %361 = vmatpush.bf16.msra.mxu1 %v2423_v32 }
  0x28   :  { %2664 = vset.pattern.permute.xlu0 %v2999_v1 }
  0x29   :  { %176 = vperm.xlu0 %2664, %v167_v31   ;;  %179 = vperm.xlu1 %2662, %v168_v35  }
  0x2a   :  { %2636 = vmatpush.bf16.msra.mxu2 %v2411_v38  ;;  %333 = vmatpush.bf16.msra.mxu0 %v2411_v38 }
  0x2b   :  { %2644 = vmatpush.bf16.msra.mxu3 %v2415_v39  ;;  %362 = vmatpush.bf16.msra.mxu1 %v2415_v39 }
  0x2e   :  { %2637 = vmatpush.bf16.msra.mxu2 %v2403_v43  ;;  %334 = vmatpush.bf16.msra.mxu0 %v2403_v43 }
  0x2f   :  { %2645 = vmatpush.bf16.msra.mxu3 %v2407_v45  ;;  %363 = vmatpush.bf16.msra.mxu1 %v2407_v45 }
  0x31   :  { %2665 = vset.pattern.permute.xlu1 %v2998_v0 }
  0x32   :  { %2638 = vmatpush.bf16.msra.mxu2 %v2395_v49  ;;  %335 = vmatpush.bf16.msra.mxu0 %v2395_v49 }
  0x33   :  { %2646 = vmatpush.bf16.msra.mxu3 %v2399_v51  ;;  %364 = vmatpush.bf16.msra.mxu1 %v2399_v51 }
  0x36   :  { %2639 = vmatpush.bf16.msra.mxu2 %v2387_v55  ;;  %336 = vmatpush.bf16.msra.mxu0 %v2387_v55 }
  0x37   :  { %2647 = vmatpush.bf16.msra.mxu3 %v2391_v57  ;;  %365 = vmatpush.bf16.msra.mxu1 %v2391_v57 }
  0x3a   :  { %417 = vmatpush.bf16.msrb.mxu2 %v3125_v59  ;;  %938 = vmatpush.bf16.msrb.mxu0 %v3125_v59 }
  0x3b   :  { %443 = vmatpush.bf16.msrb.mxu3 %v3121_v58  ;;  %959 = vmatpush.bf16.msrb.mxu1 %v3121_v58 }
  0x3e   :  { %418 = vmatpush.bf16.msrb.mxu2 %v3130_v61  ;;  %939 = vmatpush.bf16.msrb.mxu0 %v3130_v61 }
  0x3f   :  { %444 = vmatpush.bf16.msrb.mxu3 %v3127_v60  ;;  %960 = vmatpush.bf16.msrb.mxu1 %v3127_v60 }
  0x73   :  { %v137_v4 = vpop.permute.xlu2 %136 }
  0x74   :  { %vm159_vm7 = vcmp.eq.s32.totalorder %v3137_v3, %v137_v4 }
  0x7b   :  { %v140_v8 = vpop.permute.xlu2 %139 }
  0x7c   :  { %vm160_vm8 = vcmp.eq.s32.totalorder %v3137_v3, %v140_v8 }
  0x8a   :  { %v155_v63 = vpop.permute.xlu0 %154 }
  0x8b   :  { %v195_v2 = vpop.permute.xlu1 %194  ;;  %vm165_vm0 = vcmp.eq.s32.totalorder %v3137_v3, %v155_v63 }
  0x8c   :  { %vm205_vm1 = vcmp.eq.s32.totalorder %v3137_v3, %v195_v2 }
  0x8d   :  { %vm213_vm4 = vmor %vm165_vm0, %vm205_vm1 }
  0x92   :  { %v158_v5 = vpop.permute.xlu0 %157 }
  0x93   :  { %v198_v6 = vpop.permute.xlu1 %197  ;;  %vm166_vm2 = vcmp.eq.s32.totalorder %v3137_v3, %v158_v5 }
  0x94   :  { %vm206_vm3 = vcmp.eq.s32.totalorder %v3137_v3, %v198_v6 }
  0x95   :  { %vm214_vm5 = vmor %vm166_vm2, %vm206_vm3 }
  0x96   :  { %vm2454_vm6 = vmpackc.low %vm214_vm5, %vm213_vm4 }
  0x97   :  { %2455 = vmatmul.msk.bf16.vlgmr.msra.gmra.mxu2 %vm2454_vm6, %v3000_v7  ;;  %2463 = vmatmul.msk.bf16.vlgmr.msra.gmra.mxu3 %vm2454_vm6, %v3000_v7 }
  0x98   :  { %529 = vmatpush.bf16.msra.mxu3 %v3121_v58  ;;  %508 = vmatpush.bf16.msra.mxu2 %v3125_v59 }
  0x9b   :  { %v177_v9 = vpop.permute.xlu0 %176  ;;  %v180_v10 = vpop.permute.xlu1 %179 }
  0x9c   :  { %vm199_vm9 = vcmp.eq.s32.totalorder %v3137_v3, %v177_v9  ;;  %vm200_vm10 = vcmp.eq.s32.totalorder %v3137_v3, %v180_v10  ;;  %530 = vmatpush.bf16.msra.mxu3 %v3127_v60  ;;  %509 = vmatpush.bf16.msra.mxu2 %v3130_v61 }
  0x9d   :  { %vm207_vm11 = vmor %vm159_vm7, %vm199_vm9 }
  0x9e   :  { %vm208_vm12 = vmor %vm160_vm8, %vm200_vm10 }
  0x9f   :  { %vm2448_vm13 = vmpackc.low %vm208_vm12, %vm207_vm11 }
  0xa0   :  { %2449 = vmatmul.msk.bf16.vlgmr.msra.gmra.mxu0 %vm2448_vm13, %v3000_v7  ;;  %2457 = vmatmul.msk.bf16.vlgmr.msra.gmra.mxu1 %vm2448_vm13, %v3000_v7  ;;  %vm2211_vm13 = vcmp.lt.s32.totalorder %v3137_v3, 5 }
  0xa7   :  { %419 = vmatmul.bf16.vlgmr.msrb.gmra.mxu2 %v2998_v0  ;;  %445 = vmatmul.bf16.vlgmr.msrb.gmra.mxu3 %v2998_v0 }
  0xa8   :  { %615 = vmatpush.bf16.msrb.mxu3 %v3121_v58  ;;  %594 = vmatpush.bf16.msrb.mxu2 %v3125_v59 }
  0xac   :  { %616 = vmatpush.bf16.msrb.mxu3 %v3127_v60  ;;  %595 = vmatpush.bf16.msrb.mxu2 %v3130_v61 }
 0x11a   :  { %v3161_v11 = vpop.f32.mrf.mxu2  ;;  %v3163_v12 = vpop.f32.mrf.mxu3 }
 0x11b   :  { %v383_v57 = vadd.f32 %v3163_v12, %v3170_v16  ;;  %v127_v12 = vld [vmem:[%s3836_s0 + $0x10] sm:$0xff] }
 0x11d   :  { %v338_v21 = vpop.f32.mrf.mxu0 }
 0x11e   :  { %v339_v23 = vadd.f32 %v338_v21, %v3173_v22 }
 0x122   :  { %v3165_v13 = vpop.f32.mrf.mxu2  ;;  %v384_v14 = vpop.f32.mrf.mxu3 }
 0x123   :  { %v385_v17 = vadd.f32 %v384_v14, %v3170_v16 }
 0x125   :  { %v340_v5 = vpop.f32.mrf.mxu0 }
 0x126   :  { %v341_v6 = vadd.f32 %v340_v5, %v3173_v22 }
 0x12a   :  { %v420_v18 = vpop.f32.mrf.mxu2  ;;  %v446_v19 = vpop.f32.mrf.mxu3 }
 0x12b   :  { %v450_v20 = vadd.f32 %v446_v19, %v385_v17  ;;  %v424_v24 = vadd.f32 %v420_v18, %v339_v23  ;;  %v170_v17 = vadd.s32 126, %v128_v15  ;;  %v129_v19 = vld [vmem:[%s3836_s0 + $0x20] sm:$0xff] }
 0x12d   :  { %2671 = vtanh.f32 %v450_v20  ;;  %v473_v29 = vmul.f32 0.5, %v450_v20  ;;  %v451_v30 = vmul.f32 0.5, %v424_v24  ;;  %v171_v20 = vadd.s32 126, %v129_v19 }
 0x12e   :  { %2673 = vtanh.f32 %v424_v24 }
 0x12f   :  { %2675 = vtanh.f32 %v473_v29 }
 0x130   :  { %2677 = vtanh.f32 %v451_v30 }
 0x132   :  { %v448_v25 = vpop.f32.mrf.mxu3  ;;  %v422_v26 = vpop.f32.mrf.mxu2 }
 0x133   :  { %v2672_v27 = vpop.eup %2671 }
 0x134   :  { %480 = vrot.lane.b32.xlu2 %v2672_v27, %s3001_s30  ;;  %v2674_v28 = vpop.eup %2673 }
 0x135   :  { %v2676_v31 = vpop.eup %2675 }
 0x136   :  { %v475_v32 = vadd.f32 1.0, %v2676_v31  ;;  %v2678_v34 = vpop.eup %2677 }
 0x137   :  { %v453_v37 = vadd.f32 1.0, %v2678_v34 }
 0x138   :  { %v476_v33 = vmul.f32 0.5, %v475_v32 }
 0x139   :  { %v454_v38 = vmul.f32 0.5, %v453_v37 }
 0x13a   :  { %v478_v41 = vmul.f32 0.0, %v476_v33 }
 0x13b   :  { %v456_v44 = vmul.f32 0.0, %v454_v38 }
 0x13c   :  { %458 = vrot.lane.b32.xlu2 %v2674_v28, %s3001_s30 }
 0x18e   :  { %v481_v35 = vpop.permute.xlu2 %480 }
 0x18f   :  { %v483_v36 = vmul.f32 %v481_v35, %v476_v33 }
 0x191   :  { %485 = vrot.lane.b32.xlu1 %v483_v36, %s3001_s30 }
 0x196   :  { %v459_v39 = vpop.permute.xlu2 %458 }
 0x197   :  { %v461_v40 = vmul.f32 %v459_v39, %v454_v38  ;;  %v169_v39 = vadd.s32 126, %v127_v12 }
 0x199   :  { %463 = vrot.lane.b32.xlu0 %v461_v40, %s3001_s30 }
 0x203   :  { %v486_v42 = vpop.permute.xlu1 %485 }
 0x204   :  { %v3180_v43 = vadd.f32 %v486_v42, %v478_v41 }
 0x206   :  { %2679 = vtanh.f32 %v3180_v43 }
 0x20b   :  { %v464_v45 = vpop.permute.xlu0 %463 }
 0x20c   :  { %v2680_v46 = vpop.eup %2679  ;;  %v3183_v47 = vadd.f32 %v464_v45, %v456_v44 }
 0x20d   :  { %491 = vrot.lane.b32.xlu1 %v2680_v46, %s3001_s30 }
 0x20e   :  { %2681 = vtanh.f32 %v3183_v47 }
 0x214   :  { %v2682_v48 = vpop.eup %2681 }
 0x215   :  { %469 = vrot.lane.b32.xlu0 %v2682_v48, %s3001_s30 }
 0x27f   :  { %v492_v49 = vpop.permute.xlu1 %491 }
 0x280   :  { %v3188_v50 = vmul.f32 %v492_v49, %v476_v33  ;;  %v130_v33 = vld [vmem:[%s3836_s0 + $0x28] sm:$0xff] }
 0x281   :  { %v172_v34 = vadd.s32 126, %v130_v33 }
 0x282   :  { %v516_v51 = vpack.c.bf16 %v3188_v50, %v3188_v50 }
 0x284   :  { %518 = vrot.lane.b32.xlu2 %v516_v51, %s2990_s21 }
 0x287   :  { %v470_v52 = vpop.permute.xlu0 %469 }
 0x288   :  { %v3193_v53 = vmul.f32 %v470_v52, %v454_v38 }
 0x28a   :  { %v495_v54 = vpack.c.bf16 %v3193_v53, %v3193_v53 }
 0x28c   :  { %497 = vrot.lane.b32.xlu1 %v495_v54, %s2990_s21 }
 0x2de   :  { %v519_v55 = vpop.permute.xlu2 %518 }
 0x2df   :  { %2481 = vmatmul.msk.bf16.vlgmr.msra.gmra.mxu3 %vm407_vm14, %v519_v55 }
 0x2e0   :  { %701 = vmatpush.bf16.msra.mxu3 %v3121_v58 }
 0x2e4   :  { %702 = vmatpush.bf16.msra.mxu3 %v3127_v60 }
 0x2fe   :  { %v498_v56 = vpop.permute.xlu1 %497 }
 0x2ff   :  { %2480 = vmatmul.msk.bf16.vlgmr.msra.gmra.mxu2 %vm407_vm14, %v498_v56 }
 0x300   :  { %680 = vmatpush.bf16.msra.mxu2 %v3125_v59 }
 0x304   :  { %681 = vmatpush.bf16.msra.mxu2 %v3130_v61 }
 0x362   :  { %v532_v62 = vpop.f32.mrf.mxu3 }
 0x363   :  { %v536_v63 = vadd.f32 %v532_v62, %v383_v57 }
 0x365   :  { %2683 = vtanh.f32 %v536_v63  ;;  %v559_v18 = vmul.f32 0.5, %v536_v63 }
 0x36a   :  { %v534_v2 = vpop.f32.mrf.mxu3 }
 0x36b   :  { %v2684_v4 = vpop.eup %2683 }
 0x36c   :  { %566 = vrot.lane.b32.xlu2 %v2684_v4, %s3001_s30  ;;  %v3265_v4 = vpop.f32.mrf.mxu1 }
 0x374   :  { %v3267_v5 = vpop.f32.mrf.mxu1 }
 0x382   :  { %v511_v8 = vpop.f32.mrf.mxu2 }
 0x383   :  { %v515_v9 = vadd.f32 %v511_v8, %v341_v6 }
 0x385   :  { %2685 = vtanh.f32 %v515_v9  ;;  %v537_v27 = vmul.f32 0.5, %v515_v9 }
 0x386   :  { %2687 = vtanh.f32 %v559_v18 }
 0x387   :  { %2689 = vtanh.f32 %v537_v27 }
 0x38a   :  { %v513_v10 = vpop.f32.mrf.mxu2 }
 0x38b   :  { %v2686_v14 = vpop.eup %2685 }
 0x38c   :  { %544 = vrot.lane.b32.xlu1 %v2686_v14, %s3001_s30  ;;  %v2688_v21 = vpop.eup %2687 }
 0x38d   :  { %v561_v23 = vadd.f32 1.0, %v2688_v21  ;;  %v2690_v28 = vpop.eup %2689 }
 0x38e   :  { %v539_v29 = vadd.f32 1.0, %v2690_v28 }
 0x38f   :  { %v562_v24 = vmul.f32 0.5, %v561_v23 }
 0x390   :  { %v540_v30 = vmul.f32 0.5, %v539_v29 }
 0x391   :  { %v564_v35 = vmul.f32 %v562_v24, %v3180_v43 }
 0x392   :  { %v542_v40 = vmul.f32 %v540_v30, %v3183_v47 }
 0x394   :  { %142 = vperm.xlu1 %2665, %v127_v12  }
 0x39c   :  { %2666 = vset.pattern.permute.xlu1 %v2999_v1 }
 0x39d   :  { %185 = vperm.xlu1 %2666, %v170_v17  }
 0x3a5   :  { %188 = vperm.xlu1 %2666, %v171_v20  }
 0x3c6   :  { %v567_v25 = vpop.permute.xlu2 %566 }
 0x3c7   :  { %v569_v26 = vmul.f32 %v567_v25, %v562_v24 }
 0x3c9   :  { %571 = vrot.lane.b32.xlu0 %v569_v26, %s3001_s30 }
 0x3fe   :  { %v545_v31 = vpop.permute.xlu1 %544 }
 0x3ff   :  { %v547_v32 = vmul.f32 %v545_v31, %v540_v30 }
 0x401   :  { %549 = vrot.lane.b32.xlu2 %v547_v32, %s3001_s30 }
 0x406   :  { %v143_v46 = vpop.permute.xlu1 %142 }
 0x407   :  { %vm161_vm1 = vcmp.eq.s32.totalorder %v3137_v3, %v143_v46 }
 0x409   :  { %145 = vperm.xlu2 %2663, %v128_v15  }
 0x40f   :  { %v186_v52 = vpop.permute.xlu1 %185 }
 0x410   :  { %vm202_vm15 = vcmp.eq.s32.totalorder %v3137_v3, %v186_v52 }
 0x411   :  { %148 = vperm.xlu2 %2663, %v129_v19  }
 0x417   :  { %v189_v62 = vpop.permute.xlu1 %188 }
 0x418   :  { %vm203_vm7 = vcmp.eq.s32.totalorder %v3137_v3, %v189_v62 }
 0x419   :  { %2668 = vset.pattern.permute.xlu2 %v2999_v1 }
 0x41a   :  { %191 = vperm.xlu2 %2668, %v172_v34  }
 0x43b   :  { %v572_v36 = vpop.permute.xlu0 %571 }
 0x43c   :  { %v3226_v37 = vadd.f32 %v572_v36, %v564_v35 }
 0x43e   :  { %2691 = vtanh.f32 %v3226_v37 }
 0x444   :  { %v2692_v38 = vpop.eup %2691 }
 0x445   :  { %577 = vrot.lane.b32.xlu0 %v2692_v38, %s3001_s30 }
 0x44d   :  { %182 = vperm.xlu0 %2664, %v169_v39  }
 0x455   :  { %2667 = vset.pattern.permute.xlu0 %v2998_v0 }
 0x456   :  { %151 = vperm.xlu0 %2667, %v130_v33  }
 0x45b   :  { %v550_v41 = vpop.permute.xlu2 %549 }
 0x45c   :  { %v3232_v42 = vadd.f32 %v550_v41, %v542_v40 }
 0x45e   :  { %2693 = vtanh.f32 %v3232_v42  ;;  %2669 = vset.pattern.permute.xlu0 %v2999_v1 }
 0x463   :  { %v146_v44 = vpop.permute.xlu2 %145 }
 0x464   :  { %v2694_v43 = vpop.eup %2693  ;;  %vm162_vm0 = vcmp.eq.s32.totalorder %v3137_v3, %v146_v44 }
 0x465   :  { %555 = vrot.lane.b32.xlu2 %v2694_v43, %s3001_s30  ;;  %vm210_vm3 = vmor %vm162_vm0, %vm202_vm15 }
 0x46b   :  { %v149_v45 = vpop.permute.xlu2 %148 }
 0x46c   :  { %vm163_vm8 = vcmp.eq.s32.totalorder %v3137_v3, %v149_v45 }
 0x46d   :  { %vm211_vm11 = vmor %vm163_vm8, %vm203_vm7 }
 0x474   :  { %v192_v48 = vpop.permute.xlu2 %191 }
 0x475   :  { %vm204_vm9 = vcmp.eq.s32.totalorder %v3137_v3, %v192_v48 }
 0x4b7   :  { %v578_v49 = vpop.permute.xlu0 %577 }
 0x4b8   :  { %v3237_v51 = vmul.f32 %v578_v49, %v562_v24 }
 0x4ba   :  { %v602_v47 = vpack.c.bf16 %v3237_v51, %v3237_v51 }
 0x4bc   :  { %604 = vrot.lane.b32.xlu1 %v602_v47, %s2990_s21 }
 0x4bf   :  { %v556_v1 = vpop.permute.xlu2 %555  ;;  %v183_v54 = vpop.permute.xlu0 %182 }
 0x4c0   :  { %v3245_v55 = vmul.f32 %v556_v1, %v540_v30  ;;  %vm201_vm2 = vcmp.eq.s32.totalorder %v3137_v3, %v183_v54 }
 0x4c1   :  { %vm209_vm4 = vmor %vm161_vm1, %vm201_vm2 }
 0x4c2   :  { %vm2450_vm5 = vmpackc.low %vm210_vm3, %vm209_vm4  ;;  %v581_v56 = vpack.c.bf16 %v3245_v55, %v3245_v55 }
 0x4c3   :  { %2451 = vmatmul.msk.bf16.gmra.mxu0 %vm2450_vm5, %v3000_v7  ;;  %2459 = vmatmul.msk.bf16.gmra.mxu1 %vm2450_vm5, %v3000_v7 }
 0x4c4   :  { %583 = vrot.lane.b32.xlu0 %v581_v56, %s2990_s21 }
 0x4c8   :  { %v152_v57 = vpop.permute.xlu0 %151 }
 0x4c9   :  { %vm164_vm6 = vcmp.eq.s32.totalorder %v3137_v3, %v152_v57 }
 0x4ca   :  { %vm212_vm10 = vmor %vm164_vm6, %vm204_vm9 }
 0x4cb   :  { %vm2452_vm12 = vmpackc.low %vm212_vm10, %vm211_vm11 }
 0x4d3   :  { %2453 = vmatmul.msk.bf16.gmra.mxu0 %vm2452_vm12, %v3000_v7  ;;  %2461 = vmatmul.msk.bf16.gmra.mxu1 %vm2452_vm12, %v3000_v7 }
 0x52e   :  { %v605_v63 = vpop.permute.xlu1 %604 }
 0x52f   :  { %2483 = vmatmul.msk.bf16.vlgmr.msrb.gmra.mxu3 %vm407_vm14, %v605_v63 }
 0x530   :  { %787 = vmatpush.bf16.msrb.mxu3 %v3121_v58 }
 0x534   :  { %788 = vmatpush.bf16.msrb.mxu3 %v3127_v60 }
 0x536   :  { %v584_v2 = vpop.permute.xlu0 %583 }
 0x537   :  { %2482 = vmatmul.msk.bf16.vlgmr.msrb.gmra.mxu2 %vm407_vm14, %v584_v2 }
 0x538   :  { %766 = vmatpush.bf16.msrb.mxu2 %v3125_v59 }
 0x53c   :  { %767 = vmatpush.bf16.msrb.mxu2 %v3130_v61 }
 0x540   :  { %v3269_v6 = vpop.f32.mrf.mxu1  ;;  %v343_v15 = vpop.f32.mrf.mxu0 }
 0x541   :  { %v344_v17 = vadd.f32 %v343_v15, %v3173_v22 }
 0x548   :  { %v3271_v7 = vpop.f32.mrf.mxu1 }
 0x550   :  { %v377_v8 = vpop.f32.mrf.mxu1 }
 0x551   :  { %v378_v56 = vadd.f32 %v377_v8, %v3170_v16 }
 0x558   :  { %v379_v9 = vpop.f32.mrf.mxu1 }
 0x559   :  { %v380_v10 = vadd.f32 %v379_v9, %v3170_v16  ;;  %v345_v9 = vpop.f32.mrf.mxu0 }
 0x5b2   :  { %v618_v14 = vpop.f32.mrf.mxu3 }
 0x5b3   :  { %v622_v12 = vadd.f32 %v618_v14, %v380_v10  ;;  %v346_v10 = vadd.f32 %v345_v9, %v3173_v22 }
 0x5b5   :  { %2695 = vtanh.f32 %v622_v12  ;;  %v645_v25 = vmul.f32 0.5, %v622_v12 }
 0x5ba   :  { %v597_v18 = vpop.f32.mrf.mxu2  ;;  %v620_v19 = vpop.f32.mrf.mxu3 }
 0x5bb   :  { %v2696_v20 = vpop.eup %2695  ;;  %v601_v21 = vadd.f32 %v597_v18, %v344_v17 }
 0x5bc   :  { %652 = vrot.lane.b32.xlu1 %v2696_v20, %s3001_s30 }
 0x5bd   :  { %2697 = vtanh.f32 %v601_v21  ;;  %v623_v26 = vmul.f32 0.5, %v601_v21 }
 0x5be   :  { %2699 = vtanh.f32 %v645_v25 }
 0x5bf   :  { %2701 = vtanh.f32 %v623_v26 }
 0x5c2   :  { %v599_v23 = vpop.f32.mrf.mxu2 }
 0x5c3   :  { %v2698_v24 = vpop.eup %2697 }
 0x5c4   :  { %630 = vrot.lane.b32.xlu0 %v2698_v24, %s3001_s30  ;;  %v2700_v27 = vpop.eup %2699 }
 0x5c5   :  { %v647_v28 = vadd.f32 1.0, %v2700_v27  ;;  %v2702_v30 = vpop.eup %2701 }
 0x5c6   :  { %v625_v33 = vadd.f32 1.0, %v2702_v30 }
 0x5c7   :  { %v648_v29 = vmul.f32 0.5, %v647_v28 }
 0x5c8   :  { %v626_v34 = vmul.f32 0.5, %v625_v33 }
 0x5c9   :  { %v650_v38 = vmul.f32 %v648_v29, %v3226_v37 }
 0x5ca   :  { %v628_v43 = vmul.f32 %v626_v34, %v3232_v42 }
 0x62e   :  { %v653_v31 = vpop.permute.xlu1 %652 }
 0x62f   :  { %v655_v32 = vmul.f32 %v653_v31, %v648_v29 }
 0x631   :  { %657 = vrot.lane.b32.xlu2 %v655_v32, %s3001_s30 }
 0x636   :  { %v631_v35 = vpop.permute.xlu0 %630 }
 0x637   :  { %v633_v36 = vmul.f32 %v631_v35, %v626_v34 }
 0x639   :  { %635 = vrot.lane.b32.xlu1 %v633_v36, %s3001_s30 }
 0x68b   :  { %v658_v39 = vpop.permute.xlu2 %657 }
 0x68c   :  { %v660_v40 = vadd.f32 %v658_v39, %v650_v38 }
 0x68e   :  { %2703 = vtanh.f32 %v660_v40 }
 0x694   :  { %v2704_v41 = vpop.eup %2703 }
 0x695   :  { %663 = vrot.lane.b32.xlu2 %v2704_v41, %s3001_s30 }
 0x6ab   :  { %v636_v44 = vpop.permute.xlu1 %635 }
 0x6ac   :  { %v638_v45 = vadd.f32 %v636_v44, %v628_v43 }
 0x6ae   :  { %2705 = vtanh.f32 %v638_v45 }
 0x6b4   :  { %v2706_v46 = vpop.eup %2705 }
 0x6b5   :  { %641 = vrot.lane.b32.xlu1 %v2706_v46, %s3001_s30 }
 0x6ef   :  { %v664_v48 = vpop.permute.xlu2 %663 }
 0x6f0   :  { %v3283_v49 = vmul.f32 %v664_v48, %v648_v29 }
 0x6f2   :  { %v688_v37 = vpack.c.bf16 %v3283_v49, %v3283_v49 }
 0x6f4   :  { %690 = vrot.lane.b32.xlu0 %v688_v37, %s2990_s21  ;;  %v375_v37 = vadd.f32 %v3271_v7, %v3170_v16 }
 0x727   :  { %v642_v52 = vpop.permute.xlu1 %641 }
 0x728   :  { %v3288_v47 = vmul.f32 %v642_v52, %v626_v34 }
 0x72a   :  { %v667_v42 = vpack.c.bf16 %v3288_v47, %v3288_v47 }
 0x72c   :  { %669 = vrot.lane.b32.xlu2 %v667_v42, %s2990_s21 }
 0x766   :  { %v691_v1 = vpop.permute.xlu0 %690 }
 0x767   :  { %2485 = vmatmul.msk.bf16.vlgmr.msra.gmra.mxu3 %vm407_vm14, %v691_v1 }
 0x768   :  { %873 = vmatpush.bf16.msra.mxu3 %v3121_v58 }
 0x76c   :  { %874 = vmatpush.bf16.msra.mxu3 %v3127_v60 }
 0x786   :  { %v670_v54 = vpop.permute.xlu2 %669 }
 0x787   :  { %2484 = vmatmul.msk.bf16.vlgmr.msra.gmra.mxu2 %vm407_vm14, %v670_v54 }
 0x788   :  { %852 = vmatpush.bf16.msra.mxu2 %v3125_v59 }
 0x78c   :  { %853 = vmatpush.bf16.msra.mxu2 %v3130_v61 }
 0x7ea   :  { %v704_v57 = vpop.f32.mrf.mxu3 }
 0x7eb   :  { %v708_v62 = vadd.f32 %v704_v57, %v378_v56 }
 0x7ed   :  { %2707 = vtanh.f32 %v708_v62  ;;  %v731_v18 = vmul.f32 0.5, %v708_v62 }
 0x7f2   :  { %v706_v63 = vpop.f32.mrf.mxu3 }
 0x7f3   :  { %v2708_v2 = vpop.eup %2707 }
 0x7f4   :  { %738 = vrot.lane.b32.xlu0 %v2708_v2, %s3001_s30 }
 0x80a   :  { %v683_v14 = vpop.f32.mrf.mxu2 }
 0x80b   :  { %v687_v12 = vadd.f32 %v683_v14, %v346_v10 }
 0x80d   :  { %2709 = vtanh.f32 %v687_v12  ;;  %v709_v8 = vmul.f32 0.5, %v687_v12 }
 0x80e   :  { %2711 = vtanh.f32 %v731_v18 }
 0x80f   :  { %2713 = vtanh.f32 %v709_v8 }
 0x812   :  { %v685_v15 = vpop.f32.mrf.mxu2 }
 0x813   :  { %v2710_v17 = vpop.eup %2709 }
 0x814   :  { %716 = vrot.lane.b32.xlu2 %v2710_v17, %s3001_s30  ;;  %v2712_v19 = vpop.eup %2711 }
 0x815   :  { %v733_v20 = vadd.f32 1.0, %v2712_v19  ;;  %v2714_v23 = vpop.eup %2713 }
 0x816   :  { %v711_v26 = vadd.f32 1.0, %v2714_v23 }
 0x817   :  { %v734_v21 = vmul.f32 0.5, %v733_v20 }
 0x818   :  { %v712_v27 = vmul.f32 0.5, %v711_v26 }
 0x819   :  { %v736_v30 = vmul.f32 %v734_v21, %v660_v40 }
 0x81a   :  { %v714_v33 = vmul.f32 %v712_v27, %v638_v45 }
 0x866   :  { %v739_v24 = vpop.permute.xlu0 %738 }
 0x867   :  { %v741_v25 = vmul.f32 %v739_v24, %v734_v21 }
 0x869   :  { %743 = vrot.lane.b32.xlu1 %v741_v25, %s3001_s30 }
 0x86e   :  { %v717_v28 = vpop.permute.xlu2 %716 }
 0x86f   :  { %v719_v29 = vmul.f32 %v717_v28, %v712_v27 }
 0x871   :  { %721 = vrot.lane.b32.xlu0 %v719_v29, %s3001_s30 }
 0x8db   :  { %v744_v31 = vpop.permute.xlu1 %743 }
 0x8dc   :  { %v746_v32 = vadd.f32 %v744_v31, %v736_v30 }
 0x8de   :  { %2715 = vtanh.f32 %v746_v32 }
 0x8e3   :  { %v722_v34 = vpop.permute.xlu0 %721 }
 0x8e4   :  { %v2716_v35 = vpop.eup %2715  ;;  %v724_v36 = vadd.f32 %v722_v34, %v714_v33 }
 0x8e5   :  { %749 = vrot.lane.b32.xlu1 %v2716_v35, %s3001_s30 }
 0x8e6   :  { %2717 = vtanh.f32 %v724_v36 }
 0x8ec   :  { %v2718_v38 = vpop.eup %2717 }
 0x8ed   :  { %727 = vrot.lane.b32.xlu0 %v2718_v38, %s3001_s30 }
 0x957   :  { %v750_v39 = vpop.permute.xlu1 %749 }
 0x958   :  { %v3307_v41 = vmul.f32 %v750_v39, %v734_v21 }
 0x95a   :  { %v774_v43 = vpack.c.bf16 %v3307_v41, %v3307_v41 }
 0x95c   :  { %776 = vrot.lane.b32.xlu2 %v774_v43, %s2990_s21 }
 0x95f   :  { %v728_v40 = vpop.permute.xlu0 %727 }
 0x960   :  { %v3312_v44 = vmul.f32 %v728_v40, %v712_v27 }
 0x962   :  { %v753_v45 = vpack.c.bf16 %v3312_v44, %v3312_v44 }
 0x964   :  { %755 = vrot.lane.b32.xlu1 %v753_v45, %s2990_s21 }
 0x9b6   :  { %v777_v46 = vpop.permute.xlu2 %776 }
 0x9b7   :  { %2487 = vmatmul.msk.bf16.vlgmr.msrb.gmra.mxu3 %vm407_vm14, %v777_v46 }
 0x9b8   :  { %1045 = vmatpush.bf16.msrb.mxu3 %v3121_v58  ;;  %v348_v58 = vpop.f32.mrf.mxu0 }
 0x9bc   :  { %1046 = vmatpush.bf16.msrb.mxu3 %v3127_v60  ;;  %v349_v60 = vadd.f32 %v348_v58, %v3173_v22 }
 0x9c0   :  { %v350_v43 = vpop.f32.mrf.mxu0 }
 0x9c1   :  { %v351_v40 = vadd.f32 %v350_v43, %v3173_v22 }
 0x9d6   :  { %v756_v48 = vpop.permute.xlu1 %755 }
 0x9d7   :  { %2486 = vmatmul.msk.bf16.vlgmr.msrb.gmra.mxu2 %vm407_vm14, %v756_v48 }
 0x9d8   :  { %1024 = vmatpush.bf16.msrb.mxu2 %v3125_v59 }
 0x9dc   :  { %1025 = vmatpush.bf16.msrb.mxu2 %v3130_v61 }
 0xa3a   :  { %v790_v52 = vpop.f32.mrf.mxu3 }
 0xa3b   :  { %v794_v42 = vadd.f32 %v790_v52, %v375_v37 }
 0xa3d   :  { %2719 = vtanh.f32 %v794_v42  ;;  %v817_v61 = vmul.f32 0.5, %v794_v42 }
 0xa42   :  { %v792_v1 = vpop.f32.mrf.mxu3 }
 0xa43   :  { %v2720_v54 = vpop.eup %2719 }
 0xa44   :  { %824 = vrot.lane.b32.xlu2 %v2720_v54, %s3001_s30 }
 0xa5a   :  { %v769_v56 = vpop.f32.mrf.mxu2 }
 0xa5b   :  { %v773_v57 = vadd.f32 %v769_v56, %v349_v60 }
 0xa5d   :  { %2721 = vtanh.f32 %v773_v57  ;;  %v795_v14 = vmul.f32 0.5, %v773_v57 }
 0xa5e   :  { %2723 = vtanh.f32 %v817_v61 }
 0xa5f   :  { %2725 = vtanh.f32 %v795_v14 }
 0xa62   :  { %v771_v62 = vpop.f32.mrf.mxu2 }
 0xa63   :  { %v2722_v59 = vpop.eup %2721 }
 0xa64   :  { %802 = vrot.lane.b32.xlu1 %v2722_v59, %s3001_s30  ;;  %v2724_v7 = vpop.eup %2723 }
 0xa65   :  { %v819_v63 = vadd.f32 1.0, %v2724_v7  ;;  %v2726_v12 = vpop.eup %2725 }
 0xa66   :  { %v797_v15 = vadd.f32 1.0, %v2726_v12 }
 0xa67   :  { %v820_v2 = vmul.f32 0.5, %v819_v63 }
 0xa68   :  { %v798_v17 = vmul.f32 0.5, %v797_v15 }
 0xa69   :  { %v822_v19 = vmul.f32 %v820_v2, %v746_v32 }
 0xa6a   :  { %v800_v24 = vmul.f32 %v798_v17, %v724_v36  ;;  %v373_v36 = vadd.f32 %v3269_v6, %v3170_v16 }
 0xa9e   :  { %v825_v9 = vpop.permute.xlu2 %824 }
 0xa9f   :  { %v827_v10 = vmul.f32 %v825_v9, %v820_v2 }
 0xaa1   :  { %829 = vrot.lane.b32.xlu0 %v827_v10, %s3001_s30 }
 0xad6   :  { %v803_v18 = vpop.permute.xlu1 %802 }
 0xad7   :  { %v805_v8 = vmul.f32 %v803_v18, %v798_v17 }
 0xad9   :  { %807 = vrot.lane.b32.xlu2 %v805_v8, %s3001_s30 }
 0xb13   :  { %v830_v20 = vpop.permute.xlu0 %829 }
 0xb14   :  { %v832_v21 = vadd.f32 %v830_v20, %v822_v19 }
 0xb16   :  { %2727 = vtanh.f32 %v832_v21 }
 0xb1c   :  { %v2728_v23 = vpop.eup %2727 }
 0xb1d   :  { %835 = vrot.lane.b32.xlu0 %v2728_v23, %s3001_s30 }
 0xb33   :  { %v808_v25 = vpop.permute.xlu2 %807 }
 0xb34   :  { %v810_v26 = vadd.f32 %v808_v25, %v800_v24 }
 0xb36   :  { %2729 = vtanh.f32 %v810_v26 }
 0xb3c   :  { %v2730_v27 = vpop.eup %2729 }
 0xb3d   :  { %813 = vrot.lane.b32.xlu2 %v2730_v27, %s3001_s30  ;;  %v370_v27 = vadd.f32 %v3267_v5, %v3170_v16 }
 0xb8f   :  { %v836_v28 = vpop.permute.xlu0 %835 }
 0xb90   :  { %v3332_v29 = vmul.f32 %v836_v28, %v820_v2 }
 0xb92   :  { %v860_v30 = vpack.c.bf16 %v3332_v29, %v3332_v29 }
 0xb94   :  { %862 = vrot.lane.b32.xlu1 %v860_v30, %s2990_s21 }
 0xb97   :  { %v814_v31 = vpop.permute.xlu2 %813 }
 0xb98   :  { %v3337_v32 = vmul.f32 %v814_v31, %v798_v17 }
 0xb9a   :  { %v839_v33 = vpack.c.bf16 %v3337_v32, %v3337_v32 }
 0xb9c   :  { %841 = vrot.lane.b32.xlu0 %v839_v33, %s2990_s21 }
 0xc06   :  { %v863_v34 = vpop.permute.xlu1 %862 }
 0xc07   :  { %2489 = vmatmul.msk.bf16.vlgmr.msra.gmra.mxu3 %vm407_vm14, %v863_v34  ;;  %v354_v34 = vadd.f32 %v3161_v11, %v3173_v22 }
 0xc0e   :  { %v842_v35 = vpop.permute.xlu0 %841 }
 0xc0f   :  { %2488 = vmatmul.msk.bf16.vlgmr.msra.gmra.mxu2 %vm407_vm14, %v842_v35 }
 0xc8a   :  { %v876_v38 = vpop.f32.mrf.mxu3 }
 0xc8b   :  { %v880_v39 = vadd.f32 %v876_v38, %v373_v36 }
 0xc8d   :  { %2731 = vtanh.f32 %v880_v39  ;;  %v903_v1 = vmul.f32 0.5, %v880_v39 }
 0xc92   :  { %v855_v45 = vpop.f32.mrf.mxu2  ;;  %v878_v46 = vpop.f32.mrf.mxu3 }
 0xc93   :  { %v2732_v48 = vpop.eup %2731  ;;  %v859_v37 = vadd.f32 %v855_v45, %v351_v40 }
 0xc94   :  { %910 = vrot.lane.b32.xlu1 %v2732_v48, %s3001_s30 }
 0xc95   :  { %2733 = vtanh.f32 %v859_v37  ;;  %v881_v6 = vmul.f32 0.5, %v859_v37 }
 0xc96   :  { %2735 = vtanh.f32 %v903_v1 }
 0xc97   :  { %2737 = vtanh.f32 %v881_v6 }
 0xc9a   :  { %v857_v52 = vpop.f32.mrf.mxu2 }
 0xc9b   :  { %v2734_v42 = vpop.eup %2733 }
 0xc9c   :  { %888 = vrot.lane.b32.xlu0 %v2734_v42, %s3001_s30  ;;  %v2736_v54 = vpop.eup %2735 }
 0xc9d   :  { %v905_v58 = vadd.f32 1.0, %v2736_v54  ;;  %v2738_v56 = vpop.eup %2737 }
 0xc9e   :  { %v883_v59 = vadd.f32 1.0, %v2738_v56 }
 0xc9f   :  { %v906_v60 = vmul.f32 0.5, %v905_v58 }
 0xca0   :  { %v884_v61 = vmul.f32 0.5, %v883_v59 }
 0xca1   :  { %v908_v2 = vmul.f32 %v906_v60, %v832_v21 }
 0xca2   :  { %v886_v12 = vmul.f32 %v884_v61, %v810_v26 }
 0xd06   :  { %v911_v57 = vpop.permute.xlu1 %910 }
 0xd07   :  { %v913_v62 = vmul.f32 %v911_v57, %v906_v60 }
 0xd09   :  { %915 = vrot.lane.b32.xlu2 %v913_v62, %s3001_s30 }
 0xd0e   :  { %v889_v7 = vpop.permute.xlu0 %888 }
 0xd0f   :  { %v891_v63 = vmul.f32 %v889_v7, %v884_v61 }
 0xd11   :  { %893 = vrot.lane.b32.xlu1 %v891_v63, %s3001_s30 }
 0xd63   :  { %v916_v9 = vpop.permute.xlu2 %915 }
 0xd64   :  { %v918_v10 = vadd.f32 %v916_v9, %v908_v2 }
 0xd66   :  { %2739 = vtanh.f32 %v918_v10 }
 0xd6c   :  { %v2740_v14 = vpop.eup %2739 }
 0xd6d   :  { %921 = vrot.lane.b32.xlu2 %v2740_v14, %s3001_s30 }
 0xd83   :  { %v894_v15 = vpop.permute.xlu1 %893 }
 0xd84   :  { %v896_v17 = vadd.f32 %v894_v15, %v886_v12 }
 0xd86   :  { %2741 = vtanh.f32 %v896_v17 }
 0xd8c   :  { %v2742_v18 = vpop.eup %2741 }
 0xd8d   :  { %899 = vrot.lane.b32.xlu1 %v2742_v18, %s3001_s30 }
 0xdc7   :  { %v922_v8 = vpop.permute.xlu2 %921 }
 0xdc8   :  { %v3353_v19 = vmul.f32 %v922_v8, %v906_v60 }
 0xdca   :  { %v946_v20 = vpack.c.bf16 %v3353_v19, %v3353_v19 }
 0xdcc   :  { %948 = vrot.lane.b32.xlu0 %v946_v20, %s2990_s21 }
 0xdff   :  { %v900_v21 = vpop.permute.xlu1 %899 }
 0xe00   :  { %v3358_v23 = vmul.f32 %v900_v21, %v884_v61 }
 0xe02   :  { %v925_v24 = vpack.c.bf16 %v3358_v23, %v3358_v23 }
 0xe04   :  { %927 = vrot.lane.b32.xlu2 %v925_v24, %s2990_s21  ;;  %v356_v24 = vadd.f32 %v3165_v13, %v3173_v22  ;;  %v1107_v13 = vpack.c.bf16 %v3283_v49, %v3307_v41  ;;  %v2618_v49 = vld [vmem:[%s3841_s5 + $0x14] sm:$0xf]  ;;  %v2530_v41 = vld [vmem:[%s3841_s5 + $0x18] sm:$0xf0] }
 0xe3e   :  { %v949_v25 = vpop.permute.xlu0 %948 }
 0xe3f   :  { %2491 = vmatmul.msk.bf16.vlgmr.msrb.gmra.mxu1 %vm407_vm14, %v949_v25 }
 0xe5e   :  { %v928_v26 = vpop.permute.xlu2 %927 }
 0xe5f   :  { %2490 = vmatmul.msk.bf16.vlgmr.msrb.gmra.mxu0 %vm407_vm14, %v928_v26 }
 0xebc   :  { %v962_v28 = vpop.f32.mrf.mxu1 }
 0xebd   :  { %v966_v30 = vadd.f32 %v962_v28, %v370_v27 }
 0xebf   :  { %2743 = vtanh.f32 %v966_v30  ;;  %v989_v43 = vmul.f32 0.5, %v966_v30 }
 0xec4   :  { %v964_v31 = vpop.f32.mrf.mxu1 }
 0xec5   :  { %v2744_v33 = vpop.eup %2743 }
 0xec6   :  { %996 = vrot.lane.b32.xlu0 %v2744_v33, %s3001_s30 }
 0xedc   :  { %v941_v35 = vpop.f32.mrf.mxu0 }
 0xedd   :  { %v945_v36 = vadd.f32 %v941_v35, %v354_v34 }
 0xedf   :  { %2745 = vtanh.f32 %v945_v36  ;;  %v967_v5 = vmul.f32 0.5, %v945_v36  ;;  %v2520_v36 = vld [vmem:[%s3841_s5] sm:$0xf] }
 0xee0   :  { %2747 = vtanh.f32 %v989_v43 }
 0xee1   :  { %2749 = vtanh.f32 %v967_v5  ;;  %v2522_v5 = vld [vmem:[%s3841_s5 + $0x8] sm:$0xf0] }
 0xee4   :  { %v943_v38 = vpop.f32.mrf.mxu0 }
 0xee5   :  { %v2746_v39 = vpop.eup %2745  ;;  %v2617_v38 = vld [vmem:[%s3841_s5 + $0x4] sm:$0xf0] }
 0xee6   :  { %974 = vrot.lane.b32.xlu2 %v2746_v39, %s3001_s30  ;;  %v2748_v40 = vpop.eup %2747  ;;  %v2616_v39 = vld [vmem:[%s3841_s5 + $0x4] sm:$0xf]  ;;  %v2521_v43 = vor.u32 %v2617_v38, %v2520_v36 }
 0xee7   :  { %v991_v45 = vadd.f32 1.0, %v2748_v40  ;;  %v2750_v48 = vpop.eup %2749  ;;  %v2525_v40 = vor.u32 %v2616_v39, %v2522_v5 }
 0xee8   :  { %v969_v42 = vadd.f32 1.0, %v2750_v48 }
 0xee9   :  { %v992_v46 = vmul.f32 0.5, %v991_v45 }
 0xeea   :  { %v970_v11 = vmul.f32 0.5, %v969_v42 }
 0xeeb   :  { %v994_v54 = vmul.f32 %v992_v46, %v918_v10 }
 0xeec   :  { %v972_v56 = vmul.f32 %v970_v11, %v896_v17  ;;  %v368_v17 = vadd.f32 %v3265_v4, %v3170_v16  ;;  %v1097_v16 = vpack.c.bf16 %v3245_v55, %v3193_v53  ;;  %v1098_v4 = vpack.c.bf16 %v3312_v44, %v3288_v47  ;;  %v2528_v53 = vld [vmem:[%s3841_s5 + $0x10] sm:$0xf]  ;;  %v2619_v55 = vld [vmem:[%s3841_s5 + $0x14] sm:$0xf0] }
 0xeed   :  { %v2529_v47 = vor.u32 %v2619_v55, %v2528_v53  ;;  %v2533_v44 = vor.u32 %v2618_v49, %v2530_v41 }
 0xeef   :  { %1265 = vmatpush.bf16.msra.mxu2 %v2529_v47  ;;  %1294 = vmatpush.bf16.msra.mxu3 %v2533_v44 }
 0xef3   :  { %1266 = vmatpush.bf16.msra.mxu2 %v2521_v43  ;;  %1295 = vmatpush.bf16.msra.mxu3 %v2525_v40 }
 0xf38   :  { %v997_v37 = vpop.permute.xlu0 %996 }
 0xf39   :  { %v999_v52 = vmul.f32 %v997_v37, %v992_v46 }
 0xf3b   :  { %1001 = vrot.lane.b32.xlu1 %v999_v52, %s3001_s30 }
 0xf40   :  { %v975_v1 = vpop.permute.xlu2 %974 }
 0xf41   :  { %v977_v6 = vmul.f32 %v975_v1, %v970_v11 }
 0xf43   :  { %979 = vrot.lane.b32.xlu0 %v977_v6, %s3001_s30 }
 0xfad   :  { %v1002_v58 = vpop.permute.xlu1 %1001 }
 0xfae   :  { %v3373_v60 = vadd.f32 %v1002_v58, %v994_v54 }
 0xfb0   :  { %2751 = vtanh.f32 %v3373_v60 }
 0xfb5   :  { %v980_v57 = vpop.permute.xlu0 %979 }
 0xfb6   :  { %v2752_v62 = vpop.eup %2751  ;;  %v3376_v59 = vadd.f32 %v980_v57, %v972_v56 }
 0xfb7   :  { %1007 = vrot.lane.b32.xlu1 %v2752_v62, %s3001_s30 }
 0xfb8   :  { %2753 = vtanh.f32 %v3376_v59 }
 0xfbe   :  { %v2754_v61 = vpop.eup %2753 }
 0xfbf   :  { %985 = vrot.lane.b32.xlu0 %v2754_v61, %s3001_s30 }
0x1029   :  { %v1008_v7 = vpop.permute.xlu1 %1007 }
0x102a   :  { %v3381_v63 = vmul.f32 %v1008_v7, %v992_v46 }
0x102c   :  { %v1032_v2 = vpack.c.bf16 %v3381_v63, %v3381_v63 }
0x102e   :  { %1034 = vrot.lane.b32.xlu2 %v1032_v2, %s2990_s21  ;;  %v1099_v2 = vpack.c.bf16 %v3358_v23, %v3337_v32  ;;  %v2622_v32 = vld [vmem:[%s3842_s6 + $0x14] sm:$0xf] }
0x1031   :  { %v986_v9 = vpop.permute.xlu0 %985 }
0x1032   :  { %v3386_v10 = vmul.f32 %v986_v9, %v970_v11 }
0x1034   :  { %v1011_v14 = vpack.c.bf16 %v3386_v10, %v3386_v10 }
0x1036   :  { %1013 = vrot.lane.b32.xlu1 %v1011_v14, %s2990_s21 }
0x1088   :  { %v1035_v12 = vpop.permute.xlu2 %1034 }
0x1089   :  { %2493 = vmatmul.msk.bf16.vlgmr.msrb.gmra.mxu3 %vm407_vm14, %v1035_v12  ;;  %v1106_v12 = vpack.c.bf16 %v3332_v29, %v3353_v19  ;;  %v2504_v29 = vld [vmem:[%s3842_s6 + $0x10] sm:$0xf]  ;;  %v2623_v19 = vld [vmem:[%s3842_s6 + $0x14] sm:$0xf0] }
0x10a8   :  { %v1014_v15 = vpop.permute.xlu1 %1013 }
0x10a9   :  { %2492 = vmatmul.msk.bf16.vlgmr.msrb.gmra.mxu2 %vm407_vm14, %v1014_v15  ;;  %v2505_v15 = vor.u32 %v2623_v19, %v2504_v29 }
0x10ab   :  { %1163 = vmatpush.bf16.msra.mxu0 %v2505_v15 }
0x110c   :  { %v1048_v18 = vpop.f32.mrf.mxu3 }
0x110d   :  { %v1052_v8 = vadd.f32 %v1048_v18, %v368_v17  ;;  %v2496_v17 = vld [vmem:[%s3842_s6] sm:$0xf]  ;;  %v2621_v18 = vld [vmem:[%s3842_s6 + $0x4] sm:$0xf0] }
0x110f   :  { %2755 = vtanh.f32 %v1052_v8  ;;  %v1075_v22 = vmul.f32 0.5, %v1052_v8 }
0x1114   :  { %v1050_v20 = vpop.f32.mrf.mxu3 }
0x1115   :  { %v2756_v21 = vpop.eup %2755  ;;  %v2497_v20 = vor.u32 %v2621_v18, %v2496_v17 }
0x1116   :  { %1082 = vrot.lane.b32.xlu2 %v2756_v21, %s3001_s30 }
0x1117   :  { %1164 = vmatpush.bf16.msra.mxu0 %v2497_v20 }
0x112c   :  { %v1027_v25 = vpop.f32.mrf.mxu2 }
0x112d   :  { %v1031_v26 = vadd.f32 %v1027_v25, %v356_v24 }
0x112f   :  { %2757 = vtanh.f32 %v1031_v26  ;;  %v1053_v45 = vmul.f32 0.5, %v1031_v26 }
0x1130   :  { %2759 = vtanh.f32 %v1075_v22 }
0x1131   :  { %2761 = vtanh.f32 %v1053_v45 }
0x1134   :  { %v1029_v27 = vpop.f32.mrf.mxu2 }
0x1135   :  { %v2758_v28 = vpop.eup %2757  ;;  %v3481_v27 = vld [vmem:[#allocation9 + $0x8] sm:$0xff] }
0x1136   :  { %1060 = vrot.lane.b32.xlu1 %v2758_v28, %s3001_s30  ;;  %v2760_v30 = vpop.eup %2759  ;;  %1477 = vmatpush.bf16.msrb.mxu3 %v3481_v27  ;;  %v3485_v28 = vld [vmem:[#allocation7 + $0x8] sm:$0xff] }
0x1137   :  { %v1077_v31 = vadd.f32 1.0, %v2760_v30  ;;  %v2762_v46 = vpop.eup %2761  ;;  %1365 = vmatpush.bf16.msrb.mxu0 %v3485_v28  ;;  %1456 = vmatpush.bf16.msrb.mxu2 %v3485_v28 }
0x1138   :  { %v1055_v48 = vadd.f32 1.0, %v2762_v46 }
0x1139   :  { %v1078_v33 = vmul.f32 0.5, %v1077_v31 }
0x113a   :  { %v1056_v37 = vmul.f32 0.5, %v1055_v48 }
0x113b   :  { %v1080_v6 = vmul.f32 %v1078_v33, %v3373_v60  ;;  %v1108_v60 = vpack.c.bf16 %v3188_v50, %v3237_v51  ;;  %v2506_v50 = vld [vmem:[%s3842_s6 + $0x18] sm:$0xf0]  ;;  %v2620_v51 = vld [vmem:[%s3842_s6 + $0x4] sm:$0xf] }
0x113c   :  { %v1058_v57 = vmul.f32 %v1056_v37, %v3376_v59  ;;  %v2509_v23 = vor.u32 %v2622_v32, %v2506_v50 }
0x113e   :  { %1219 = vrot.lane.b32.xlu1 %v1097_v16, %s2990_s21  ;;  %1192 = vmatpush.bf16.msra.mxu1 %v2509_v23  ;;  %v3491_v16 = vld [vmem:[#allocation9] sm:$0xff] }
0x113f   :  { %1478 = vmatpush.bf16.msrb.mxu3 %v3491_v16 }
0x1146   :  { %1221 = vrot.lane.b32.xlu1 %v1098_v4, %s2990_s21 }
0x114e   :  { %1121 = vrot.lane.b32.xlu1 %v1107_v13, %s2990_s21  ;;  %v3501_v13 = vld [vmem:[#allocation7] sm:$0xff] }
0x114f   :  { %1366 = vmatpush.bf16.msrb.mxu0 %v3501_v13  ;;  %1457 = vmatpush.bf16.msrb.mxu2 %v3501_v13 }
0x1170   :  { %v1083_v34 = vpop.permute.xlu2 %1082 }
0x1171   :  { %v1085_v35 = vmul.f32 %v1083_v34, %v1078_v33 }
0x1173   :  { %1087 = vrot.lane.b32.xlu0 %v1085_v35, %s3001_s30  ;;  %v1317_v35 = vld [vmem:[%s3843_s7] sm:$0x3] }
0x1174   :  { %v1320_v55 = vperm.slane %v1317_v35, 1  ;;  %v1319_v40 = vperm.slane %v1317_v35, 0 }
0x11a8   :  { %v1061_v52 = vpop.permute.xlu1 %1060 }
0x11a9   :  { %v1063_v42 = vmul.f32 %v1061_v52, %v1056_v37 }
0x11ab   :  { %1065 = vrot.lane.b32.xlu2 %v1063_v42, %s3001_s30 }
0x11b0   :  { %v1220_v11 = vpop.permute.xlu1 %1219 }
0x11b1   :  { %2534 = vmatmul.msk.bf16.vlgmr.msra.gmra.mxu2 %vm407_vm14, %v1220_v11  ;;  %2538 = vmatmul.msk.bf16.vlgmr.msra.gmra.mxu3 %vm407_vm14, %v1220_v11 }
0x11b2   :  { %1649 = vmatpush.bf16.msra.mxu3 %v3481_v27  ;;  %1628 = vmatpush.bf16.msra.mxu2 %v3485_v28 }
0x11b6   :  { %1650 = vmatpush.bf16.msra.mxu3 %v3491_v16  ;;  %1629 = vmatpush.bf16.msra.mxu2 %v3501_v13 }
0x11b8   :  { %v1222_v1 = vpop.permute.xlu1 %1221 }
0x11c0   :  { %v1122_v22 = vpop.permute.xlu1 %1121 }
0x11c1   :  { %2535 = vmatmul.msk.bf16.gmra.mxu2 %vm407_vm14, %v1222_v1  ;;  %2539 = vmatmul.msk.bf16.gmra.mxu3 %vm407_vm14, %v1222_v1 }
0x11e5   :  { %v1088_v54 = vpop.permute.xlu0 %1087 }
0x11e6   :  { %v1090_v58 = vadd.f32 %v1088_v54, %v1080_v6 }
0x11e8   :  { %2763 = vtanh.f32 %v1090_v58 }
0x11ee   :  { %v2764_v56 = vpop.eup %2763 }
0x11ef   :  { %1093 = vrot.lane.b32.xlu0 %v2764_v56, %s3001_s30 }
0x1205   :  { %v1066_v62 = vpop.permute.xlu2 %1065 }
0x1206   :  { %v1068_v61 = vadd.f32 %v1066_v62, %v1058_v57 }
0x1208   :  { %2765 = vtanh.f32 %v1068_v61 }
0x120e   :  { %v2766_v7 = vpop.eup %2765 }
0x120f   :  { %1071 = vrot.lane.b32.xlu0 %v2766_v7, %s3001_s30 }
0x1217   :  { %1223 = vrot.lane.b32.xlu0 %v1099_v2, %s2990_s21 }
0x121f   :  { %1123 = vrot.lane.b32.xlu0 %v1108_v60, %s2990_s21 }
0x1234   :  { %v1297_v34 = vpop.f32.mrf.mxu3 }
0x123c   :  { %v1299_v41 = vpop.f32.mrf.mxu3 }
0x1244   :  { %v1302_v45 = vpop.f32.mrf.mxu3 }
0x124c   :  { %v1304_v58 = vpop.f32.mrf.mxu3 }
0x1261   :  { %v1094_v9 = vpop.permute.xlu0 %1093 }
0x1262   :  { %v1096_v14 = vmul.f32 %v1094_v9, %v1078_v33  ;;  %v1268_v33 = vpop.f32.mrf.mxu2 }
0x1264   :  { %v1105_v59 = vpack.c.bf16 %v3381_v63, %v1096_v14  ;;  %v2498_v63 = vld [vmem:[%s3842_s6 + $0x8] sm:$0xf0] }
0x1265   :  { %v2501_v8 = vor.u32 %v2620_v51, %v2498_v63 }
0x1266   :  { %1117 = vrot.lane.b32.xlu2 %v1105_v59, %s2990_s21 }
0x1267   :  { %1193 = vmatpush.bf16.msra.mxu1 %v2501_v8 }
0x126a   :  { %v1270_v53 = vpop.f32.mrf.mxu2 }
0x126b   :  { %1391 = vmatpush.bf16.msrb.mxu1 %v3481_v27 }
0x126e   :  { %1119 = vrot.lane.b32.xlu2 %v1106_v12, %s2990_s21 }
0x126f   :  { %1392 = vmatpush.bf16.msrb.mxu1 %v3491_v16 }
0x1272   :  { %v1273_v39 = vpop.f32.mrf.mxu2 }
0x127a   :  { %v1275_v1 = vpop.f32.mrf.mxu2 }
0x1281   :  { %v1072_v21 = vpop.permute.xlu0 %1071 }
0x1282   :  { %v1074_v24 = vmul.f32 %v1072_v21, %v1056_v37 }
0x1284   :  { %v1100_v25 = vpack.c.bf16 %v1074_v24, %v3386_v10 }
0x1286   :  { %1225 = vrot.lane.b32.xlu2 %v1100_v25, %s2990_s21 }
0x1289   :  { %v1224_v26 = vpop.permute.xlu0 %1223 }
0x128a   :  { %2536 = vmatmul.msk.bf16.gmra.mxu2 %vm407_vm14, %v1224_v26  ;;  %2540 = vmatmul.msk.bf16.gmra.mxu3 %vm407_vm14, %v1224_v26 }
0x1291   :  { %v1124_v31 = vpop.permute.xlu0 %1123 }
0x12c0   :  { %v1118_v10 = vpop.permute.xlu2 %1117 }
0x12c1   :  { %2510 = vmatmul.msk.bf16.vlgmr.msra.gmra.mxu0 %vm407_vm14, %v1118_v10  ;;  %2514 = vmatmul.msk.bf16.vlgmr.msra.gmra.mxu1 %vm407_vm14, %v1118_v10 }
0x12c2   :  { %1563 = vmatpush.bf16.msra.mxu1 %v3481_v27  ;;  %1542 = vmatpush.bf16.msra.mxu0 %v3485_v28 }
0x12c6   :  { %1564 = vmatpush.bf16.msra.mxu1 %v3491_v16  ;;  %1543 = vmatpush.bf16.msra.mxu0 %v3501_v13 }
0x12c8   :  { %v1120_v4 = vpop.permute.xlu2 %1119 }
0x12d1   :  { %2511 = vmatmul.msk.bf16.gmra.mxu0 %vm407_vm14, %v1120_v4  ;;  %2515 = vmatmul.msk.bf16.gmra.mxu1 %vm407_vm14, %v1120_v4 }
0x12e0   :  { %v1226_v30 = vpop.permute.xlu2 %1225 }
0x12e1   :  { %2512 = vmatmul.msk.bf16.gmra.mxu0 %vm407_vm14, %v1122_v22  ;;  %2516 = vmatmul.msk.bf16.gmra.mxu1 %vm407_vm14, %v1122_v22 }
0x12e2   :  { %2537 = vmatmul.msk.bf16.gmra.mxu2 %vm407_vm14, %v1226_v30  ;;  %2541 = vmatmul.msk.bf16.gmra.mxu3 %vm407_vm14, %v1226_v30 }
0x12f1   :  { %2513 = vmatmul.msk.bf16.gmra.mxu0 %vm407_vm14, %v1124_v31  ;;  %2517 = vmatmul.msk.bf16.gmra.mxu1 %vm407_vm14, %v1124_v31 }
0x1301   :  { %1367 = vmatmul.bf16.vlgmr.msrb.gmra.mxu0 %v2998_v0  ;;  %1393 = vmatmul.bf16.vlgmr.msrb.gmra.mxu1 %v2998_v0 }
0x1302   :  { %1735 = vmatpush.bf16.msrb.mxu1 %v3481_v27  ;;  %1714 = vmatpush.bf16.msrb.mxu0 %v3485_v28 }
0x1306   :  { %1736 = vmatpush.bf16.msrb.mxu1 %v3491_v16  ;;  %1715 = vmatpush.bf16.msrb.mxu0 %v3501_v13 }
0x130d   :  { %v1278_v7 = vpop.f32.mrf.mxu2  ;;  %v1307_v9 = vpop.f32.mrf.mxu3 }
0x1315   :  { %v1280_v23 = vpop.f32.mrf.mxu2  ;;  %v1309_v63 = vpop.f32.mrf.mxu3 }
0x133e   :  { %v1166_v49 = vpop.f32.mrf.mxu0  ;;  %v1195_v47 = vpop.f32.mrf.mxu1 }
0x133f   :  { %v1298_v0 = vadd.f32 %v1297_v34, %v1195_v47  ;;  %v1269_v47 = vadd.f32 %v1268_v33, %v1166_v49 }
0x1341   :  { %v3524_v44 = vadd.f32 %v1320_v55, %v1298_v0 }
0x1346   :  { %v1168_v36 = vpop.f32.mrf.mxu0  ;;  %v1197_v38 = vpop.f32.mrf.mxu1 }
0x1347   :  { %v1271_v43 = vadd.f32 %v1270_v53, %v1168_v36  ;;  %v1300_v5 = vadd.f32 %v1299_v41, %v1197_v38  ;;  %v1323_v36 = vadd.f32 %v1319_v40, %v1269_v47 }
0x1349   :  { %v3526_v46 = vadd.f32 %v1319_v40, %v1271_v43  ;;  %v3528_v48 = vadd.f32 %v1320_v55, %v1300_v5 }
0x134e   :  { %v1171_v37 = vpop.f32.mrf.mxu0  ;;  %v1200_v52 = vpop.f32.mrf.mxu1 }
0x134f   :  { %v1274_v42 = vadd.f32 %v1273_v39, %v1171_v37  ;;  %v1303_v11 = vadd.f32 %v1302_v45, %v1200_v52 }
0x1351   :  { %v3530_v6 = vadd.f32 %v1319_v40, %v1274_v42  ;;  %v3532_v54 = vadd.f32 %v1320_v55, %v1303_v11 }
0x1356   :  { %v1173_v56 = vpop.f32.mrf.mxu0  ;;  %v1202_v57 = vpop.f32.mrf.mxu1 }
0x1357   :  { %v1276_v62 = vadd.f32 %v1275_v1, %v1173_v56  ;;  %v1305_v61 = vadd.f32 %v1304_v58, %v1202_v57 }
0x1359   :  { %v3534_v2 = vadd.f32 %v1319_v40, %v1276_v62  ;;  %v3536_v60 = vadd.f32 %v1320_v55, %v1305_v61 }
0x135e   :  { %v1176_v14 = vpop.f32.mrf.mxu0  ;;  %v1205_v59 = vpop.f32.mrf.mxu1 }
0x135f   :  { %v1279_v12 = vadd.f32 %v1278_v7, %v1176_v14  ;;  %v1308_v32 = vadd.f32 %v1307_v9, %v1205_v59 }
0x1361   :  { %v3538_v50 = vadd.f32 %v1320_v55, %v1308_v32  ;;  %v3540_v51 = vadd.f32 %v1319_v40, %v1279_v12 }
0x1365   :  { %v1283_v20 = vpop.f32.mrf.mxu2  ;;  %v1312_v21 = vpop.f32.mrf.mxu3 }
0x1366   :  { %v1178_v29 = vpop.f32.mrf.mxu0  ;;  %v1207_v19 = vpop.f32.mrf.mxu1 }
0x1367   :  { %v1281_v15 = vadd.f32 %v1280_v23, %v1178_v29  ;;  %v1310_v17 = vadd.f32 %v1309_v63, %v1207_v19 }
0x1369   :  { %v3542_v18 = vadd.f32 %v1320_v55, %v1310_v17  ;;  %v3544_v8 = vadd.f32 %v1319_v40, %v1281_v15 }
0x136d   :  { %v1285_v30 = vpop.f32.mrf.mxu2  ;;  %v1314_v53 = vpop.f32.mrf.mxu3 }
0x136e   :  { %v1181_v24 = vpop.f32.mrf.mxu0  ;;  %v1210_v25 = vpop.f32.mrf.mxu1 }
0x136f   :  { %v1284_v26 = vadd.f32 %v1283_v20, %v1181_v24  ;;  %v1313_v10 = vadd.f32 %v1312_v21, %v1210_v25 }
0x1371   :  { %v3546_v4 = vadd.f32 %v1320_v55, %v1313_v10  ;;  %v3548_v22 = vadd.f32 %v1319_v40, %v1284_v26 }
0x1376   :  { %v1183_v31 = vpop.f32.mrf.mxu0  ;;  %v1212_v34 = vpop.f32.mrf.mxu1 }
0x1377   :  { %v1286_v35 = vadd.f32 %v1285_v30, %v1183_v31  ;;  %v1315_v41 = vadd.f32 %v1314_v53, %v1212_v34 }
0x1379   :  { %v3550_v0 = vadd.f32 %v1319_v40, %v1286_v35  ;;  %v1338_v38 = vadd.f32 %v1320_v55, %v1315_v41 }
0x137e   :  { %v1368_v39 = vpop.f32.mrf.mxu0  ;;  %v1394_v43 = vpop.f32.mrf.mxu1 }
0x137f   :  { %v1372_v5 = vadd.f32 %v1368_v39, %v1323_v36  ;;  %v1398_v45 = vadd.f32 %v1394_v43, %v1338_v38 }
0x1381   :  { %2767 = vtanh.f32 %v1372_v5  ;;  %v1399_v33 = vmul.f32 0.5, %v1372_v5  ;;  %v1421_v49 = vmul.f32 0.5, %v1398_v45 }
0x1382   :  { %2769 = vtanh.f32 %v1398_v45 }
0x1383   :  { %2771 = vtanh.f32 %v1399_v33 }
0x1384   :  { %2773 = vtanh.f32 %v1421_v49 }
0x1386   :  { %v1396_v37 = vpop.f32.mrf.mxu1  ;;  %v1370_v52 = vpop.f32.mrf.mxu0 }
0x1387   :  { %v2768_v42 = vpop.eup %2767 }
0x1388   :  { %v2770_v11 = vpop.eup %2769  ;;  %1406 = vrot.lane.b32.xlu0 %v2768_v42, %s3001_s30 }
0x1389   :  { %1428 = vrot.lane.b32.xlu1 %v2770_v11, %s3001_s30  ;;  %v2772_v40 = vpop.eup %2771 }
0x138a   :  { %v2774_v55 = vpop.eup %2773  ;;  %v1401_v1 = vadd.f32 1.0, %v2772_v40 }
0x138b   :  { %v1423_v58 = vadd.f32 1.0, %v2774_v55 }
0x138c   :  { %v1402_v56 = vmul.f32 0.5, %v1401_v1 }
0x138d   :  { %v1424_v57 = vmul.f32 0.5, %v1423_v58 }
0x138e   :  { %v1404_v23 = vmul.f32 0.0, %v1402_v56 }
0x138f   :  { %v1426_v14 = vmul.f32 0.0, %v1424_v57 }
0x13fa   :  { %v1407_v62 = vpop.permute.xlu0 %1406 }
0x13fb   :  { %v1429_v61 = vpop.permute.xlu1 %1428  ;;  %v1409_v7 = vmul.f32 %v1407_v62, %v1402_v56 }
0x13fc   :  { %v1431_v9 = vmul.f32 %v1429_v61, %v1424_v57 }
0x13fd   :  { %1411 = vrot.lane.b32.xlu1 %v1409_v7, %s3001_s30 }
0x13fe   :  { %1433 = vrot.lane.b32.xlu2 %v1431_v9, %s3001_s30 }
0x1458   :  { %v1434_v59 = vpop.permute.xlu2 %1433 }
0x1459   :  { %v1436_v12 = vadd.f32 %v1434_v59, %v1426_v14 }
0x145b   :  { %2775 = vtanh.f32 %v1436_v12 }
0x1461   :  { %v2776_v32 = vpop.eup %2775 }
0x1462   :  { %1439 = vrot.lane.b32.xlu2 %v2776_v32, %s3001_s30 }
0x146f   :  { %v1412_v63 = vpop.permute.xlu1 %1411 }
0x1470   :  { %v1414_v29 = vadd.f32 %v1412_v63, %v1404_v23 }
0x1472   :  { %2777 = vtanh.f32 %v1414_v29 }
0x1478   :  { %v2778_v19 = vpop.eup %2777 }
0x1479   :  { %1417 = vrot.lane.b32.xlu1 %v2778_v19, %s3001_s30 }
0x14bc   :  { %v1440_v15 = vpop.permute.xlu2 %1439 }
0x14bd   :  { %v3558_v17 = vmul.f32 %v1440_v15, %v1424_v57 }
0x14bf   :  { %v1464_v20 = vpack.c.bf16 %v3558_v17, %v3558_v17 }
0x14c1   :  { %1466 = vrot.lane.b32.xlu0 %v1464_v20, %s2990_s21 }
0x14eb   :  { %v1418_v21 = vpop.permute.xlu1 %1417 }
0x14ec   :  { %v3563_v24 = vmul.f32 %v1418_v21, %v1402_v56 }
0x14ee   :  { %v1443_v25 = vpack.c.bf16 %v3563_v24, %v3563_v24 }
0x14f0   :  { %1445 = vrot.lane.b32.xlu2 %v1443_v25, %s2990_s21 }
0x1533   :  { %v1467_v26 = vpop.permute.xlu0 %1466 }
0x1534   :  { %2559 = vmatmul.msk.bf16.vlgmr.msrb.gmra.mxu3 %vm407_vm14, %v1467_v26 }
0x1535   :  { %1821 = vmatpush.bf16.msrb.mxu3 %v3481_v27 }
0x1539   :  { %1822 = vmatpush.bf16.msrb.mxu3 %v3491_v16 }
0x154a   :  { %v1446_v10 = vpop.permute.xlu2 %1445 }
0x154b   :  { %2558 = vmatmul.msk.bf16.vlgmr.msrb.gmra.mxu2 %vm407_vm14, %v1446_v10 }
0x154c   :  { %1800 = vmatpush.bf16.msrb.mxu2 %v3485_v28 }
0x1550   :  { %1801 = vmatpush.bf16.msrb.mxu2 %v3501_v13 }
0x15b7   :  { %v1480_v30 = vpop.f32.mrf.mxu3 }
0x15b8   :  { %v1484_v31 = vadd.f32 %v1480_v30, %v3546_v4 }
0x15ba   :  { %2779 = vtanh.f32 %v1484_v31  ;;  %v1507_v39 = vmul.f32 0.5, %v1484_v31 }
0x15bf   :  { %v1482_v34 = vpop.f32.mrf.mxu3 }
0x15c0   :  { %v2780_v35 = vpop.eup %2779 }
0x15c1   :  { %1514 = vrot.lane.b32.xlu0 %v2780_v35, %s3001_s30 }
0x15ce   :  { %v1459_v53 = vpop.f32.mrf.mxu2 }
0x15cf   :  { %v1463_v47 = vadd.f32 %v1459_v53, %v3526_v46 }
0x15d1   :  { %2781 = vtanh.f32 %v1463_v47  ;;  %v1485_v38 = vmul.f32 0.5, %v1463_v47 }
0x15d3   :  { %2783 = vtanh.f32 %v1485_v38 }
0x15d4   :  { %2785 = vtanh.f32 %v1507_v39 }
0x15d6   :  { %v1461_v41 = vpop.f32.mrf.mxu2 }
0x15d7   :  { %v2782_v36 = vpop.eup %2781 }
0x15d8   :  { %1492 = vrot.lane.b32.xlu2 %v2782_v36, %s3001_s30 }
0x15d9   :  { %v2784_v43 = vpop.eup %2783 }
0x15da   :  { %v2786_v5 = vpop.eup %2785  ;;  %v1487_v4 = vadd.f32 1.0, %v2784_v43 }
0x15db   :  { %v1509_v45 = vadd.f32 1.0, %v2786_v5 }
0x15dc   :  { %v1488_v37 = vmul.f32 0.5, %v1487_v4 }
0x15dd   :  { %v1510_v52 = vmul.f32 0.5, %v1509_v45 }
0x15de   :  { %v1490_v46 = vmul.f32 %v1488_v37, %v1414_v29 }
0x15df   :  { %v1512_v55 = vmul.f32 %v1510_v52, %v1436_v12 }
0x1632   :  { %v1493_v42 = vpop.permute.xlu2 %1492 }
0x1633   :  { %v1515_v11 = vpop.permute.xlu0 %1514  ;;  %v1495_v33 = vmul.f32 %v1493_v42, %v1488_v37 }
0x1634   :  { %v1517_v49 = vmul.f32 %v1515_v11, %v1510_v52 }
0x1635   :  { %1497 = vrot.lane.b32.xlu0 %v1495_v33, %s3001_s30 }
0x1636   :  { %1519 = vrot.lane.b32.xlu1 %v1517_v49, %s3001_s30 }
0x16a7   :  { %v1498_v40 = vpop.permute.xlu0 %1497 }
0x16a8   :  { %v1500_v1 = vadd.f32 %v1498_v40, %v1490_v46  ;;  %v1520_v58 = vpop.permute.xlu1 %1519 }
0x16a9   :  { %v1522_v56 = vadd.f32 %v1520_v58, %v1512_v55 }
0x16aa   :  { %2787 = vtanh.f32 %v1500_v1 }
0x16ab   :  { %2789 = vtanh.f32 %v1522_v56 }
0x16b0   :  { %v2788_v57 = vpop.eup %2787 }
0x16b1   :  { %v2790_v62 = vpop.eup %2789  ;;  %1503 = vrot.lane.b32.xlu0 %v2788_v57, %s3001_s30 }
0x16b2   :  { %1525 = vrot.lane.b32.xlu1 %v2790_v62, %s3001_s30 }
0x1723   :  { %v1504_v61 = vpop.permute.xlu0 %1503 }
0x1724   :  { %v3582_v7 = vmul.f32 %v1504_v61, %v1488_v37  ;;  %v1526_v9 = vpop.permute.xlu1 %1525 }
0x1725   :  { %v3584_v14 = vmul.f32 %v1526_v9, %v1510_v52 }
0x1726   :  { %v1529_v59 = vpack.c.bf16 %v3582_v7, %v3582_v7 }
0x1727   :  { %v1550_v12 = vpack.c.bf16 %v3584_v14, %v3584_v14 }
0x1728   :  { %1531 = vrot.lane.b32.xlu1 %v1529_v59, %s2990_s21 }
0x1729   :  { %1552 = vrot.lane.b32.xlu2 %v1550_v12, %s2990_s21 }
0x1783   :  { %v1553_v32 = vpop.permute.xlu2 %1552 }
0x1784   :  { %2561 = vmatmul.msk.bf16.vlgmr.msra.gmra.mxu1 %vm407_vm14, %v1553_v32 }
0x1785   :  { %1907 = vmatpush.bf16.msra.mxu1 %v3481_v27 }
0x1789   :  { %1908 = vmatpush.bf16.msra.mxu1 %v3491_v16 }
0x179a   :  { %v1532_v23 = vpop.permute.xlu1 %1531 }
0x179b   :  { %2560 = vmatmul.msk.bf16.vlgmr.msra.gmra.mxu0 %vm407_vm14, %v1532_v23 }
0x179c   :  { %1886 = vmatpush.bf16.msra.mxu0 %v3485_v28 }
0x17a0   :  { %1887 = vmatpush.bf16.msra.mxu0 %v3501_v13 }
0x1801   :  { %v1566_v63 = vpop.f32.mrf.mxu1 }
0x1802   :  { %v1570_v29 = vadd.f32 %v1566_v63, %v3542_v18 }
0x1804   :  { %2791 = vtanh.f32 %v1570_v29  ;;  %v1593_v10 = vmul.f32 0.5, %v1570_v29 }
0x1809   :  { %v1568_v19 = vpop.f32.mrf.mxu1 }
0x180a   :  { %v2792_v15 = vpop.eup %2791 }
0x180b   :  { %1600 = vrot.lane.b32.xlu2 %v2792_v15, %s3001_s30 }
0x1818   :  { %v1545_v20 = vpop.f32.mrf.mxu0 }
0x1819   :  { %v1549_v21 = vadd.f32 %v1545_v20, %v3530_v6 }
0x181b   :  { %2793 = vtanh.f32 %v1549_v21  ;;  %v1571_v53 = vmul.f32 0.5, %v1549_v21 }
0x181c   :  { %2795 = vtanh.f32 %v1593_v10 }
0x181d   :  { %2797 = vtanh.f32 %v1571_v53 }
0x1820   :  { %v1547_v25 = vpop.f32.mrf.mxu0 }
0x1821   :  { %v2794_v26 = vpop.eup %2793 }
0x1822   :  { %1578 = vrot.lane.b32.xlu1 %v2794_v26, %s3001_s30  ;;  %v2796_v30 = vpop.eup %2795 }
0x1823   :  { %v1595_v31 = vadd.f32 1.0, %v2796_v30  ;;  %v2798_v47 = vpop.eup %2797 }
0x1824   :  { %v1573_v41 = vadd.f32 1.0, %v2798_v47 }
0x1825   :  { %v1596_v34 = vmul.f32 0.5, %v1595_v31 }
0x1826   :  { %v1574_v36 = vmul.f32 0.5, %v1573_v41 }
0x1827   :  { %v1598_v39 = vmul.f32 %v1596_v34, %v1522_v56 }
0x1828   :  { %v1576_v45 = vmul.f32 %v1574_v36, %v1500_v1 }
0x1865   :  { %v1601_v35 = vpop.permute.xlu2 %1600 }
0x1866   :  { %v1603_v18 = vmul.f32 %v1601_v35, %v1596_v34 }
0x1868   :  { %1605 = vrot.lane.b32.xlu0 %v1603_v18, %s3001_s30 }
0x1894   :  { %v1579_v6 = vpop.permute.xlu1 %1578 }
0x1895   :  { %v1581_v38 = vmul.f32 %v1579_v6, %v1574_v36 }
0x1897   :  { %1583 = vrot.lane.b32.xlu2 %v1581_v38, %s3001_s30 }
0x18da   :  { %v1606_v43 = vpop.permute.xlu0 %1605 }
0x18db   :  { %v1608_v5 = vadd.f32 %v1606_v43, %v1598_v39 }
0x18dd   :  { %2799 = vtanh.f32 %v1608_v5 }
0x18e3   :  { %v2800_v4 = vpop.eup %2799 }
0x18e4   :  { %1611 = vrot.lane.b32.xlu0 %v2800_v4, %s3001_s30 }
0x18f1   :  { %v1584_v37 = vpop.permute.xlu2 %1583 }
0x18f2   :  { %v1586_v52 = vadd.f32 %v1584_v37, %v1576_v45 }
0x18f4   :  { %2801 = vtanh.f32 %v1586_v52 }
0x18fa   :  { %v2802_v42 = vpop.eup %2801 }
0x18fb   :  { %1589 = vrot.lane.b32.xlu2 %v2802_v42, %s3001_s30 }
0x1955   :  { %v1590_v11 = vpop.permute.xlu2 %1589 }
0x1956   :  { %v1612_v33 = vpop.permute.xlu0 %1611  ;;  %v3606_v49 = vmul.f32 %v1590_v11, %v1574_v36 }
0x1957   :  { %v3608_v46 = vmul.f32 %v1612_v33, %v1596_v34 }
0x1958   :  { %v1615_v40 = vpack.c.bf16 %v3606_v49, %v3606_v49 }
0x1959   :  { %v1636_v55 = vpack.c.bf16 %v3608_v46, %v3608_v46 }
0x195a   :  { %1617 = vrot.lane.b32.xlu0 %v1615_v40, %s2990_s21 }
0x195b   :  { %1638 = vrot.lane.b32.xlu1 %v1636_v55, %s2990_s21 }
0x19cc   :  { %v1618_v1 = vpop.permute.xlu0 %1617 }
0x19cd   :  { %v1639_v58 = vpop.permute.xlu1 %1638  ;;  %2562 = vmatmul.msk.bf16.vlgmr.msra.gmra.mxu2 %vm407_vm14, %v1618_v1 }
0x19ce   :  { %2563 = vmatmul.msk.bf16.vlgmr.msra.gmra.mxu3 %vm407_vm14, %v1639_v58  ;;  %1972 = vmatpush.bf16.msra.mxu2 %v3485_v28 }
0x19cf   :  { %1993 = vmatpush.bf16.msra.mxu3 %v3481_v27 }
0x19d2   :  { %1973 = vmatpush.bf16.msra.mxu2 %v3501_v13 }
0x19d3   :  { %1994 = vmatpush.bf16.msra.mxu3 %v3491_v16 }
0x1a50   :  { %v1631_v56 = vpop.f32.mrf.mxu2 }
0x1a51   :  { %v1635_v57 = vadd.f32 %v1631_v56, %v3534_v2  ;;  %v1652_v62 = vpop.f32.mrf.mxu3 }
0x1a52   :  { %v1656_v61 = vadd.f32 %v1652_v62, %v3538_v50 }
0x1a53   :  { %2803 = vtanh.f32 %v1635_v57  ;;  %v1657_v27 = vmul.f32 0.5, %v1635_v57 }
0x1a54   :  { %2805 = vtanh.f32 %v1656_v61  ;;  %v1679_v28 = vmul.f32 0.5, %v1656_v61 }
0x1a55   :  { %2807 = vtanh.f32 %v1657_v27 }
0x1a56   :  { %2809 = vtanh.f32 %v1679_v28 }
0x1a58   :  { %v1633_v9 = vpop.f32.mrf.mxu2 }
0x1a59   :  { %v2804_v59 = vpop.eup %2803  ;;  %v1654_v12 = vpop.f32.mrf.mxu3 }
0x1a5a   :  { %v2806_v32 = vpop.eup %2805  ;;  %1664 = vrot.lane.b32.xlu0 %v2804_v59, %s3001_s30 }
0x1a5b   :  { %1686 = vrot.lane.b32.xlu1 %v2806_v32, %s3001_s30  ;;  %v2808_v16 = vpop.eup %2807 }
0x1a5c   :  { %v2810_v13 = vpop.eup %2809  ;;  %v1659_v2 = vadd.f32 1.0, %v2808_v16 }
0x1a5d   :  { %v1681_v23 = vadd.f32 1.0, %v2810_v13 }
0x1a5e   :  { %v1660_v63 = vmul.f32 0.5, %v1659_v2 }
0x1a5f   :  { %v1682_v50 = vmul.f32 0.5, %v1681_v23 }
0x1a60   :  { %v1662_v30 = vmul.f32 %v1660_v63, %v1586_v52 }
0x1a61   :  { %v1684_v21 = vmul.f32 %v1682_v50, %v1608_v5 }
0x1acc   :  { %v1665_v29 = vpop.permute.xlu0 %1664 }
0x1acd   :  { %v1687_v19 = vpop.permute.xlu1 %1686  ;;  %v1667_v15 = vmul.f32 %v1665_v29, %v1660_v63 }
0x1ace   :  { %v1689_v20 = vmul.f32 %v1687_v19, %v1682_v50 }
0x1acf   :  { %1669 = vrot.lane.b32.xlu1 %v1667_v15, %s3001_s30 }
0x1ad0   :  { %1691 = vrot.lane.b32.xlu2 %v1689_v20, %s3001_s30 }
0x1b2a   :  { %v1692_v25 = vpop.permute.xlu2 %1691 }
0x1b2b   :  { %v1694_v26 = vadd.f32 %v1692_v25, %v1684_v21 }
0x1b2d   :  { %2811 = vtanh.f32 %v1694_v26 }
0x1b33   :  { %v2812_v10 = vpop.eup %2811 }
0x1b34   :  { %1697 = vrot.lane.b32.xlu2 %v2812_v10, %s3001_s30 }
0x1b41   :  { %v1670_v31 = vpop.permute.xlu1 %1669 }
0x1b42   :  { %v1672_v34 = vadd.f32 %v1670_v31, %v1662_v30 }
0x1b44   :  { %2813 = vtanh.f32 %v1672_v34 }
0x1b4a   :  { %v2814_v35 = vpop.eup %2813 }
0x1b4b   :  { %1675 = vrot.lane.b32.xlu1 %v2814_v35, %s3001_s30 }
0x1b8e   :  { %v1698_v18 = vpop.permute.xlu2 %1697 }
0x1b8f   :  { %v3630_v53 = vmul.f32 %v1698_v18, %v1682_v50 }
0x1b91   :  { %v1722_v47 = vpack.c.bf16 %v3630_v53, %v3630_v53 }
0x1b93   :  { %1724 = vrot.lane.b32.xlu0 %v1722_v47, %s2990_s21 }
0x1bbd   :  { %v1676_v41 = vpop.permute.xlu1 %1675 }
0x1bbe   :  { %v3635_v36 = vmul.f32 %v1676_v41, %v1660_v63 }
0x1bc0   :  { %v1701_v6 = vpack.c.bf16 %v3635_v36, %v3635_v36 }
0x1bc2   :  { %1703 = vrot.lane.b32.xlu2 %v1701_v6, %s2990_s21 }
0x1c05   :  { %v1725_v38 = vpop.permute.xlu0 %1724 }
0x1c06   :  { %2565 = vmatmul.msk.bf16.vlgmr.msrb.gmra.mxu1 %vm407_vm14, %v1725_v38 }
0x1c1c   :  { %v1704_v39 = vpop.permute.xlu2 %1703 }
0x1c1d   :  { %2564 = vmatmul.msk.bf16.vlgmr.msrb.gmra.mxu0 %vm407_vm14, %v1704_v39 }
0x1c83   :  { %v1738_v43 = vpop.f32.mrf.mxu1 }
0x1c84   :  { %v1742_v5 = vadd.f32 %v1738_v43, %v3536_v60 }
0x1c86   :  { %2815 = vtanh.f32 %v1742_v5  ;;  %v1765_v40 = vmul.f32 0.5, %v1742_v5 }
0x1c8b   :  { %v1740_v4 = vpop.f32.mrf.mxu1 }
0x1c8c   :  { %v2816_v45 = vpop.eup %2815 }
0x1c8d   :  { %1772 = vrot.lane.b32.xlu0 %v2816_v45, %s3001_s30 }
0x1c9a   :  { %v1717_v37 = vpop.f32.mrf.mxu0 }
0x1c9b   :  { %v1721_v52 = vadd.f32 %v1717_v37, %v3540_v51 }
0x1c9d   :  { %2817 = vtanh.f32 %v1721_v52  ;;  %v1743_v33 = vmul.f32 0.5, %v1721_v52 }
0x1c9f   :  { %2819 = vtanh.f32 %v1743_v33 }
0x1ca0   :  { %2821 = vtanh.f32 %v1765_v40 }
0x1ca2   :  { %v1719_v42 = vpop.f32.mrf.mxu0 }
0x1ca3   :  { %v2818_v11 = vpop.eup %2817 }
0x1ca4   :  { %1750 = vrot.lane.b32.xlu2 %v2818_v11, %s3001_s30 }
0x1ca5   :  { %v2820_v55 = vpop.eup %2819 }
0x1ca6   :  { %v2822_v1 = vpop.eup %2821  ;;  %v1745_v60 = vadd.f32 1.0, %v2820_v55 }
0x1ca7   :  { %v1767_v58 = vadd.f32 1.0, %v2822_v1 }
0x1ca8   :  { %v1746_v56 = vmul.f32 0.5, %v1745_v60 }
0x1ca9   :  { %v1768_v57 = vmul.f32 0.5, %v1767_v58 }
0x1caa   :  { %v1748_v51 = vmul.f32 %v1746_v56, %v1672_v34 }
0x1cab   :  { %v1770_v12 = vmul.f32 %v1768_v57, %v1694_v26 }
0x1cfe   :  { %v1751_v62 = vpop.permute.xlu2 %1750 }
0x1cff   :  { %v1773_v61 = vpop.permute.xlu0 %1772  ;;  %v1753_v9 = vmul.f32 %v1751_v62, %v1746_v56 }
0x1d00   :  { %v1775_v59 = vmul.f32 %v1773_v61, %v1768_v57 }
0x1d01   :  { %1755 = vrot.lane.b32.xlu0 %v1753_v9, %s3001_s30 }
0x1d02   :  { %1777 = vrot.lane.b32.xlu1 %v1775_v59, %s3001_s30 }
0x1d73   :  { %v1756_v32 = vpop.permute.xlu0 %1755 }
0x1d74   :  { %v1778_v27 = vpop.permute.xlu1 %1777  ;;  %v1758_v28 = vadd.f32 %v1756_v32, %v1748_v51 }
0x1d75   :  { %v1780_v16 = vadd.f32 %v1778_v27, %v1770_v12 }
0x1d76   :  { %2823 = vtanh.f32 %v1758_v28 }
0x1d77   :  { %2825 = vtanh.f32 %v1780_v16 }
0x1d7c   :  { %v2824_v13 = vpop.eup %2823 }
0x1d7d   :  { %v2826_v2 = vpop.eup %2825  ;;  %1761 = vrot.lane.b32.xlu0 %v2824_v13, %s3001_s30 }
0x1d7e   :  { %1783 = vrot.lane.b32.xlu1 %v2826_v2, %s3001_s30 }
0x1def   :  { %v1762_v23 = vpop.permute.xlu0 %1761 }
0x1df0   :  { %v1784_v63 = vpop.permute.xlu1 %1783  ;;  %v3650_v50 = vmul.f32 %v1762_v23, %v1746_v56 }
0x1df1   :  { %v3652_v29 = vmul.f32 %v1784_v63, %v1768_v57 }
0x1df2   :  { %v1787_v19 = vpack.c.bf16 %v3650_v50, %v3650_v50 }
0x1df3   :  { %v1808_v15 = vpack.c.bf16 %v3652_v29, %v3652_v29 }
0x1df4   :  { %1789 = vrot.lane.b32.xlu1 %v1787_v19, %s2990_s21 }
0x1df5   :  { %1810 = vrot.lane.b32.xlu2 %v1808_v15, %s2990_s21 }
0x1e4f   :  { %v1811_v20 = vpop.permute.xlu2 %1810 }
0x1e50   :  { %2567 = vmatmul.msk.bf16.vlgmr.msrb.gmra.mxu3 %vm407_vm14, %v1811_v20 }
0x1e66   :  { %v1790_v21 = vpop.permute.xlu1 %1789 }
0x1e67   :  { %2566 = vmatmul.msk.bf16.vlgmr.msrb.gmra.mxu2 %vm407_vm14, %v1790_v21 }
0x1ed3   :  { %v1824_v25 = vpop.f32.mrf.mxu3 }
0x1ed4   :  { %v1828_v26 = vadd.f32 %v1824_v25, %v3532_v54 }
0x1ed6   :  { %2827 = vtanh.f32 %v1828_v26  ;;  %v1851_v47 = vmul.f32 0.5, %v1828_v26 }
0x1edb   :  { %v1826_v10 = vpop.f32.mrf.mxu3 }
0x1edc   :  { %v2828_v30 = vpop.eup %2827 }
0x1edd   :  { %1858 = vrot.lane.b32.xlu2 %v2828_v30, %s3001_s30 }
0x1eea   :  { %v1803_v31 = vpop.f32.mrf.mxu2 }
0x1eeb   :  { %v1807_v34 = vadd.f32 %v1803_v31, %v3544_v8 }
0x1eed   :  { %2829 = vtanh.f32 %v1807_v34  ;;  %v1829_v43 = vmul.f32 0.5, %v1807_v34 }
0x1eee   :  { %2831 = vtanh.f32 %v1851_v47 }
0x1eef   :  { %2833 = vtanh.f32 %v1829_v43 }
0x1ef2   :  { %v1805_v35 = vpop.f32.mrf.mxu2 }
0x1ef3   :  { %v2830_v18 = vpop.eup %2829 }
0x1ef4   :  { %1836 = vrot.lane.b32.xlu1 %v2830_v18, %s3001_s30  ;;  %v2832_v41 = vpop.eup %2831 }
0x1ef5   :  { %v1853_v6 = vadd.f32 1.0, %v2832_v41  ;;  %v2834_v5 = vpop.eup %2833 }
0x1ef6   :  { %v1831_v4 = vadd.f32 1.0, %v2834_v5 }
0x1ef7   :  { %v1854_v38 = vmul.f32 0.5, %v1853_v6 }
0x1ef8   :  { %v1832_v45 = vmul.f32 0.5, %v1831_v4 }
0x1ef9   :  { %v1856_v52 = vmul.f32 %v1854_v38, %v1780_v16 }
0x1efa   :  { %v1834_v40 = vmul.f32 %v1832_v45, %v1758_v28 }
0x1f37   :  { %v1859_v39 = vpop.permute.xlu2 %1858 }
0x1f38   :  { %v1861_v54 = vmul.f32 %v1859_v39, %v1854_v38 }
0x1f3a   :  { %1863 = vrot.lane.b32.xlu0 %v1861_v54, %s3001_s30 }
0x1f66   :  { %v1837_v8 = vpop.permute.xlu1 %1836 }
0x1f67   :  { %v1839_v37 = vmul.f32 %v1837_v8, %v1832_v45 }
0x1f69   :  { %1841 = vrot.lane.b32.xlu2 %v1839_v37, %s3001_s30 }
0x1fac   :  { %v1864_v42 = vpop.permute.xlu0 %1863 }
0x1fad   :  { %v1866_v11 = vadd.f32 %v1864_v42, %v1856_v52 }
0x1faf   :  { %2835 = vtanh.f32 %v1866_v11 }
0x1fb5   :  { %v2836_v33 = vpop.eup %2835 }
0x1fb6   :  { %1869 = vrot.lane.b32.xlu0 %v2836_v33, %s3001_s30 }
0x1fc3   :  { %v1842_v55 = vpop.permute.xlu2 %1841 }
0x1fc4   :  { %v1844_v1 = vadd.f32 %v1842_v55, %v1834_v40 }
0x1fc6   :  { %2837 = vtanh.f32 %v1844_v1 }
0x1fcc   :  { %v2838_v60 = vpop.eup %2837 }
0x1fcd   :  { %1847 = vrot.lane.b32.xlu2 %v2838_v60, %s3001_s30 }
0x2027   :  { %v1848_v58 = vpop.permute.xlu2 %1847 }
0x2028   :  { %v3670_v56 = vmul.f32 %v1848_v58, %v1832_v45  ;;  %v1870_v57 = vpop.permute.xlu0 %1869 }
0x2029   :  { %v3672_v62 = vmul.f32 %v1870_v57, %v1854_v38 }
0x202a   :  { %v1873_v61 = vpack.c.bf16 %v3670_v56, %v3670_v56 }
0x202b   :  { %v1894_v9 = vpack.c.bf16 %v3672_v62, %v3672_v62 }
0x202c   :  { %1875 = vrot.lane.b32.xlu0 %v1873_v61, %s2990_s21 }
0x202d   :  { %1896 = vrot.lane.b32.xlu1 %v1894_v9, %s2990_s21 }
0x209e   :  { %v1876_v59 = vpop.permute.xlu0 %1875 }
0x209f   :  { %v1897_v51 = vpop.permute.xlu1 %1896  ;;  %2568 = vmatmul.msk.bf16.vlgmr.msra.gmra.mxu0 %vm407_vm14, %v1876_v59 }
0x20a0   :  { %2569 = vmatmul.msk.bf16.vlgmr.msra.gmra.mxu1 %vm407_vm14, %v1897_v51 }
0x211c   :  { %v1889_v12 = vpop.f32.mrf.mxu0 }
0x211d   :  { %v1893_v32 = vadd.f32 %v1889_v12, %v3548_v22  ;;  %v1910_v27 = vpop.f32.mrf.mxu1 }
0x211e   :  { %v1914_v28 = vadd.f32 %v1910_v27, %v3528_v48 }
0x211f   :  { %2839 = vtanh.f32 %v1893_v32  ;;  %v1915_v63 = vmul.f32 0.5, %v1893_v32 }
0x2120   :  { %2841 = vtanh.f32 %v1914_v28  ;;  %v1937_v19 = vmul.f32 0.5, %v1914_v28 }
0x2121   :  { %2843 = vtanh.f32 %v1915_v63  ;;  %v2629_v63 = vld [vmem:[%s3846_s10 + $0x8] sm:$0xff] }
0x2122   :  { %2845 = vtanh.f32 %v1937_v19  ;;  %2168 = vmatpush.bf16.msrb.mxu1 %v2629_v63 }
0x2124   :  { %v1891_v16 = vpop.f32.mrf.mxu0 }
0x2125   :  { %v2840_v13 = vpop.eup %2839  ;;  %v1912_v2 = vpop.f32.mrf.mxu1 }
0x2126   :  { %v2842_v23 = vpop.eup %2841  ;;  %1922 = vrot.lane.b32.xlu0 %v2840_v13, %s3001_s30  ;;  %v2046_v2 = vpack.c.bf16 %v3635_v36, %v3606_v49 }
0x2127   :  { %1944 = vrot.lane.b32.xlu1 %v2842_v23, %s3001_s30  ;;  %v2844_v15 = vpop.eup %2843  ;;  %v2056_v23 = vpack.c.bf16 %v3558_v17, %v3584_v14 }
0x2128   :  { %v2846_v20 = vpop.eup %2845  ;;  %v1917_v22 = vadd.f32 1.0, %v2844_v15 }
0x2129   :  { %v1939_v21 = vadd.f32 1.0, %v2846_v20 }
0x212a   :  { %v1918_v25 = vmul.f32 0.5, %v1917_v22 }
0x212b   :  { %v1940_v48 = vmul.f32 0.5, %v1939_v21 }
0x212c   :  { %v1920_v41 = vmul.f32 %v1918_v25, %v1844_v1 }
0x212d   :  { %v1942_v34 = vmul.f32 %v1940_v48, %v1866_v11 }
0x2198   :  { %v1923_v26 = vpop.permute.xlu0 %1922 }
0x2199   :  { %v1945_v10 = vpop.permute.xlu1 %1944  ;;  %v1925_v30 = vmul.f32 %v1923_v26, %v1918_v25 }
0x219a   :  { %v1947_v31 = vmul.f32 %v1945_v10, %v1940_v48  ;;  %v2631_v10 = vld [vmem:[%s3847_s11 + $0x8] sm:$0xff] }
0x219b   :  { %1927 = vrot.lane.b32.xlu1 %v1925_v30, %s3001_s30  ;;  %2103 = vmatpush.bf16.msrb.mxu0 %v2631_v10 }
0x219c   :  { %1949 = vrot.lane.b32.xlu2 %v1947_v31, %s3001_s30  ;;  %v2630_v31 = vld [vmem:[%s3847_s11] sm:$0xff] }
0x219f   :  { %2104 = vmatpush.bf16.msrb.mxu0 %v2630_v31 }
0x21f6   :  { %v1950_v35 = vpop.permute.xlu2 %1949 }
0x21f7   :  { %v1952_v18 = vadd.f32 %v1950_v35, %v1942_v34  ;;  %v2054_v34 = vpack.c.bf16 %v3652_v29, %v3672_v62 }
0x21f9   :  { %2847 = vtanh.f32 %v1952_v18 }
0x21ff   :  { %v2848_v47 = vpop.eup %2847 }
0x2200   :  { %1955 = vrot.lane.b32.xlu2 %v2848_v47, %s3001_s30 }
0x220d   :  { %v1928_v6 = vpop.permute.xlu1 %1927 }
0x220e   :  { %v1930_v38 = vadd.f32 %v1928_v6, %v1920_v41 }
0x2210   :  { %2849 = vtanh.f32 %v1930_v38 }
0x2216   :  { %v2850_v39 = vpop.eup %2849 }
0x2217   :  { %1933 = vrot.lane.b32.xlu1 %v2850_v39, %s3001_s30  ;;  %v2670_v39 = vld [vmem:[%s3848_s12] ss:$0 sm:$0xff] }
0x225a   :  { %v1956_v54 = vpop.permute.xlu2 %1955 }
0x225b   :  { %v3690_v43 = vmul.f32 %v1956_v54, %v1940_v48 }
0x225d   :  { %v1980_v5 = vpack.c.bf16 %v3690_v43, %v3690_v43 }
0x225f   :  { %1982 = vrot.lane.b32.xlu0 %v1980_v5, %s2990_s21 }
0x2289   :  { %v1934_v4 = vpop.permute.xlu1 %1933 }
0x228a   :  { %v3695_v45 = vmul.f32 %v1934_v4, %v1918_v25  ;;  %v2055_v25 = vpack.c.bf16 %v3608_v46, %v3630_v53 }
0x228c   :  { %v1959_v8 = vpack.c.bf16 %v3695_v45, %v3695_v45 }
0x228e   :  { %1961 = vrot.lane.b32.xlu2 %v1959_v8, %s2990_s21 }
0x22d1   :  { %v1983_v37 = vpop.permute.xlu0 %1982 }
0x22d2   :  { %2571 = vmatmul.msk.bf16.vlgmr.msra.gmra.mxu3 %vm407_vm14, %v1983_v37 }
0x22e8   :  { %v1962_v52 = vpop.permute.xlu2 %1961 }
0x22e9   :  { %2570 = vmatmul.msk.bf16.vlgmr.msra.gmra.mxu2 %vm407_vm14, %v1962_v52 }
0x2355   :  { %v1996_v42 = vpop.f32.mrf.mxu3 }
0x2356   :  { %v2000_v11 = vadd.f32 %v1996_v42, %v3524_v44 }
0x2358   :  { %2851 = vtanh.f32 %v2000_v11  ;;  %v2023_v61 = vmul.f32 0.5, %v2000_v11 }
0x235d   :  { %v1998_v33 = vpop.f32.mrf.mxu3 }
0x235e   :  { %v2852_v40 = vpop.eup %2851 }
0x235f   :  { %2030 = vrot.lane.b32.xlu0 %v2852_v40, %s3001_s30 }
0x236c   :  { %v1975_v55 = vpop.f32.mrf.mxu2 }
0x236d   :  { %v1979_v1 = vadd.f32 %v1975_v55, %v3550_v0  ;;  %v2045_v0 = vpack.c.bf16 %v3582_v7, %v3563_v24  ;;  %v2628_v24 = vld [vmem:[%s3846_s10] sm:$0xff] }
0x236e   :  { %2169 = vmatpush.bf16.msrb.mxu1 %v2628_v24 }
0x236f   :  { %2853 = vtanh.f32 %v1979_v1  ;;  %v2001_v57 = vmul.f32 0.5, %v1979_v1 }
0x2371   :  { %2855 = vtanh.f32 %v2001_v57 }
0x2372   :  { %2857 = vtanh.f32 %v2023_v61 }
0x2374   :  { %v1977_v60 = vpop.f32.mrf.mxu2 }
0x2375   :  { %v2854_v58 = vpop.eup %2853 }
0x2376   :  { %2008 = vrot.lane.b32.xlu2 %v2854_v58, %s3001_s30 }
0x2377   :  { %v2856_v9 = vpop.eup %2855 }
0x2378   :  { %v2858_v59 = vpop.eup %2857  ;;  %v2003_v44 = vadd.f32 1.0, %v2856_v9 }
0x2379   :  { %v2025_v51 = vadd.f32 1.0, %v2858_v59 }
0x237a   :  { %v2004_v12 = vmul.f32 0.5, %v2003_v44 }
0x237b   :  { %v2026_v32 = vmul.f32 0.5, %v2025_v51 }
0x237c   :  { %v2006_v15 = vmul.f32 %v2004_v12, %v1930_v38 }
0x237d   :  { %v2028_v19 = vmul.f32 %v2026_v32, %v1952_v18  ;;  %v2047_v18 = vpack.c.bf16 %v3670_v56, %v3650_v50 }
0x23d0   :  { %v2009_v27 = vpop.permute.xlu2 %2008 }
0x23d1   :  { %v2031_v28 = vpop.permute.xlu0 %2030  ;;  %v2011_v16 = vmul.f32 %v2009_v27, %v2004_v12 }
0x23d2   :  { %v2033_v13 = vmul.f32 %v2031_v28, %v2026_v32 }
0x23d3   :  { %2013 = vrot.lane.b32.xlu0 %v2011_v16, %s3001_s30 }
0x23d4   :  { %2035 = vrot.lane.b32.xlu1 %v2033_v13, %s3001_s30 }
0x23db   :  { %2130 = vrot.lane.b32.xlu0 %v2045_v0, %s2990_s21 }
0x23e3   :  { %2132 = vrot.lane.b32.xlu0 %v2046_v2, %s2990_s21 }
0x23eb   :  { %2071 = vrot.lane.b32.xlu0 %v2056_v23, %s2990_s21 }
0x2445   :  { %v2014_v7 = vpop.permute.xlu0 %2013 }
0x2446   :  { %v2036_v49 = vpop.permute.xlu1 %2035  ;;  %v2016_v20 = vadd.f32 %v2014_v7, %v2006_v15 }
0x2447   :  { %v2038_v36 = vadd.f32 %v2036_v49, %v2028_v19 }
0x2449   :  { %2859 = vtanh.f32 %v2038_v36 }
0x244a   :  { %2861 = vtanh.f32 %v2016_v20 }
0x244d   :  { %v2131_v17 = vpop.permute.xlu0 %2130 }
0x244e   :  { %2592 = vmatmul.msk.bf16.vlgmr.msrb.gmra.mxu1 %vm407_vm14, %v2131_v17 }
0x244f   :  { %v2860_v14 = vpop.eup %2859 }
0x2450   :  { %2041 = vrot.lane.b32.xlu1 %v2860_v14, %s3001_s30  ;;  %v2862_v22 = vpop.eup %2861 }
0x2455   :  { %v2133_v21 = vpop.permute.xlu0 %2132 }
0x2458   :  { %2019 = vrot.lane.b32.xlu1 %v2862_v22, %s3001_s30 }
0x245d   :  { %v2072_v38 = vpop.permute.xlu0 %2071 }
0x245e   :  { %2593 = vmatmul.msk.bf16.gmra.mxu1 %vm407_vm14, %v2133_v21 }
0x2460   :  { %2069 = vrot.lane.b32.xlu1 %v2055_v25, %s2990_s21 }
0x24c2   :  { %v2042_v48 = vpop.permute.xlu1 %2041 }
0x24c3   :  { %v2044_v26 = vmul.f32 %v2042_v48, %v2026_v32 }
0x24c5   :  { %v2053_v30 = vpack.c.bf16 %v3690_v43, %v2044_v26 }
0x24c7   :  { %2065 = vrot.lane.b32.xlu2 %v2053_v30, %s2990_s21 }
0x24ca   :  { %v2020_v46 = vpop.permute.xlu1 %2019 }
0x24cb   :  { %v2022_v53 = vmul.f32 %v2020_v46, %v2004_v12  ;;  %v2171_v50 = vpop.f32.mrf.mxu1 }
0x24cd   :  { %v2048_v35 = vpack.c.bf16 %v2022_v53, %v3695_v45 }
0x24cf   :  { %2067 = vrot.lane.b32.xlu2 %v2054_v34, %s2990_s21  ;;  %2136 = vrot.lane.b32.xlu1 %v2048_v35, %s2990_s21 }
0x24d2   :  { %v2070_v29 = vpop.permute.xlu1 %2069 }
0x24d3   :  { %v2173_v56 = vpop.f32.mrf.mxu1 }
0x24d7   :  { %2134 = vrot.lane.b32.xlu2 %v2047_v18, %s2990_s21 }
0x24db   :  { %v2176_v45 = vpop.f32.mrf.mxu1 }
0x24e3   :  { %v2178_v40 = vpop.f32.mrf.mxu1 }
0x2521   :  { %v2066_v47 = vpop.permute.xlu2 %2065 }
0x2522   :  { %2580 = vmatmul.msk.bf16.vlgmr.msrb.gmra.mxu0 %vm407_vm14, %v2066_v47 }
0x2529   :  { %v2068_v41 = vpop.permute.xlu2 %2067 }
0x2531   :  { %v2135_v6 = vpop.permute.xlu2 %2134 }
0x2532   :  { %2581 = vmatmul.msk.bf16.gmra.mxu0 %vm407_vm14, %v2068_v41  ;;  %2594 = vmatmul.msk.bf16.gmra.mxu1 %vm407_vm14, %v2135_v6 }
0x2541   :  { %v2137_v62 = vpop.permute.xlu1 %2136 }
0x2542   :  { %2582 = vmatmul.msk.bf16.gmra.mxu0 %vm407_vm14, %v2070_v29  ;;  %2595 = vmatmul.msk.bf16.gmra.mxu1 %vm407_vm14, %v2137_v62 }
0x2552   :  { %2583 = vmatmul.msk.bf16.gmra.mxu0 %vm407_vm14, %v2072_v38 }
0x259f   :  { %v2106_v54 = vpop.f32.mrf.mxu0 }
0x25a0   :  { %v2172_v43 = vadd.f32 %v2171_v50, %v2106_v54 }
0x25a2   :  { %v2195_v5 = vadd.f32 %v2670_v39, %v2172_v43 }
0x25a4   :  { %2203 = vst [vmem:[%s3849_s13] sm:$0xff] %v2195_v5  ;;  %v2212_v4 = vsel %vm2211_vm13, %v2195_v5, -1e+30 }
0x25a5   :  { %2220 = vmax.xlane.f32.xlu2 %v2212_v4 }
0x25a7   :  { %v2108_v8 = vpop.f32.mrf.mxu0 }
0x25a8   :  { %v2174_v37 = vadd.f32 %v2173_v56, %v2108_v8 }
0x25aa   :  { %v2196_v52 = vadd.f32 %v2670_v39, %v2174_v37 }
0x25ac   :  { %2204 = vst [vmem:[%s3849_s13 + $0x8] sm:$0xff] %v2196_v52  ;;  %v2213_v42 = vsel %vm2211_vm13, %v2196_v52, -1e+30 }
0x25ad   :  { %2222 = vmax.xlane.f32.xlu0 %v2213_v42 }
0x25af   :  { %v2111_v11 = vpop.f32.mrf.mxu0  ;;  %v2181_v57 = vpop.f32.mrf.mxu1 }
0x25b0   :  { %v2177_v33 = vadd.f32 %v2176_v45, %v2111_v11 }
0x25b2   :  { %v2197_v55 = vadd.f32 %v2670_v39, %v2177_v33 }
0x25b4   :  { %2205 = vst [vmem:[%s3849_s13 + $0x10] sm:$0xff] %v2197_v55  ;;  %v2214_v1 = vsel %vm2211_vm13, %v2197_v55, -1e+30 }
0x25b5   :  { %2224 = vmax.xlane.f32.xlu1 %v2214_v1 }
0x25b7   :  { %v2113_v60 = vpop.f32.mrf.mxu0  ;;  %v2183_v12 = vpop.f32.mrf.mxu1 }
0x25b8   :  { %v2179_v58 = vadd.f32 %v2178_v40, %v2113_v60 }
0x25ba   :  { %v2198_v61 = vadd.f32 %v2670_v39, %v2179_v58 }
0x25bc   :  { %2206 = vst [vmem:[%s3849_s13 + $0x18] sm:$0xff] %v2198_v61  ;;  %v2215_v9 = vsel %vm2211_vm13, %v2198_v61, -1e+30 }
0x25bd   :  { %2226 = vmax.xlane.f32.xlu2 %v2215_v9 }
0x25bf   :  { %v2116_v59 = vpop.f32.mrf.mxu0  ;;  %v2186_v0 = vpop.f32.mrf.mxu1 }
0x25c0   :  { %v2182_v44 = vadd.f32 %v2181_v57, %v2116_v59 }
0x25c2   :  { %v2199_v51 = vadd.f32 %v2670_v39, %v2182_v44 }
0x25c4   :  { %2207 = vst [vmem:[%s3849_s13 + $0x20] sm:$0xff] %v2199_v51  ;;  %v2216_v32 = vsel %vm2211_vm13, %v2199_v51, -1e+30 }
0x25c5   :  { %2228 = vmax.xlane.f32.xlu2 %v2216_v32 }
0x25c7   :  { %v2118_v27 = vpop.f32.mrf.mxu0  ;;  %v2188_v7 = vpop.f32.mrf.mxu1 }
0x25c8   :  { %v2184_v28 = vadd.f32 %v2183_v12, %v2118_v27 }
0x25ca   :  { %v2200_v16 = vadd.f32 %v2670_v39, %v2184_v28 }
0x25cc   :  { %2208 = vst [vmem:[%s3849_s13 + $0x28] sm:$0xff] %v2200_v16  ;;  %v2217_v13 = vsel %vm2211_vm13, %v2200_v16, -1e+30 }
0x25cd   :  { %2230 = vmax.xlane.f32.xlu0 %v2217_v13 }
0x25cf   :  { %v2121_v2 = vpop.f32.mrf.mxu0 }
0x25d0   :  { %v2187_v23 = vadd.f32 %v2186_v0, %v2121_v2 }
0x25d2   :  { %v2201_v63 = vadd.f32 %v2670_v39, %v2187_v23 }
0x25d4   :  { %2209 = vst [vmem:[%s3849_s13 + $0x30] sm:$0xff] %v2201_v63  ;;  %v2218_v24 = vsel %vm2211_vm13, %v2201_v63, -1e+30 }
0x25d5   :  { %2232 = vmax.xlane.f32.xlu1 %v2218_v24 }
0x25d7   :  { %v2123_v19 = vpop.f32.mrf.mxu0 }
0x25d8   :  { %v2189_v49 = vadd.f32 %v2188_v7, %v2123_v19 }
0x25da   :  { %v2202_v36 = vadd.f32 %v2670_v39, %v2189_v49 }
0x25dc   :  { %2210 = vst [vmem:[%s3849_s13 + $0x38] sm:$0xff] %v2202_v36  ;;  %v2219_v15 = vsel %vm2211_vm13, %v2202_v36, -1e+30 }
0x25dd   :  { %2234 = vmax.xlane.f32.xlu2 %v2219_v15 }
0x2618   :  { %v2221_v20 = vpop.xlane.xlu2 %2220 }
0x2619   :  { %vm2236_vm14 = vcmp.eq.f32.partialorder %v2212_v4, %v2221_v20 }
0x261a   :  { %v2244_v17 = vsel %vm2236_vm14, %v3137_v3, 128  ;;  %vm2364_vm14 = vcmask 7168  }
0x261b   :  { %v2253_v14 = vshra.s32 %v2244_v17, 16  ;;  %v2252_v52 = vand.u32 65535, %v2244_v17 }
0x261d   :  { %v2255_v22 = vcvt.s32.f32 %v2253_v14 }
0x261f   :  { %2256 = vmin.xlane.f32.xlu0 %v2255_v22 }
0x2620   :  { %v2223_v21 = vpop.xlane.xlu0 %2222 }
0x2621   :  { %vm2237_vm15 = vcmp.eq.f32.partialorder %v2213_v42, %v2223_v21  ;;  %v2254_v42 = vcvt.s32.f32 %v2252_v52 }
0x2622   :  { %v2245_v25 = vsel %vm2237_vm15, %v3137_v3, 128 }
0x2623   :  { %v2267_v48 = vshra.s32 %v2245_v25, 16  ;;  %v2266_v40 = vand.u32 65535, %v2245_v25 }
0x2625   :  { %v2269_v26 = vcvt.s32.f32 %v2267_v48  ;;  %v2268_v55 = vcvt.s32.f32 %v2266_v40 }
0x2627   :  { %2270 = vmin.xlane.f32.xlu1 %v2269_v26 }
0x2628   :  { %v2225_v10 = vpop.xlane.xlu1 %2224 }
0x2629   :  { %vm2238_vm0 = vcmp.eq.f32.partialorder %v2214_v1, %v2225_v10 }
0x262a   :  { %v2246_v30 = vsel %vm2238_vm0, %v3137_v3, 128 }
0x262b   :  { %v2281_v31 = vshra.s32 %v2246_v30, 16  ;;  %v2280_v58 = vand.u32 65535, %v2246_v30 }
0x262d   :  { %v2283_v46 = vcvt.s32.f32 %v2281_v31  ;;  %v2282_v57 = vcvt.s32.f32 %v2280_v58 }
0x262f   :  { %2284 = vmin.xlane.f32.xlu2 %v2283_v46 }
0x2630   :  { %v2227_v53 = vpop.xlane.xlu2 %2226 }
0x2631   :  { %vm2239_vm1 = vcmp.eq.f32.partialorder %v2215_v9, %v2227_v53 }
0x2632   :  { %v2247_v34 = vsel %vm2239_vm1, %v3137_v3, 128 }
0x2633   :  { %v2295_v35 = vshra.s32 %v2247_v34, 16  ;;  %v2294_v9 = vand.u32 65535, %v2247_v34 }
0x2635   :  { %v2297_v18 = vcvt.s32.f32 %v2295_v35  ;;  %v2296_v59 = vcvt.s32.f32 %v2294_v9 }
0x2637   :  { %2298 = vmin.xlane.f32.xlu0 %v2297_v18 }
0x2638   :  { %v2229_v47 = vpop.xlane.xlu2 %2228 }
0x2639   :  { %vm2240_vm2 = vcmp.eq.f32.partialorder %v2216_v32, %v2229_v47 }
0x263a   :  { %v2248_v41 = vsel %vm2240_vm2, %v3137_v3, 128 }
0x263b   :  { %v2309_v6 = vshra.s32 %v2248_v41, 16  ;;  %v2308_v12 = vand.u32 65535, %v2248_v41 }
0x263d   :  { %v2311_v29 = vcvt.s32.f32 %v2309_v6  ;;  %v2310_v32 = vcvt.s32.f32 %v2308_v12 }
0x263f   :  { %2312 = vmin.xlane.f32.xlu1 %v2311_v29 }
0x2640   :  { %v2231_v62 = vpop.xlane.xlu0 %2230 }
0x2641   :  { %vm2241_vm3 = vcmp.eq.f32.partialorder %v2217_v13, %v2231_v62 }
0x2642   :  { %v2249_v38 = vsel %vm2241_vm3, %v3137_v3, 128 }
0x2643   :  { %v2323_v50 = vshra.s32 %v2249_v38, 16  ;;  %v2322_v16 = vand.u32 65535, %v2249_v38 }
0x2645   :  { %v2325_v56 = vcvt.s32.f32 %v2323_v50  ;;  %v2324_v13 = vcvt.s32.f32 %v2322_v16 }
0x2647   :  { %2326 = vmin.xlane.f32.xlu2 %v2325_v56 }
0x2648   :  { %v2233_v39 = vpop.xlane.xlu1 %2232 }
0x2649   :  { %vm2242_vm4 = vcmp.eq.f32.partialorder %v2218_v24, %v2233_v39 }
0x264a   :  { %v2250_v54 = vsel %vm2242_vm4, %v3137_v3, 128 }
0x264b   :  { %v2337_v43 = vshra.s32 %v2250_v54, 16  ;;  %v2336_v23 = vand.u32 65535, %v2250_v54 }
0x264d   :  { %v2339_v5 = vcvt.s32.f32 %v2337_v43  ;;  %v2338_v63 = vcvt.s32.f32 %v2336_v23 }
0x264f   :  { %2340 = vmin.xlane.f32.xlu0 %v2339_v5 }
0x2650   :  { %v2235_v4 = vpop.xlane.xlu2 %2234 }
0x2651   :  { %vm2243_vm5 = vcmp.eq.f32.partialorder %v2219_v15, %v2235_v4 }
0x2652   :  { %v2251_v45 = vsel %vm2243_vm5, %v3137_v3, 128 }
0x2653   :  { %v2351_v8 = vshra.s32 %v2251_v45, 16  ;;  %v2350_v19 = vand.u32 65535, %v2251_v45 }
0x2655   :  { %v2353_v37 = vcvt.s32.f32 %v2351_v8  ;;  %v2352_v49 = vcvt.s32.f32 %v2350_v19 }
0x2657   :  { %2354 = vmin.xlane.f32.xlu1 %v2353_v37 }
0x2692   :  { %v2257_v11 = vpop.xlane.xlu0 %2256 }
0x2693   :  { %vm2258_vm6 = vcmp.eq.f32.partialorder %v2255_v22, %v2257_v11  ;;  %v2263_v20 = vcvt.f32.s32 %v2257_v11 }
0x2694   :  { %v2259_v33 = vsel %vm2258_vm6, %v2254_v42, inf }
0x2695   :  { %2260 = vmin.xlane.f32.xlu2 %v2259_v33  ;;  %v2264_v14 = vshll.u32 %v2263_v20, 16 }
0x269a   :  { %v2271_v1 = vpop.xlane.xlu1 %2270 }
0x269b   :  { %vm2272_vm7 = vcmp.eq.f32.partialorder %v2269_v26, %v2271_v1  ;;  %v2277_v25 = vcvt.f32.s32 %v2271_v1 }
0x269c   :  { %v2273_v60 = vsel %vm2272_vm7, %v2268_v55, inf }
0x269d   :  { %2274 = vmin.xlane.f32.xlu0 %v2273_v60  ;;  %v2278_v26 = vshll.u32 %v2277_v25, 16 }
0x26a2   :  { %v2285_v61 = vpop.xlane.xlu2 %2284 }
0x26a3   :  { %vm2286_vm8 = vcmp.eq.f32.partialorder %v2283_v46, %v2285_v61  ;;  %v2291_v31 = vcvt.f32.s32 %v2285_v61 }
0x26a4   :  { %v2287_v3 = vsel %vm2286_vm8, %v2282_v57, inf }
0x26a5   :  { %2288 = vmin.xlane.f32.xlu1 %v2287_v3  ;;  %v2292_v53 = vshll.u32 %v2291_v31, 16 }
0x26aa   :  { %v2299_v44 = vpop.xlane.xlu0 %2298 }
0x26ab   :  { %vm2300_vm9 = vcmp.eq.f32.partialorder %v2297_v18, %v2299_v44  ;;  %v2305_v18 = vcvt.f32.s32 %v2299_v44 }
0x26ac   :  { %v2301_v51 = vsel %vm2300_vm9, %v2296_v59, inf }
0x26ad   :  { %2302 = vmin.xlane.f32.xlu2 %v2301_v51  ;;  %v2306_v41 = vshll.u32 %v2305_v18, 16 }
0x26b2   :  { %v2313_v27 = vpop.xlane.xlu1 %2312 }
0x26b3   :  { %vm2314_vm10 = vcmp.eq.f32.partialorder %v2311_v29, %v2313_v27  ;;  %v2319_v62 = vcvt.f32.s32 %v2313_v27 }
0x26b4   :  { %v2315_v28 = vsel %vm2314_vm10, %v2310_v32, inf }
0x26b5   :  { %2316 = vmin.xlane.f32.xlu0 %v2315_v28  ;;  %v2320_v50 = vshll.u32 %v2319_v62, 16 }
0x26ba   :  { %v2327_v0 = vpop.xlane.xlu2 %2326 }
0x26bb   :  { %vm2328_vm11 = vcmp.eq.f32.partialorder %v2325_v56, %v2327_v0  ;;  %v2333_v54 = vcvt.f32.s32 %v2327_v0 }
0x26bc   :  { %v2329_v2 = vsel %vm2328_vm11, %v2324_v13, inf }
0x26bd   :  { %2330 = vmin.xlane.f32.xlu1 %v2329_v2 }
0x26c2   :  { %v2341_v24 = vpop.xlane.xlu0 %2340 }
0x26c3   :  { %vm2342_vm12 = vcmp.eq.f32.partialorder %v2339_v5, %v2341_v24  ;;  %v2334_v5 = vshll.u32 %v2333_v54, 16  ;;  %v2347_v8 = vcvt.f32.s32 %v2341_v24 }
0x26c4   :  { %v2343_v7 = vsel %vm2342_vm12, %v2338_v63, inf }
0x26c5   :  { %2344 = vmin.xlane.f32.xlu2 %v2343_v7  ;;  %v2348_v52 = vshll.u32 %v2347_v8, 16 }
0x26ca   :  { %v2355_v36 = vpop.xlane.xlu1 %2354 }
0x26cb   :  { %vm2356_vm13 = vcmp.eq.f32.partialorder %v2353_v37, %v2355_v36  ;;  %v2361_v33 = vcvt.f32.s32 %v2355_v36 }
0x26cc   :  { %v2357_v15 = vsel %vm2356_vm13, %v2352_v49, inf }
0x26cd   :  { %2358 = vmin.xlane.f32.xlu0 %v2357_v15  ;;  %v2362_v55 = vshll.u32 %v2361_v33, 16 }
0x2708   :  { %v2261_v17 = vpop.xlane.xlu2 %2260 }
0x2709   :  { %v2262_v22 = vcvt.f32.s32 %v2261_v17 }
0x270b   :  { %v2265_v21 = vadd.s32 %v2264_v14, %v2262_v22 }
0x270d   :  { %2365 = vst.msk [vmem:[%s3850_s14] sm:$0xff] %vm2364_vm14, %v2265_v21 }
0x2710   :  { %v2275_v48 = vpop.xlane.xlu0 %2274 }
0x2711   :  { %v2276_v10 = vcvt.f32.s32 %v2275_v48 }
0x2713   :  { %v2279_v30 = vadd.s32 %v2278_v26, %v2276_v10 }
0x2715   :  { %2366 = vst.msk [vmem:[%s3850_s14 + $0x8] sm:$0xff] %vm2364_vm14, %v2279_v30 }
0x2718   :  { %v2289_v46 = vpop.xlane.xlu1 %2288 }
0x2719   :  { %v2290_v34 = vcvt.f32.s32 %v2289_v46 }
0x271b   :  { %v2293_v35 = vadd.s32 %v2292_v53, %v2290_v34 }
0x271d   :  { %2367 = vst.msk [vmem:[%s3850_s14 + $0x10] sm:$0xff] %vm2364_vm14, %v2293_v35 }
0x2720   :  { %v2303_v47 = vpop.xlane.xlu2 %2302 }
0x2721   :  { %v2304_v6 = vcvt.f32.s32 %v2303_v47 }
0x2723   :  { %v2307_v29 = vadd.s32 %v2306_v41, %v2304_v6 }
0x2725   :  { %2368 = vst.msk [vmem:[%s3850_s14 + $0x18] sm:$0xff] %vm2364_vm14, %v2307_v29 }
0x2728   :  { %v2317_v38 = vpop.xlane.xlu0 %2316 }
0x2729   :  { %v2318_v56 = vcvt.f32.s32 %v2317_v38 }
0x272b   :  { %v2321_v39 = vadd.s32 %v2320_v50, %v2318_v56 }
0x272d   :  { %2369 = vst.msk [vmem:[%s3850_s14 + $0x20] sm:$0xff] %vm2364_vm14, %v2321_v39 }
0x2730   :  { %v2331_v43 = vpop.xlane.xlu1 %2330 }
0x2731   :  { %v2332_v4 = vcvt.f32.s32 %v2331_v43 }
0x2733   :  { %v2335_v45 = vadd.s32 %v2334_v5, %v2332_v4 }
0x2735   :  { %2370 = vst.msk [vmem:[%s3850_s14 + $0x28] sm:$0xff] %vm2364_vm14, %v2335_v45 }
0x2738   :  { %v2345_v37 = vpop.xlane.xlu2 %2344 }
0x2739   :  { %v2346_v42 = vcvt.f32.s32 %v2345_v37 }
0x273b   :  { %v2349_v11 = vadd.s32 %v2348_v52, %v2346_v42 }
0x273d   :  { %2371 = vst.msk [vmem:[%s3850_s14 + $0x30] sm:$0xff] %vm2364_vm14, %v2349_v11 }
0x2740   :  { %v2359_v40 = vpop.xlane.xlu0 %2358 }
0x2741   :  { %v2360_v1 = vcvt.f32.s32 %v2359_v40 }
0x2743   :  { %v2363_v60 = vadd.s32 %v2362_v55, %v2360_v1 }
0x2745   :  { %2372 = vst.msk [vmem:[%s3850_s14 + $0x38] sm:$0xff] %vm2364_vm14, %v2363_v60 }
0x2746   :  { %2381 = vsyncpa [#allocation3], 1 }
0x2747   :  { %2382 = vsyncpa [#allocation5], 1 }
0x2748   :  { %2383 = vsyncpa [#allocation8], 1 }

</bundles_post_ra>
